<compile_context>
chip_gen: v7x
topology: tpu7x:2x2x1
jax: 0.10.0
libtpu: 0.0.40
codegen_flags: <defaults>
</compile_context>

<pallas_src>
import functools

import numpy as np

import jax
import jax.numpy as jnp
from jax.experimental import pallas as pl
from jax.experimental.pallas import tpu as pltpu


# ----------------------------------------------------------------------------
# Static operand builders (plain JAX / numpy weight preprocessing, outside the
# kernel; all shapes static).
# ----------------------------------------------------------------------------
def _build_row_select(n, h_in, k, stride, pad, dtype):
    """A_kh[n*OH+oh, n*H+h] = 1 iff h == stride*oh + kh - pad and 0 <= h < H."""
    oh_n = (h_in + 2 * pad - k) // stride + 1
    a = np.zeros((k, n * oh_n, n * h_in), np.float32)
    for kh in range(k):
        for b in range(n):
            for oh in range(oh_n):
                h = stride * oh + kh - pad
                if 0 <= h < h_in:
                    a[kh, b * oh_n + oh, b * h_in + h] = 1.0
    return jnp.asarray(a, dtype)


def _build_col_weights(weight, w_in, stride, pad, dtype):
    """B_kh[w*C+c, ow*OC+oc] = weight[oc, c, kh, w + pad - stride*ow] (else 0)."""
    oc_n, c_n, k, _ = weight.shape
    ow_n = (w_in + 2 * pad - k) // stride + 1
    kw = np.arange(w_in)[:, None] + pad - stride * np.arange(ow_n)[None, :]  # (W, OW)
    valid = jnp.asarray((kw >= 0) & (kw < k))
    kw_clipped = np.clip(kw, 0, k - 1)
    bs = []
    for kh in range(k):
        wk = weight[:, :, kh, :]                       # (OC, C, KW)
        g = wk[:, :, kw_clipped]                       # (OC, C, W, OW)
        g = jnp.where(valid[None, None], g, 0.0)
        g = jnp.transpose(g, (2, 1, 3, 0))             # (W, C, OW, OC)
        bs.append(g.reshape(w_in * c_n, ow_n * oc_n))
    return jnp.stack(bs).astype(dtype)                 # (K, W*C, OW*OC)


def _build_bn_fold(ow_n, oc_n):
    """Q[ow*OC+oc, ow'*OC+oc'] = 1 iff oc == oc' (folds width into channels)."""
    return jnp.asarray(np.tile(np.eye(oc_n, dtype=np.float32), (ow_n, ow_n)))


# ----------------------------------------------------------------------------
# Fused whole-network kernel.
# ----------------------------------------------------------------------------
def _disc_kernel(*args, cfg):
    # args = (x2d, per-layer operands..., out_ref)
    # cfg  = tuple of (taps, use_bn, m_count, act) per layer (static).
    out_ref = args[-1]
    refs = args[:-1]
    pos = 0
    h = refs[pos][...]          # (N*H, W*C) f32 activation
    pos += 1

    for taps, use_bn, m_count, act in cfg:
        a_ref = refs[pos]       # (K, N*OH, N*H)   bf16 row-selection
        b_ref = refs[pos + 1]   # (K, W*C, OW*OC)  bf16 block-Toeplitz weights
        pos += 2

        hb = h.astype(jnp.bfloat16)            # MXU operands in bf16
        acc = None
        for t in range(taps):                  # static, unrolled
            rows = jnp.dot(a_ref[t], hb, preferred_element_type=jnp.float32)
            term = jnp.dot(rows.astype(jnp.bfloat16), b_ref[t],
                           preferred_element_type=jnp.float32)
            acc = term if acc is None else acc + term
        # acc: (N*OH, OW*OC) f32, layout [n*OH+oh, ow*OC+oc]

        if use_bn:
            q_ref, g_ref, beta_ref = refs[pos], refs[pos + 1], refs[pos + 2]
            pos += 3
            inv_m = 1.0 / float(m_count)
            # single pass: sum and sum-of-squares, folded over (n, oh) rows
            # then over ow via the static 0/1 matrix Q (stays f32 on VPU/MXU).
            rsum = jnp.sum(acc, axis=0, keepdims=True)
            rsq = jnp.sum(acc * acc, axis=0, keepdims=True)
            mean = jnp.dot(rsum, q_ref[...], preferred_element_type=jnp.float32) * inv_m
            ex2 = jnp.dot(rsq, q_ref[...], preferred_element_type=jnp.float32) * inv_m
            var = ex2 - mean * mean            # biased batch variance
            scale = g_ref[...] * jax.lax.rsqrt(var + 1e-5)
            acc = (acc - mean) * scale + beta_ref[...]

        if act == "leaky":
            h = jnp.where(acc > 0, acc, 0.2 * acc)
        else:  # sigmoid (exact form so the output stays within [0, 1])
            h = 1.0 / (1.0 + jnp.exp(-acc))

    out_ref[...] = h


# ----------------------------------------------------------------------------
# Wrapper: builds the static operands and launches the single fused kernel.
# ----------------------------------------------------------------------------
_CONV_LAYERS = (
    # (weight name, k, stride, pad, (gamma, beta) or None)
    ("w1", 4, 2, 1, None),
    ("w2", 4, 2, 1, ("g2", "b2")),
    ("w3", 4, 2, 1, ("g3", "b3")),
    ("w4", 4, 2, 1, ("g4", "b4")),
    ("w5", 2, 2, 0, None),
)


def discriminator_forward(params, x):
    n, c, h, w = x.shape
    # single layout transform at the boundary: NCHW -> flattened NHWC 2-D
    x2d = jnp.transpose(x, (0, 2, 3, 1)).reshape(n * h, w * c).astype(jnp.float32)

    operands = [x2d]
    cfg = []
    for name, k, stride, pad, bn_names in _CONV_LAYERS:
        weight = params[name].astype(jnp.float32)
        oc = weight.shape[0]
        oh = (h + 2 * pad - k) // stride + 1
        ow = (w + 2 * pad - k) // stride + 1
        operands.append(_build_row_select(n, h, k, stride, pad, jnp.bfloat16))
        operands.append(_build_col_weights(weight, w, stride, pad, jnp.bfloat16))
        if bn_names is not None:
            g_name, b_name = bn_names
            operands.append(_build_bn_fold(ow, oc))
            operands.append(
                jnp.tile(params[g_name].reshape(1, oc), (1, ow)).astype(jnp.float32))
            operands.append(
                jnp.tile(params[b_name].reshape(1, oc), (1, ow)).astype(jnp.float32))
        act = "sigmoid" if name == "w5" else "leaky"
        cfg.append((k, bn_names is not None, n * oh * ow, act))
        h, w, c = oh, ow, oc

    out_rows, out_cols = n * h, w * c   # (N, 1) for 32x32 inputs

    def full_spec(shape):
        nd = len(shape)
        return pl.BlockSpec(tuple(shape), lambda i, _nd=nd: (0,) * _nd)

    kernel = functools.partial(_disc_kernel, cfg=tuple(cfg))
    out2d = pl.pallas_call(
        kernel,
        out_shape=jax.ShapeDtypeStruct((out_rows, out_cols), jnp.float32),
        grid=(1,),
        in_specs=[full_spec(op.shape) for op in operands],
        out_specs=pl.BlockSpec((out_rows, out_cols), lambda i: (0, 0)),
        compiler_params=pltpu.CompilerParams(
            dimension_semantics=("arbitrary",),
            vmem_limit_bytes=32 * 1024 * 1024,
        ),
    )(*operands)
    # output.view(-1, 1).squeeze(1)
    return out2d.reshape(-1)


# ----------------------------------------------------------------------------
# Parameters (PyTorch layouts: Conv2d OIHW, BatchNorm gamma=1 / beta=0)
# ----------------------------------------------------------------------------
def init_params(key, nc=3, ndf=16):
    ks = jax.random.split(key, 5)
    std = 0.02  # DCGAN-style init
    return {
        "w1": jax.random.normal(ks[0], (ndf, nc, 4, 4), jnp.float32) * std,
        "w2": jax.random.normal(ks[1], (ndf * 2, ndf, 4, 4), jnp.float32) * std,
        "w3": jax.random.normal(ks[2], (ndf * 4, ndf * 2, 4, 4), jnp.float32) * std,
        "w4": jax.random.normal(ks[3], (ndf * 8, ndf * 4, 4, 4), jnp.float32) * std,
        "w5": jax.random.normal(ks[4], (1, ndf * 8, 2, 2), jnp.float32) * std,
        "g2": jnp.ones((ndf * 2,), jnp.float32),
        "b2": jnp.zeros((ndf * 2,), jnp.float32),
        "g3": jnp.ones((ndf * 4,), jnp.float32),
        "b3": jnp.zeros((ndf * 4,), jnp.float32),
        "g4": jnp.ones((ndf * 8,), jnp.float32),
        "b4": jnp.zeros((ndf * 8,), jnp.float32),
    }


# ----------------------------------------------------------------------------
# Pure-JAX f32 reference (PyTorch training-mode semantics) for self-check.
# ----------------------------------------------------------------------------
def _reference_forward(params, x):
    def conv(h, wt, stride, pad):
        return jax.lax.conv_general_dilated(
            h, wt, window_strides=(stride, stride),
            padding=((pad, pad), (pad, pad)),
            dimension_numbers=("NCHW", "OIHW", "NCHW"))

    def bn(h, g, b):
        mean = jnp.mean(h, axis=(0, 2, 3), keepdims=True)
        var = jnp.mean((h - mean) ** 2, axis=(0, 2, 3), keepdims=True)
        hn = (h - mean) * jax.lax.rsqrt(var + 1e-5)
        return hn * g.reshape(1, -1, 1, 1) + b.reshape(1, -1, 1, 1)

    def leaky(h):
        return jnp.where(h > 0, h, 0.2 * h)

    h = leaky(conv(x, params["w1"], 2, 1))
    h = leaky(bn(conv(h, params["w2"], 2, 1), params["g2"], params["b2"]))
    h = leaky(bn(conv(h, params["w3"], 2, 1), params["g3"], params["b3"]))
    h = leaky(bn(conv(h, params["w4"], 2, 1), params["g4"], params["b4"]))
    h = jax.nn.sigmoid(conv(h, params["w5"], 2, 0))
    return h.reshape(-1)


if __name__ == "__main__":
    key = jax.random.PRNGKey(0)
    k_params, k_input = jax.random.split(key)

    nc, ndf = 3, 16
    batch, spatial = 2, 32  # 32x32 -> final 1x1 spatial, output shape (batch,)

    params = init_params(k_params, nc=nc, ndf=ndf)
    x = jax.random.normal(k_input, (batch, nc, spatial, spatial), jnp.float32)

    fwd = jax.jit(discriminator_forward)
    out = jax.block_until_ready(fwd(params, x))

    assert out.shape == (batch,), out.shape
    assert bool(jnp.all(jnp.isfinite(out)))
    assert bool(jnp.all((out >= 0.0) & (out <= 1.0)))  # sigmoid range

    # numerical self-check against the f32 reference (bf16 MXU tolerance)
    ref = _reference_forward(params, x)
    max_err = float(jnp.max(jnp.abs(out - ref)))
    assert max_err < 5e-2, f"mismatch vs f32 reference: max abs err {max_err}"

    print("KERNEL_OK")
</pallas_src>

<mosaic_0001>
module attributes {stable_mosaic.version = 11 : i64} {
  func.func @_disc_kernel(%arg0: i32, %arg1: memref<64x96xf32, #tpu.memory_space<vmem>>, %arg2: memref<4x32x64xbf16, #tpu.memory_space<vmem>>, %arg3: memref<4x96x256xbf16, #tpu.memory_space<vmem>>, %arg4: memref<4x16x32xbf16, #tpu.memory_space<vmem>>, %arg5: memref<4x256x256xbf16, #tpu.memory_space<vmem>>, %arg6: memref<256x256xf32, #tpu.memory_space<vmem>>, %arg7: memref<1x256xf32, #tpu.memory_space<vmem>>, %arg8: memref<1x256xf32, #tpu.memory_space<vmem>>, %arg9: memref<4x8x16xbf16, #tpu.memory_space<vmem>>, %arg10: memref<4x256x256xbf16, #tpu.memory_space<vmem>>, %arg11: memref<256x256xf32, #tpu.memory_space<vmem>>, %arg12: memref<1x256xf32, #tpu.memory_space<vmem>>, %arg13: memref<1x256xf32, #tpu.memory_space<vmem>>, %arg14: memref<4x4x8xbf16, #tpu.memory_space<vmem>>, %arg15: memref<4x256x256xbf16, #tpu.memory_space<vmem>>, %arg16: memref<256x256xf32, #tpu.memory_space<vmem>>, %arg17: memref<1x256xf32, #tpu.memory_space<vmem>>, %arg18: memref<1x256xf32, #tpu.memory_space<vmem>>, %arg19: memref<2x2x4xbf16, #tpu.memory_space<vmem>>, %arg20: memref<2x256x1xbf16, #tpu.memory_space<vmem>>, %arg21: memref<2x1xf32, #tpu.memory_space<vmem>>) attributes {dimension_semantics = [#tpu.dimension_semantics<arbitrary>], iteration_bounds = array<i64: 1>, scalar_prefetch = 0 : i64, scratch_operands = 0 : i64, tpu.core_type = #tpu.core_type<tc>, window_params = [{pipeline_mode = #tpu.pipeline_mode<synchronous>, transform_indices = @transform_0, window_bounds = array<i64: 64, 96>}, {pipeline_mode = #tpu.pipeline_mode<synchronous>, transform_indices = @transform_1, window_bounds = array<i64: 4, 32, 64>}, {pipeline_mode = #tpu.pipeline_mode<synchronous>, transform_indices = @transform_2, window_bounds = array<i64: 4, 96, 256>}, {pipeline_mode = #tpu.pipeline_mode<synchronous>, transform_indices = @transform_3, window_bounds = array<i64: 4, 16, 32>}, {pipeline_mode = #tpu.pipeline_mode<synchronous>, transform_indices = @transform_4, window_bounds = array<i64: 4, 256, 256>}, {pipeline_mode = #tpu.pipeline_mode<synchronous>, transform_indices = @transform_5, window_bounds = array<i64: 256, 256>}, {pipeline_mode = #tpu.pipeline_mode<synchronous>, transform_indices = @transform_6, window_bounds = array<i64: 1, 256>}, {pipeline_mode = #tpu.pipeline_mode<synchronous>, transform_indices = @transform_7, window_bounds = array<i64: 1, 256>}, {pipeline_mode = #tpu.pipeline_mode<synchronous>, transform_indices = @transform_8, window_bounds = array<i64: 4, 8, 16>}, {pipeline_mode = #tpu.pipeline_mode<synchronous>, transform_indices = @transform_9, window_bounds = array<i64: 4, 256, 256>}, {pipeline_mode = #tpu.pipeline_mode<synchronous>, transform_indices = @transform_10, window_bounds = array<i64: 256, 256>}, {pipeline_mode = #tpu.pipeline_mode<synchronous>, transform_indices = @transform_11, window_bounds = array<i64: 1, 256>}, {pipeline_mode = #tpu.pipeline_mode<synchronous>, transform_indices = @transform_12, window_bounds = array<i64: 1, 256>}, {pipeline_mode = #tpu.pipeline_mode<synchronous>, transform_indices = @transform_13, window_bounds = array<i64: 4, 4, 8>}, {pipeline_mode = #tpu.pipeline_mode<synchronous>, transform_indices = @transform_14, window_bounds = array<i64: 4, 256, 256>}, {pipeline_mode = #tpu.pipeline_mode<synchronous>, transform_indices = @transform_15, window_bounds = array<i64: 256, 256>}, {pipeline_mode = #tpu.pipeline_mode<synchronous>, transform_indices = @transform_16, window_bounds = array<i64: 1, 256>}, {pipeline_mode = #tpu.pipeline_mode<synchronous>, transform_indices = @transform_17, window_bounds = array<i64: 1, 256>}, {pipeline_mode = #tpu.pipeline_mode<synchronous>, transform_indices = @transform_18, window_bounds = array<i64: 2, 2, 4>}, {pipeline_mode = #tpu.pipeline_mode<synchronous>, transform_indices = @transform_19, window_bounds = array<i64: 2, 256, 1>}, {pipeline_mode = #tpu.pipeline_mode<synchronous>, transform_indices = @transform_20, window_bounds = array<i64: 2, 1>}]} {
    %c0 = arith.constant 0 : index
    %c0_0 = arith.constant 0 : index
    %0 = vector.load %arg1[%c0, %c0_0] : memref<64x96xf32, #tpu.memory_space<vmem>>, vector<64x96xf32>
    %1 = arith.truncf %0 : vector<64x96xf32> to vector<64x96xbf16>
    %c0_1 = arith.constant 0 : index
    %c0_2 = arith.constant 0 : index
    %c0_3 = arith.constant 0 : index
    %2 = vector.load %arg2[%c0_1, %c0_2, %c0_3] : memref<4x32x64xbf16, #tpu.memory_space<vmem>>, vector<1x32x64xbf16>
    %3 = vector.shape_cast %2 : vector<1x32x64xbf16> to vector<32x64xbf16>
    %cst = arith.constant dense<0.000000e+00> : vector<32x96xf32>
    %4 = tpu.matmul %3, %1, %cst {dimension_numbers = #tpu.dot_dimension_numbers<[1], [0], [0], [1], [0, 0, 1, 1], [], []>} : vector<32x64xbf16>, vector<64x96xbf16>, vector<32x96xf32> -> vector<32x96xf32>
    %5 = arith.truncf %4 : vector<32x96xf32> to vector<32x96xbf16>
    %c0_4 = arith.constant 0 : index
    %c0_5 = arith.constant 0 : index
    %c0_6 = arith.constant 0 : index
    %6 = vector.load %arg3[%c0_4, %c0_5, %c0_6] : memref<4x96x256xbf16, #tpu.memory_space<vmem>>, vector<1x96x256xbf16>
    %7 = vector.shape_cast %6 : vector<1x96x256xbf16> to vector<96x256xbf16>
    %cst_7 = arith.constant dense<0.000000e+00> : vector<32x256xf32>
    %8 = tpu.matmul %5, %7, %cst_7 {dimension_numbers = #tpu.dot_dimension_numbers<[1], [0], [0], [1], [0, 0, 1, 1], [], []>} : vector<32x96xbf16>, vector<96x256xbf16>, vector<32x256xf32> -> vector<32x256xf32>
    %c1 = arith.constant 1 : index
    %c0_8 = arith.constant 0 : index
    %c0_9 = arith.constant 0 : index
    %9 = vector.load %arg2[%c1, %c0_8, %c0_9] : memref<4x32x64xbf16, #tpu.memory_space<vmem>>, vector<1x32x64xbf16>
    %10 = vector.shape_cast %9 : vector<1x32x64xbf16> to vector<32x64xbf16>
    %cst_10 = arith.constant dense<0.000000e+00> : vector<32x96xf32>
    %11 = tpu.matmul %10, %1, %cst_10 {dimension_numbers = #tpu.dot_dimension_numbers<[1], [0], [0], [1], [0, 0, 1, 1], [], []>} : vector<32x64xbf16>, vector<64x96xbf16>, vector<32x96xf32> -> vector<32x96xf32>
    %12 = arith.truncf %11 : vector<32x96xf32> to vector<32x96xbf16>
    %c1_11 = arith.constant 1 : index
    %c0_12 = arith.constant 0 : index
    %c0_13 = arith.constant 0 : index
    %13 = vector.load %arg3[%c1_11, %c0_12, %c0_13] : memref<4x96x256xbf16, #tpu.memory_space<vmem>>, vector<1x96x256xbf16>
    %14 = vector.shape_cast %13 : vector<1x96x256xbf16> to vector<96x256xbf16>
    %cst_14 = arith.constant dense<0.000000e+00> : vector<32x256xf32>
    %15 = tpu.matmul %12, %14, %cst_14 {dimension_numbers = #tpu.dot_dimension_numbers<[1], [0], [0], [1], [0, 0, 1, 1], [], []>} : vector<32x96xbf16>, vector<96x256xbf16>, vector<32x256xf32> -> vector<32x256xf32>
    %16 = arith.addf %8, %15 : vector<32x256xf32>
    %c2 = arith.constant 2 : index
    %c0_15 = arith.constant 0 : index
    %c0_16 = arith.constant 0 : index
    %17 = vector.load %arg2[%c2, %c0_15, %c0_16] : memref<4x32x64xbf16, #tpu.memory_space<vmem>>, vector<1x32x64xbf16>
    %18 = vector.shape_cast %17 : vector<1x32x64xbf16> to vector<32x64xbf16>
    %cst_17 = arith.constant dense<0.000000e+00> : vector<32x96xf32>
    %19 = tpu.matmul %18, %1, %cst_17 {dimension_numbers = #tpu.dot_dimension_numbers<[1], [0], [0], [1], [0, 0, 1, 1], [], []>} : vector<32x64xbf16>, vector<64x96xbf16>, vector<32x96xf32> -> vector<32x96xf32>
    %20 = arith.truncf %19 : vector<32x96xf32> to vector<32x96xbf16>
    %c2_18 = arith.constant 2 : index
    %c0_19 = arith.constant 0 : index
    %c0_20 = arith.constant 0 : index
    %21 = vector.load %arg3[%c2_18, %c0_19, %c0_20] : memref<4x96x256xbf16, #tpu.memory_space<vmem>>, vector<1x96x256xbf16>
    %22 = vector.shape_cast %21 : vector<1x96x256xbf16> to vector<96x256xbf16>
    %cst_21 = arith.constant dense<0.000000e+00> : vector<32x256xf32>
    %23 = tpu.matmul %20, %22, %cst_21 {dimension_numbers = #tpu.dot_dimension_numbers<[1], [0], [0], [1], [0, 0, 1, 1], [], []>} : vector<32x96xbf16>, vector<96x256xbf16>, vector<32x256xf32> -> vector<32x256xf32>
    %24 = arith.addf %16, %23 : vector<32x256xf32>
    %c3 = arith.constant 3 : index
    %c0_22 = arith.constant 0 : index
    %c0_23 = arith.constant 0 : index
    %25 = vector.load %arg2[%c3, %c0_22, %c0_23] : memref<4x32x64xbf16, #tpu.memory_space<vmem>>, vector<1x32x64xbf16>
    %26 = vector.shape_cast %25 : vector<1x32x64xbf16> to vector<32x64xbf16>
    %cst_24 = arith.constant dense<0.000000e+00> : vector<32x96xf32>
    %27 = tpu.matmul %26, %1, %cst_24 {dimension_numbers = #tpu.dot_dimension_numbers<[1], [0], [0], [1], [0, 0, 1, 1], [], []>} : vector<32x64xbf16>, vector<64x96xbf16>, vector<32x96xf32> -> vector<32x96xf32>
    %28 = arith.truncf %27 : vector<32x96xf32> to vector<32x96xbf16>
    %c3_25 = arith.constant 3 : index
    %c0_26 = arith.constant 0 : index
    %c0_27 = arith.constant 0 : index
    %29 = vector.load %arg3[%c3_25, %c0_26, %c0_27] : memref<4x96x256xbf16, #tpu.memory_space<vmem>>, vector<1x96x256xbf16>
    %30 = vector.shape_cast %29 : vector<1x96x256xbf16> to vector<96x256xbf16>
    %cst_28 = arith.constant dense<0.000000e+00> : vector<32x256xf32>
    %31 = tpu.matmul %28, %30, %cst_28 {dimension_numbers = #tpu.dot_dimension_numbers<[1], [0], [0], [1], [0, 0, 1, 1], [], []>} : vector<32x96xbf16>, vector<96x256xbf16>, vector<32x256xf32> -> vector<32x256xf32>
    %32 = arith.addf %24, %31 : vector<32x256xf32>
    %cst_29 = arith.constant 0.000000e+00 : f32
    %33 = vector.broadcast %cst_29 : f32 to vector<32x256xf32>
    %34 = arith.cmpf ogt, %32, %33 : vector<32x256xf32>
    %cst_30 = arith.constant 2.000000e-01 : f32
    %35 = vector.broadcast %cst_30 : f32 to vector<32x256xf32>
    %36 = arith.mulf %35, %32 : vector<32x256xf32>
    %37 = arith.select %34, %32, %36 : vector<32x256xi1>, vector<32x256xf32>
    %38 = arith.truncf %37 : vector<32x256xf32> to vector<32x256xbf16>
    %c0_31 = arith.constant 0 : index
    %c0_32 = arith.constant 0 : index
    %c0_33 = arith.constant 0 : index
    %39 = vector.load %arg4[%c0_31, %c0_32, %c0_33] : memref<4x16x32xbf16, #tpu.memory_space<vmem>>, vector<1x16x32xbf16>
    %40 = vector.shape_cast %39 : vector<1x16x32xbf16> to vector<16x32xbf16>
    %cst_34 = arith.constant dense<0.000000e+00> : vector<16x256xf32>
    %41 = tpu.matmul %40, %38, %cst_34 {dimension_numbers = #tpu.dot_dimension_numbers<[1], [0], [0], [1], [0, 0, 1, 1], [], []>} : vector<16x32xbf16>, vector<32x256xbf16>, vector<16x256xf32> -> vector<16x256xf32>
    %42 = arith.truncf %41 : vector<16x256xf32> to vector<16x256xbf16>
    %c0_35 = arith.constant 0 : index
    %c0_36 = arith.constant 0 : index
    %c0_37 = arith.constant 0 : index
    %43 = vector.load %arg5[%c0_35, %c0_36, %c0_37] : memref<4x256x256xbf16, #tpu.memory_space<vmem>>, vector<1x256x256xbf16>
    %44 = vector.shape_cast %43 : vector<1x256x256xbf16> to vector<256x256xbf16>
    %cst_38 = arith.constant dense<0.000000e+00> : vector<16x256xf32>
    %45 = tpu.matmul %42, %44, %cst_38 {dimension_numbers = #tpu.dot_dimension_numbers<[1], [0], [0], [1], [0, 0, 1, 1], [], []>} : vector<16x256xbf16>, vector<256x256xbf16>, vector<16x256xf32> -> vector<16x256xf32>
    %c1_39 = arith.constant 1 : index
    %c0_40 = arith.constant 0 : index
    %c0_41 = arith.constant 0 : index
    %46 = vector.load %arg4[%c1_39, %c0_40, %c0_41] : memref<4x16x32xbf16, #tpu.memory_space<vmem>>, vector<1x16x32xbf16>
    %47 = vector.shape_cast %46 : vector<1x16x32xbf16> to vector<16x32xbf16>
    %cst_42 = arith.constant dense<0.000000e+00> : vector<16x256xf32>
    %48 = tpu.matmul %47, %38, %cst_42 {dimension_numbers = #tpu.dot_dimension_numbers<[1], [0], [0], [1], [0, 0, 1, 1], [], []>} : vector<16x32xbf16>, vector<32x256xbf16>, vector<16x256xf32> -> vector<16x256xf32>
    %49 = arith.truncf %48 : vector<16x256xf32> to vector<16x256xbf16>
    %c1_43 = arith.constant 1 : index
    %c0_44 = arith.constant 0 : index
    %c0_45 = arith.constant 0 : index
    %50 = vector.load %arg5[%c1_43, %c0_44, %c0_45] : memref<4x256x256xbf16, #tpu.memory_space<vmem>>, vector<1x256x256xbf16>
    %51 = vector.shape_cast %50 : vector<1x256x256xbf16> to vector<256x256xbf16>
    %cst_46 = arith.constant dense<0.000000e+00> : vector<16x256xf32>
    %52 = tpu.matmul %49, %51, %cst_46 {dimension_numbers = #tpu.dot_dimension_numbers<[1], [0], [0], [1], [0, 0, 1, 1], [], []>} : vector<16x256xbf16>, vector<256x256xbf16>, vector<16x256xf32> -> vector<16x256xf32>
    %53 = arith.addf %45, %52 : vector<16x256xf32>
    %c2_47 = arith.constant 2 : index
    %c0_48 = arith.constant 0 : index
    %c0_49 = arith.constant 0 : index
    %54 = vector.load %arg4[%c2_47, %c0_48, %c0_49] : memref<4x16x32xbf16, #tpu.memory_space<vmem>>, vector<1x16x32xbf16>
    %55 = vector.shape_cast %54 : vector<1x16x32xbf16> to vector<16x32xbf16>
    %cst_50 = arith.constant dense<0.000000e+00> : vector<16x256xf32>
    %56 = tpu.matmul %55, %38, %cst_50 {dimension_numbers = #tpu.dot_dimension_numbers<[1], [0], [0], [1], [0, 0, 1, 1], [], []>} : vector<16x32xbf16>, vector<32x256xbf16>, vector<16x256xf32> -> vector<16x256xf32>
    %57 = arith.truncf %56 : vector<16x256xf32> to vector<16x256xbf16>
    %c2_51 = arith.constant 2 : index
    %c0_52 = arith.constant 0 : index
    %c0_53 = arith.constant 0 : index
    %58 = vector.load %arg5[%c2_51, %c0_52, %c0_53] : memref<4x256x256xbf16, #tpu.memory_space<vmem>>, vector<1x256x256xbf16>
    %59 = vector.shape_cast %58 : vector<1x256x256xbf16> to vector<256x256xbf16>
    %cst_54 = arith.constant dense<0.000000e+00> : vector<16x256xf32>
    %60 = tpu.matmul %57, %59, %cst_54 {dimension_numbers = #tpu.dot_dimension_numbers<[1], [0], [0], [1], [0, 0, 1, 1], [], []>} : vector<16x256xbf16>, vector<256x256xbf16>, vector<16x256xf32> -> vector<16x256xf32>
    %61 = arith.addf %53, %60 : vector<16x256xf32>
    %c3_55 = arith.constant 3 : index
    %c0_56 = arith.constant 0 : index
    %c0_57 = arith.constant 0 : index
    %62 = vector.load %arg4[%c3_55, %c0_56, %c0_57] : memref<4x16x32xbf16, #tpu.memory_space<vmem>>, vector<1x16x32xbf16>
    %63 = vector.shape_cast %62 : vector<1x16x32xbf16> to vector<16x32xbf16>
    %cst_58 = arith.constant dense<0.000000e+00> : vector<16x256xf32>
    %64 = tpu.matmul %63, %38, %cst_58 {dimension_numbers = #tpu.dot_dimension_numbers<[1], [0], [0], [1], [0, 0, 1, 1], [], []>} : vector<16x32xbf16>, vector<32x256xbf16>, vector<16x256xf32> -> vector<16x256xf32>
    %65 = arith.truncf %64 : vector<16x256xf32> to vector<16x256xbf16>
    %c3_59 = arith.constant 3 : index
    %c0_60 = arith.constant 0 : index
    %c0_61 = arith.constant 0 : index
    %66 = vector.load %arg5[%c3_59, %c0_60, %c0_61] : memref<4x256x256xbf16, #tpu.memory_space<vmem>>, vector<1x256x256xbf16>
    %67 = vector.shape_cast %66 : vector<1x256x256xbf16> to vector<256x256xbf16>
    %cst_62 = arith.constant dense<0.000000e+00> : vector<16x256xf32>
    %68 = tpu.matmul %65, %67, %cst_62 {dimension_numbers = #tpu.dot_dimension_numbers<[1], [0], [0], [1], [0, 0, 1, 1], [], []>} : vector<16x256xbf16>, vector<256x256xbf16>, vector<16x256xf32> -> vector<16x256xf32>
    %69 = arith.addf %61, %68 : vector<16x256xf32>
    %cst_63 = arith.constant dense<0.000000e+00> : vector<256xf32>
    %70 = vector.multi_reduction <add>, %69, %cst_63 [0] : vector<16x256xf32> to vector<256xf32>
    %71 = vector.shape_cast %70 : vector<256xf32> to vector<1x256xf32>
    %72 = arith.mulf %69, %69 : vector<16x256xf32>
    %cst_64 = arith.constant dense<0.000000e+00> : vector<256xf32>
    %73 = vector.multi_reduction <add>, %72, %cst_64 [0] : vector<16x256xf32> to vector<256xf32>
    %74 = vector.shape_cast %73 : vector<256xf32> to vector<1x256xf32>
    %c0_65 = arith.constant 0 : index
    %c0_66 = arith.constant 0 : index
    %75 = vector.load %arg6[%c0_65, %c0_66] : memref<256x256xf32, #tpu.memory_space<vmem>>, vector<256x256xf32>
    %cst_67 = arith.constant dense<0.000000e+00> : vector<1x256xf32>
    %76 = tpu.matmul %71, %75, %cst_67 {dimension_numbers = #tpu.dot_dimension_numbers<[1], [0], [0], [1], [0, 0, 1, 1], [], []>} : vector<1x256xf32>, vector<256x256xf32>, vector<1x256xf32> -> vector<1x256xf32>
    %cst_68 = arith.constant 7.812500e-03 : f32
    %77 = vector.broadcast %cst_68 : f32 to vector<1x256xf32>
    %78 = arith.mulf %76, %77 : vector<1x256xf32>
    %c0_69 = arith.constant 0 : index
    %c0_70 = arith.constant 0 : index
    %79 = vector.load %arg6[%c0_69, %c0_70] : memref<256x256xf32, #tpu.memory_space<vmem>>, vector<256x256xf32>
    %cst_71 = arith.constant dense<0.000000e+00> : vector<1x256xf32>
    %80 = tpu.matmul %74, %79, %cst_71 {dimension_numbers = #tpu.dot_dimension_numbers<[1], [0], [0], [1], [0, 0, 1, 1], [], []>} : vector<1x256xf32>, vector<256x256xf32>, vector<1x256xf32> -> vector<1x256xf32>
    %cst_72 = arith.constant 7.812500e-03 : f32
    %81 = vector.broadcast %cst_72 : f32 to vector<1x256xf32>
    %82 = arith.mulf %80, %81 : vector<1x256xf32>
    %83 = arith.mulf %78, %78 : vector<1x256xf32>
    %84 = arith.subf %82, %83 : vector<1x256xf32>
    %c0_73 = arith.constant 0 : index
    %c0_74 = arith.constant 0 : index
    %85 = vector.load %arg7[%c0_73, %c0_74] : memref<1x256xf32, #tpu.memory_space<vmem>>, vector<1x256xf32>
    %cst_75 = arith.constant 9.99999974E-6 : f32
    %86 = vector.broadcast %cst_75 : f32 to vector<1x256xf32>
    %87 = arith.addf %84, %86 : vector<1x256xf32>
    %88 = math.rsqrt %87 : vector<1x256xf32>
    %89 = arith.mulf %85, %88 : vector<1x256xf32>
    %90 = vector.broadcast %78 : vector<1x256xf32> to vector<16x256xf32>
    %91 = arith.subf %69, %90 : vector<16x256xf32>
    %92 = vector.broadcast %89 : vector<1x256xf32> to vector<16x256xf32>
    %93 = arith.mulf %91, %92 : vector<16x256xf32>
    %c0_76 = arith.constant 0 : index
    %c0_77 = arith.constant 0 : index
    %94 = vector.load %arg8[%c0_76, %c0_77] : memref<1x256xf32, #tpu.memory_space<vmem>>, vector<1x256xf32>
    %95 = vector.broadcast %94 : vector<1x256xf32> to vector<16x256xf32>
    %96 = arith.addf %93, %95 : vector<16x256xf32>
    %cst_78 = arith.constant 0.000000e+00 : f32
    %97 = vector.broadcast %cst_78 : f32 to vector<16x256xf32>
    %98 = arith.cmpf ogt, %96, %97 : vector<16x256xf32>
    %cst_79 = arith.constant 2.000000e-01 : f32
    %99 = vector.broadcast %cst_79 : f32 to vector<16x256xf32>
    %100 = arith.mulf %99, %96 : vector<16x256xf32>
    %101 = arith.select %98, %96, %100 : vector<16x256xi1>, vector<16x256xf32>
    %102 = arith.truncf %101 : vector<16x256xf32> to vector<16x256xbf16>
    %c0_80 = arith.constant 0 : index
    %c0_81 = arith.constant 0 : index
    %c0_82 = arith.constant 0 : index
    %103 = vector.load %arg9[%c0_80, %c0_81, %c0_82] : memref<4x8x16xbf16, #tpu.memory_space<vmem>>, vector<1x8x16xbf16>
    %104 = vector.shape_cast %103 : vector<1x8x16xbf16> to vector<8x16xbf16>
    %cst_83 = arith.constant dense<0.000000e+00> : vector<8x256xf32>
    %105 = tpu.matmul %104, %102, %cst_83 {dimension_numbers = #tpu.dot_dimension_numbers<[1], [0], [0], [1], [0, 0, 1, 1], [], []>} : vector<8x16xbf16>, vector<16x256xbf16>, vector<8x256xf32> -> vector<8x256xf32>
    %106 = arith.truncf %105 : vector<8x256xf32> to vector<8x256xbf16>
    %c0_84 = arith.constant 0 : index
    %c0_85 = arith.constant 0 : index
    %c0_86 = arith.constant 0 : index
    %107 = vector.load %arg10[%c0_84, %c0_85, %c0_86] : memref<4x256x256xbf16, #tpu.memory_space<vmem>>, vector<1x256x256xbf16>
    %108 = vector.shape_cast %107 : vector<1x256x256xbf16> to vector<256x256xbf16>
    %cst_87 = arith.constant dense<0.000000e+00> : vector<8x256xf32>
    %109 = tpu.matmul %106, %108, %cst_87 {dimension_numbers = #tpu.dot_dimension_numbers<[1], [0], [0], [1], [0, 0, 1, 1], [], []>} : vector<8x256xbf16>, vector<256x256xbf16>, vector<8x256xf32> -> vector<8x256xf32>
    %c1_88 = arith.constant 1 : index
    %c0_89 = arith.constant 0 : index
    %c0_90 = arith.constant 0 : index
    %110 = vector.load %arg9[%c1_88, %c0_89, %c0_90] : memref<4x8x16xbf16, #tpu.memory_space<vmem>>, vector<1x8x16xbf16>
    %111 = vector.shape_cast %110 : vector<1x8x16xbf16> to vector<8x16xbf16>
    %cst_91 = arith.constant dense<0.000000e+00> : vector<8x256xf32>
    %112 = tpu.matmul %111, %102, %cst_91 {dimension_numbers = #tpu.dot_dimension_numbers<[1], [0], [0], [1], [0, 0, 1, 1], [], []>} : vector<8x16xbf16>, vector<16x256xbf16>, vector<8x256xf32> -> vector<8x256xf32>
    %113 = arith.truncf %112 : vector<8x256xf32> to vector<8x256xbf16>
    %c1_92 = arith.constant 1 : index
    %c0_93 = arith.constant 0 : index
    %c0_94 = arith.constant 0 : index
    %114 = vector.load %arg10[%c1_92, %c0_93, %c0_94] : memref<4x256x256xbf16, #tpu.memory_space<vmem>>, vector<1x256x256xbf16>
    %115 = vector.shape_cast %114 : vector<1x256x256xbf16> to vector<256x256xbf16>
    %cst_95 = arith.constant dense<0.000000e+00> : vector<8x256xf32>
    %116 = tpu.matmul %113, %115, %cst_95 {dimension_numbers = #tpu.dot_dimension_numbers<[1], [0], [0], [1], [0, 0, 1, 1], [], []>} : vector<8x256xbf16>, vector<256x256xbf16>, vector<8x256xf32> -> vector<8x256xf32>
    %117 = arith.addf %109, %116 : vector<8x256xf32>
    %c2_96 = arith.constant 2 : index
    %c0_97 = arith.constant 0 : index
    %c0_98 = arith.constant 0 : index
    %118 = vector.load %arg9[%c2_96, %c0_97, %c0_98] : memref<4x8x16xbf16, #tpu.memory_space<vmem>>, vector<1x8x16xbf16>
    %119 = vector.shape_cast %118 : vector<1x8x16xbf16> to vector<8x16xbf16>
    %cst_99 = arith.constant dense<0.000000e+00> : vector<8x256xf32>
    %120 = tpu.matmul %119, %102, %cst_99 {dimension_numbers = #tpu.dot_dimension_numbers<[1], [0], [0], [1], [0, 0, 1, 1], [], []>} : vector<8x16xbf16>, vector<16x256xbf16>, vector<8x256xf32> -> vector<8x256xf32>
    %121 = arith.truncf %120 : vector<8x256xf32> to vector<8x256xbf16>
    %c2_100 = arith.constant 2 : index
    %c0_101 = arith.constant 0 : index
    %c0_102 = arith.constant 0 : index
    %122 = vector.load %arg10[%c2_100, %c0_101, %c0_102] : memref<4x256x256xbf16, #tpu.memory_space<vmem>>, vector<1x256x256xbf16>
    %123 = vector.shape_cast %122 : vector<1x256x256xbf16> to vector<256x256xbf16>
    %cst_103 = arith.constant dense<0.000000e+00> : vector<8x256xf32>
    %124 = tpu.matmul %121, %123, %cst_103 {dimension_numbers = #tpu.dot_dimension_numbers<[1], [0], [0], [1], [0, 0, 1, 1], [], []>} : vector<8x256xbf16>, vector<256x256xbf16>, vector<8x256xf32> -> vector<8x256xf32>
    %125 = arith.addf %117, %124 : vector<8x256xf32>
    %c3_104 = arith.constant 3 : index
    %c0_105 = arith.constant 0 : index
    %c0_106 = arith.constant 0 : index
    %126 = vector.load %arg9[%c3_104, %c0_105, %c0_106] : memref<4x8x16xbf16, #tpu.memory_space<vmem>>, vector<1x8x16xbf16>
    %127 = vector.shape_cast %126 : vector<1x8x16xbf16> to vector<8x16xbf16>
    %cst_107 = arith.constant dense<0.000000e+00> : vector<8x256xf32>
    %128 = tpu.matmul %127, %102, %cst_107 {dimension_numbers = #tpu.dot_dimension_numbers<[1], [0], [0], [1], [0, 0, 1, 1], [], []>} : vector<8x16xbf16>, vector<16x256xbf16>, vector<8x256xf32> -> vector<8x256xf32>
    %129 = arith.truncf %128 : vector<8x256xf32> to vector<8x256xbf16>
    %c3_108 = arith.constant 3 : index
    %c0_109 = arith.constant 0 : index
    %c0_110 = arith.constant 0 : index
    %130 = vector.load %arg10[%c3_108, %c0_109, %c0_110] : memref<4x256x256xbf16, #tpu.memory_space<vmem>>, vector<1x256x256xbf16>
    %131 = vector.shape_cast %130 : vector<1x256x256xbf16> to vector<256x256xbf16>
    %cst_111 = arith.constant dense<0.000000e+00> : vector<8x256xf32>
    %132 = tpu.matmul %129, %131, %cst_111 {dimension_numbers = #tpu.dot_dimension_numbers<[1], [0], [0], [1], [0, 0, 1, 1], [], []>} : vector<8x256xbf16>, vector<256x256xbf16>, vector<8x256xf32> -> vector<8x256xf32>
    %133 = arith.addf %125, %132 : vector<8x256xf32>
    %cst_112 = arith.constant dense<0.000000e+00> : vector<256xf32>
    %134 = vector.multi_reduction <add>, %133, %cst_112 [0] : vector<8x256xf32> to vector<256xf32>
    %135 = vector.shape_cast %134 : vector<256xf32> to vector<1x256xf32>
    %136 = arith.mulf %133, %133 : vector<8x256xf32>
    %cst_113 = arith.constant dense<0.000000e+00> : vector<256xf32>
    %137 = vector.multi_reduction <add>, %136, %cst_113 [0] : vector<8x256xf32> to vector<256xf32>
    %138 = vector.shape_cast %137 : vector<256xf32> to vector<1x256xf32>
    %c0_114 = arith.constant 0 : index
    %c0_115 = arith.constant 0 : index
    %139 = vector.load %arg11[%c0_114, %c0_115] : memref<256x256xf32, #tpu.memory_space<vmem>>, vector<256x256xf32>
    %cst_116 = arith.constant dense<0.000000e+00> : vector<1x256xf32>
    %140 = tpu.matmul %135, %139, %cst_116 {dimension_numbers = #tpu.dot_dimension_numbers<[1], [0], [0], [1], [0, 0, 1, 1], [], []>} : vector<1x256xf32>, vector<256x256xf32>, vector<1x256xf32> -> vector<1x256xf32>
    %cst_117 = arith.constant 3.125000e-02 : f32
    %141 = vector.broadcast %cst_117 : f32 to vector<1x256xf32>
    %142 = arith.mulf %140, %141 : vector<1x256xf32>
    %c0_118 = arith.constant 0 : index
    %c0_119 = arith.constant 0 : index
    %143 = vector.load %arg11[%c0_118, %c0_119] : memref<256x256xf32, #tpu.memory_space<vmem>>, vector<256x256xf32>
    %cst_120 = arith.constant dense<0.000000e+00> : vector<1x256xf32>
    %144 = tpu.matmul %138, %143, %cst_120 {dimension_numbers = #tpu.dot_dimension_numbers<[1], [0], [0], [1], [0, 0, 1, 1], [], []>} : vector<1x256xf32>, vector<256x256xf32>, vector<1x256xf32> -> vector<1x256xf32>
    %cst_121 = arith.constant 3.125000e-02 : f32
    %145 = vector.broadcast %cst_121 : f32 to vector<1x256xf32>
    %146 = arith.mulf %144, %145 : vector<1x256xf32>
    %147 = arith.mulf %142, %142 : vector<1x256xf32>
    %148 = arith.subf %146, %147 : vector<1x256xf32>
    %c0_122 = arith.constant 0 : index
    %c0_123 = arith.constant 0 : index
    %149 = vector.load %arg12[%c0_122, %c0_123] : memref<1x256xf32, #tpu.memory_space<vmem>>, vector<1x256xf32>
    %cst_124 = arith.constant 9.99999974E-6 : f32
    %150 = vector.broadcast %cst_124 : f32 to vector<1x256xf32>
    %151 = arith.addf %148, %150 : vector<1x256xf32>
    %152 = math.rsqrt %151 : vector<1x256xf32>
    %153 = arith.mulf %149, %152 : vector<1x256xf32>
    %154 = vector.broadcast %142 : vector<1x256xf32> to vector<8x256xf32>
    %155 = arith.subf %133, %154 : vector<8x256xf32>
    %156 = vector.broadcast %153 : vector<1x256xf32> to vector<8x256xf32>
    %157 = arith.mulf %155, %156 : vector<8x256xf32>
    %c0_125 = arith.constant 0 : index
    %c0_126 = arith.constant 0 : index
    %158 = vector.load %arg13[%c0_125, %c0_126] : memref<1x256xf32, #tpu.memory_space<vmem>>, vector<1x256xf32>
    %159 = vector.broadcast %158 : vector<1x256xf32> to vector<8x256xf32>
    %160 = arith.addf %157, %159 : vector<8x256xf32>
    %cst_127 = arith.constant 0.000000e+00 : f32
    %161 = vector.broadcast %cst_127 : f32 to vector<8x256xf32>
    %162 = arith.cmpf ogt, %160, %161 : vector<8x256xf32>
    %cst_128 = arith.constant 2.000000e-01 : f32
    %163 = vector.broadcast %cst_128 : f32 to vector<8x256xf32>
    %164 = arith.mulf %163, %160 : vector<8x256xf32>
    %165 = arith.select %162, %160, %164 : vector<8x256xi1>, vector<8x256xf32>
    %166 = arith.truncf %165 : vector<8x256xf32> to vector<8x256xbf16>
    %c0_129 = arith.constant 0 : index
    %c0_130 = arith.constant 0 : index
    %c0_131 = arith.constant 0 : index
    %167 = vector.load %arg14[%c0_129, %c0_130, %c0_131] : memref<4x4x8xbf16, #tpu.memory_space<vmem>>, vector<1x4x8xbf16>
    %168 = vector.shape_cast %167 : vector<1x4x8xbf16> to vector<4x8xbf16>
    %cst_132 = arith.constant dense<0.000000e+00> : vector<4x256xf32>
    %169 = tpu.matmul %168, %166, %cst_132 {dimension_numbers = #tpu.dot_dimension_numbers<[1], [0], [0], [1], [0, 0, 1, 1], [], []>} : vector<4x8xbf16>, vector<8x256xbf16>, vector<4x256xf32> -> vector<4x256xf32>
    %170 = arith.truncf %169 : vector<4x256xf32> to vector<4x256xbf16>
    %c0_133 = arith.constant 0 : index
    %c0_134 = arith.constant 0 : index
    %c0_135 = arith.constant 0 : index
    %171 = vector.load %arg15[%c0_133, %c0_134, %c0_135] : memref<4x256x256xbf16, #tpu.memory_space<vmem>>, vector<1x256x256xbf16>
    %172 = vector.shape_cast %171 : vector<1x256x256xbf16> to vector<256x256xbf16>
    %cst_136 = arith.constant dense<0.000000e+00> : vector<4x256xf32>
    %173 = tpu.matmul %170, %172, %cst_136 {dimension_numbers = #tpu.dot_dimension_numbers<[1], [0], [0], [1], [0, 0, 1, 1], [], []>} : vector<4x256xbf16>, vector<256x256xbf16>, vector<4x256xf32> -> vector<4x256xf32>
    %c1_137 = arith.constant 1 : index
    %c0_138 = arith.constant 0 : index
    %c0_139 = arith.constant 0 : index
    %174 = vector.load %arg14[%c1_137, %c0_138, %c0_139] : memref<4x4x8xbf16, #tpu.memory_space<vmem>>, vector<1x4x8xbf16>
    %175 = vector.shape_cast %174 : vector<1x4x8xbf16> to vector<4x8xbf16>
    %cst_140 = arith.constant dense<0.000000e+00> : vector<4x256xf32>
    %176 = tpu.matmul %175, %166, %cst_140 {dimension_numbers = #tpu.dot_dimension_numbers<[1], [0], [0], [1], [0, 0, 1, 1], [], []>} : vector<4x8xbf16>, vector<8x256xbf16>, vector<4x256xf32> -> vector<4x256xf32>
    %177 = arith.truncf %176 : vector<4x256xf32> to vector<4x256xbf16>
    %c1_141 = arith.constant 1 : index
    %c0_142 = arith.constant 0 : index
    %c0_143 = arith.constant 0 : index
    %178 = vector.load %arg15[%c1_141, %c0_142, %c0_143] : memref<4x256x256xbf16, #tpu.memory_space<vmem>>, vector<1x256x256xbf16>
    %179 = vector.shape_cast %178 : vector<1x256x256xbf16> to vector<256x256xbf16>
    %cst_144 = arith.constant dense<0.000000e+00> : vector<4x256xf32>
    %180 = tpu.matmul %177, %179, %cst_144 {dimension_numbers = #tpu.dot_dimension_numbers<[1], [0], [0], [1], [0, 0, 1, 1], [], []>} : vector<4x256xbf16>, vector<256x256xbf16>, vector<4x256xf32> -> vector<4x256xf32>
    %181 = arith.addf %173, %180 : vector<4x256xf32>
    %c2_145 = arith.constant 2 : index
    %c0_146 = arith.constant 0 : index
    %c0_147 = arith.constant 0 : index
    %182 = vector.load %arg14[%c2_145, %c0_146, %c0_147] : memref<4x4x8xbf16, #tpu.memory_space<vmem>>, vector<1x4x8xbf16>
    %183 = vector.shape_cast %182 : vector<1x4x8xbf16> to vector<4x8xbf16>
    %cst_148 = arith.constant dense<0.000000e+00> : vector<4x256xf32>
    %184 = tpu.matmul %183, %166, %cst_148 {dimension_numbers = #tpu.dot_dimension_numbers<[1], [0], [0], [1], [0, 0, 1, 1], [], []>} : vector<4x8xbf16>, vector<8x256xbf16>, vector<4x256xf32> -> vector<4x256xf32>
    %185 = arith.truncf %184 : vector<4x256xf32> to vector<4x256xbf16>
    %c2_149 = arith.constant 2 : index
    %c0_150 = arith.constant 0 : index
    %c0_151 = arith.constant 0 : index
    %186 = vector.load %arg15[%c2_149, %c0_150, %c0_151] : memref<4x256x256xbf16, #tpu.memory_space<vmem>>, vector<1x256x256xbf16>
    %187 = vector.shape_cast %186 : vector<1x256x256xbf16> to vector<256x256xbf16>
    %cst_152 = arith.constant dense<0.000000e+00> : vector<4x256xf32>
    %188 = tpu.matmul %185, %187, %cst_152 {dimension_numbers = #tpu.dot_dimension_numbers<[1], [0], [0], [1], [0, 0, 1, 1], [], []>} : vector<4x256xbf16>, vector<256x256xbf16>, vector<4x256xf32> -> vector<4x256xf32>
    %189 = arith.addf %181, %188 : vector<4x256xf32>
    %c3_153 = arith.constant 3 : index
    %c0_154 = arith.constant 0 : index
    %c0_155 = arith.constant 0 : index
    %190 = vector.load %arg14[%c3_153, %c0_154, %c0_155] : memref<4x4x8xbf16, #tpu.memory_space<vmem>>, vector<1x4x8xbf16>
    %191 = vector.shape_cast %190 : vector<1x4x8xbf16> to vector<4x8xbf16>
    %cst_156 = arith.constant dense<0.000000e+00> : vector<4x256xf32>
    %192 = tpu.matmul %191, %166, %cst_156 {dimension_numbers = #tpu.dot_dimension_numbers<[1], [0], [0], [1], [0, 0, 1, 1], [], []>} : vector<4x8xbf16>, vector<8x256xbf16>, vector<4x256xf32> -> vector<4x256xf32>
    %193 = arith.truncf %192 : vector<4x256xf32> to vector<4x256xbf16>
    %c3_157 = arith.constant 3 : index
    %c0_158 = arith.constant 0 : index
    %c0_159 = arith.constant 0 : index
    %194 = vector.load %arg15[%c3_157, %c0_158, %c0_159] : memref<4x256x256xbf16, #tpu.memory_space<vmem>>, vector<1x256x256xbf16>
    %195 = vector.shape_cast %194 : vector<1x256x256xbf16> to vector<256x256xbf16>
    %cst_160 = arith.constant dense<0.000000e+00> : vector<4x256xf32>
    %196 = tpu.matmul %193, %195, %cst_160 {dimension_numbers = #tpu.dot_dimension_numbers<[1], [0], [0], [1], [0, 0, 1, 1], [], []>} : vector<4x256xbf16>, vector<256x256xbf16>, vector<4x256xf32> -> vector<4x256xf32>
    %197 = arith.addf %189, %196 : vector<4x256xf32>
    %cst_161 = arith.constant dense<0.000000e+00> : vector<256xf32>
    %198 = vector.multi_reduction <add>, %197, %cst_161 [0] : vector<4x256xf32> to vector<256xf32>
    %199 = vector.shape_cast %198 : vector<256xf32> to vector<1x256xf32>
    %200 = arith.mulf %197, %197 : vector<4x256xf32>
    %cst_162 = arith.constant dense<0.000000e+00> : vector<256xf32>
    %201 = vector.multi_reduction <add>, %200, %cst_162 [0] : vector<4x256xf32> to vector<256xf32>
    %202 = vector.shape_cast %201 : vector<256xf32> to vector<1x256xf32>
    %c0_163 = arith.constant 0 : index
    %c0_164 = arith.constant 0 : index
    %203 = vector.load %arg16[%c0_163, %c0_164] : memref<256x256xf32, #tpu.memory_space<vmem>>, vector<256x256xf32>
    %cst_165 = arith.constant dense<0.000000e+00> : vector<1x256xf32>
    %204 = tpu.matmul %199, %203, %cst_165 {dimension_numbers = #tpu.dot_dimension_numbers<[1], [0], [0], [1], [0, 0, 1, 1], [], []>} : vector<1x256xf32>, vector<256x256xf32>, vector<1x256xf32> -> vector<1x256xf32>
    %cst_166 = arith.constant 1.250000e-01 : f32
    %205 = vector.broadcast %cst_166 : f32 to vector<1x256xf32>
    %206 = arith.mulf %204, %205 : vector<1x256xf32>
    %c0_167 = arith.constant 0 : index
    %c0_168 = arith.constant 0 : index
    %207 = vector.load %arg16[%c0_167, %c0_168] : memref<256x256xf32, #tpu.memory_space<vmem>>, vector<256x256xf32>
    %cst_169 = arith.constant dense<0.000000e+00> : vector<1x256xf32>
    %208 = tpu.matmul %202, %207, %cst_169 {dimension_numbers = #tpu.dot_dimension_numbers<[1], [0], [0], [1], [0, 0, 1, 1], [], []>} : vector<1x256xf32>, vector<256x256xf32>, vector<1x256xf32> -> vector<1x256xf32>
    %cst_170 = arith.constant 1.250000e-01 : f32
    %209 = vector.broadcast %cst_170 : f32 to vector<1x256xf32>
    %210 = arith.mulf %208, %209 : vector<1x256xf32>
    %211 = arith.mulf %206, %206 : vector<1x256xf32>
    %212 = arith.subf %210, %211 : vector<1x256xf32>
    %c0_171 = arith.constant 0 : index
    %c0_172 = arith.constant 0 : index
    %213 = vector.load %arg17[%c0_171, %c0_172] : memref<1x256xf32, #tpu.memory_space<vmem>>, vector<1x256xf32>
    %cst_173 = arith.constant 9.99999974E-6 : f32
    %214 = vector.broadcast %cst_173 : f32 to vector<1x256xf32>
    %215 = arith.addf %212, %214 : vector<1x256xf32>
    %216 = math.rsqrt %215 : vector<1x256xf32>
    %217 = arith.mulf %213, %216 : vector<1x256xf32>
    %218 = vector.broadcast %206 : vector<1x256xf32> to vector<4x256xf32>
    %219 = arith.subf %197, %218 : vector<4x256xf32>
    %220 = vector.broadcast %217 : vector<1x256xf32> to vector<4x256xf32>
    %221 = arith.mulf %219, %220 : vector<4x256xf32>
    %c0_174 = arith.constant 0 : index
    %c0_175 = arith.constant 0 : index
    %222 = vector.load %arg18[%c0_174, %c0_175] : memref<1x256xf32, #tpu.memory_space<vmem>>, vector<1x256xf32>
    %223 = vector.broadcast %222 : vector<1x256xf32> to vector<4x256xf32>
    %224 = arith.addf %221, %223 : vector<4x256xf32>
    %cst_176 = arith.constant 0.000000e+00 : f32
    %225 = vector.broadcast %cst_176 : f32 to vector<4x256xf32>
    %226 = arith.cmpf ogt, %224, %225 : vector<4x256xf32>
    %cst_177 = arith.constant 2.000000e-01 : f32
    %227 = vector.broadcast %cst_177 : f32 to vector<4x256xf32>
    %228 = arith.mulf %227, %224 : vector<4x256xf32>
    %229 = arith.select %226, %224, %228 : vector<4x256xi1>, vector<4x256xf32>
    %230 = arith.truncf %229 : vector<4x256xf32> to vector<4x256xbf16>
    %c0_178 = arith.constant 0 : index
    %c0_179 = arith.constant 0 : index
    %c0_180 = arith.constant 0 : index
    %231 = vector.load %arg19[%c0_178, %c0_179, %c0_180] : memref<2x2x4xbf16, #tpu.memory_space<vmem>>, vector<1x2x4xbf16>
    %232 = vector.shape_cast %231 : vector<1x2x4xbf16> to vector<2x4xbf16>
    %cst_181 = arith.constant dense<0.000000e+00> : vector<2x256xf32>
    %233 = tpu.matmul %232, %230, %cst_181 {dimension_numbers = #tpu.dot_dimension_numbers<[1], [0], [0], [1], [0, 0, 1, 1], [], []>} : vector<2x4xbf16>, vector<4x256xbf16>, vector<2x256xf32> -> vector<2x256xf32>
    %234 = arith.truncf %233 : vector<2x256xf32> to vector<2x256xbf16>
    %c0_182 = arith.constant 0 : index
    %c0_183 = arith.constant 0 : index
    %c0_184 = arith.constant 0 : index
    %235 = vector.load %arg20[%c0_182, %c0_183, %c0_184] : memref<2x256x1xbf16, #tpu.memory_space<vmem>>, vector<1x256x1xbf16>
    %236 = vector.shape_cast %235 : vector<1x256x1xbf16> to vector<256x1xbf16>
    %cst_185 = arith.constant dense<0.000000e+00> : vector<2x1xf32>
    %237 = tpu.matmul %234, %236, %cst_185 {dimension_numbers = #tpu.dot_dimension_numbers<[1], [0], [0], [1], [0, 0, 1, 1], [], []>} : vector<2x256xbf16>, vector<256x1xbf16>, vector<2x1xf32> -> vector<2x1xf32>
    %c1_186 = arith.constant 1 : index
    %c0_187 = arith.constant 0 : index
    %c0_188 = arith.constant 0 : index
    %238 = vector.load %arg19[%c1_186, %c0_187, %c0_188] : memref<2x2x4xbf16, #tpu.memory_space<vmem>>, vector<1x2x4xbf16>
    %239 = vector.shape_cast %238 : vector<1x2x4xbf16> to vector<2x4xbf16>
    %cst_189 = arith.constant dense<0.000000e+00> : vector<2x256xf32>
    %240 = tpu.matmul %239, %230, %cst_189 {dimension_numbers = #tpu.dot_dimension_numbers<[1], [0], [0], [1], [0, 0, 1, 1], [], []>} : vector<2x4xbf16>, vector<4x256xbf16>, vector<2x256xf32> -> vector<2x256xf32>
    %241 = arith.truncf %240 : vector<2x256xf32> to vector<2x256xbf16>
    %c1_190 = arith.constant 1 : index
    %c0_191 = arith.constant 0 : index
    %c0_192 = arith.constant 0 : index
    %242 = vector.load %arg20[%c1_190, %c0_191, %c0_192] : memref<2x256x1xbf16, #tpu.memory_space<vmem>>, vector<1x256x1xbf16>
    %243 = vector.shape_cast %242 : vector<1x256x1xbf16> to vector<256x1xbf16>
    %cst_193 = arith.constant dense<0.000000e+00> : vector<2x1xf32>
    %244 = tpu.matmul %241, %243, %cst_193 {dimension_numbers = #tpu.dot_dimension_numbers<[1], [0], [0], [1], [0, 0, 1, 1], [], []>} : vector<2x256xbf16>, vector<256x1xbf16>, vector<2x1xf32> -> vector<2x1xf32>
    %245 = arith.addf %237, %244 : vector<2x1xf32>
    %cst_194 = arith.constant 0.000000e+00 : f32
    %246 = vector.broadcast %cst_194 : f32 to vector<2x1xf32>
    %247 = arith.subf %246, %245 : vector<2x1xf32>
    %248 = math.exp %247 : vector<2x1xf32>
    %cst_195 = arith.constant 1.000000e+00 : f32
    %249 = vector.broadcast %cst_195 : f32 to vector<2x1xf32>
    %250 = arith.addf %249, %248 : vector<2x1xf32>
    %cst_196 = arith.constant 1.000000e+00 : f32
    %251 = vector.broadcast %cst_196 : f32 to vector<2x1xf32>
    %252 = arith.divf %251, %250 : vector<2x1xf32>
    %c0_197 = arith.constant 0 : index
    %c0_198 = arith.constant 0 : index
    %253 = vector.load %arg21[%c0_197, %c0_198] : memref<2x1xf32, #tpu.memory_space<vmem>>, vector<2x1xf32>
    tpu.vector_store %arg21[%c0_197, %c0_198], %252 {strides = array<i32>} : memref<2x1xf32, #tpu.memory_space<vmem>>, vector<2x1xf32>,
    return
  }
  func.func @transform_0(%arg0: i32) -> (i32, i32) {
    %c0_i32 = arith.constant 0 : i32
    %c0_i32_0 = arith.constant 0 : i32
    %c0_i32_1 = arith.constant 0 : i32
    return %c0_i32, %c0_i32_0 : i32, i32
  }
  func.func @transform_1(%arg0: i32) -> (i32, i32, i32) {
    %c0_i32 = arith.constant 0 : i32
    %c0_i32_0 = arith.constant 0 : i32
    %c0_i32_1 = arith.constant 0 : i32
    %c0_i32_2 = arith.constant 0 : i32
    return %c0_i32, %c0_i32_0, %c0_i32_1 : i32, i32, i32
  }
  func.func @transform_2(%arg0: i32) -> (i32, i32, i32) {
    %c0_i32 = arith.constant 0 : i32
    %c0_i32_0 = arith.constant 0 : i32
    %c0_i32_1 = arith.constant 0 : i32
    %c0_i32_2 = arith.constant 0 : i32
    return %c0_i32, %c0_i32_0, %c0_i32_1 : i32, i32, i32
  }
  func.func @transform_3(%arg0: i32) -> (i32, i32, i32) {
    %c0_i32 = arith.constant 0 : i32
    %c0_i32_0 = arith.constant 0 : i32
    %c0_i32_1 = arith.constant 0 : i32
    %c0_i32_2 = arith.constant 0 : i32
    return %c0_i32, %c0_i32_0, %c0_i32_1 : i32, i32, i32
  }
  func.func @transform_4(%arg0: i32) -> (i32, i32, i32) {
    %c0_i32 = arith.constant 0 : i32
    %c0_i32_0 = arith.constant 0 : i32
    %c0_i32_1 = arith.constant 0 : i32
    %c0_i32_2 = arith.constant 0 : i32
    return %c0_i32, %c0_i32_0, %c0_i32_1 : i32, i32, i32
  }
  func.func @transform_5(%arg0: i32) -> (i32, i32) {
    %c0_i32 = arith.constant 0 : i32
    %c0_i32_0 = arith.constant 0 : i32
    %c0_i32_1 = arith.constant 0 : i32
    return %c0_i32, %c0_i32_0 : i32, i32
  }
  func.func @transform_6(%arg0: i32) -> (i32, i32) {
    %c0_i32 = arith.constant 0 : i32
    %c0_i32_0 = arith.constant 0 : i32
    %c0_i32_1 = arith.constant 0 : i32
    return %c0_i32, %c0_i32_0 : i32, i32
  }
  func.func @transform_7(%arg0: i32) -> (i32, i32) {
    %c0_i32 = arith.constant 0 : i32
    %c0_i32_0 = arith.constant 0 : i32
    %c0_i32_1 = arith.constant 0 : i32
    return %c0_i32, %c0_i32_0 : i32, i32
  }
  func.func @transform_8(%arg0: i32) -> (i32, i32, i32) {
    %c0_i32 = arith.constant 0 : i32
    %c0_i32_0 = arith.constant 0 : i32
    %c0_i32_1 = arith.constant 0 : i32
    %c0_i32_2 = arith.constant 0 : i32
    return %c0_i32, %c0_i32_0, %c0_i32_1 : i32, i32, i32
  }
  func.func @transform_9(%arg0: i32) -> (i32, i32, i32) {
    %c0_i32 = arith.constant 0 : i32
    %c0_i32_0 = arith.constant 0 : i32
    %c0_i32_1 = arith.constant 0 : i32
    %c0_i32_2 = arith.constant 0 : i32
    return %c0_i32, %c0_i32_0, %c0_i32_1 : i32, i32, i32
  }
  func.func @transform_10(%arg0: i32) -> (i32, i32) {
    %c0_i32 = arith.constant 0 : i32
    %c0_i32_0 = arith.constant 0 : i32
    %c0_i32_1 = arith.constant 0 : i32
    return %c0_i32, %c0_i32_0 : i32, i32
  }
  func.func @transform_11(%arg0: i32) -> (i32, i32) {
    %c0_i32 = arith.constant 0 : i32
    %c0_i32_0 = arith.constant 0 : i32
    %c0_i32_1 = arith.constant 0 : i32
    return %c0_i32, %c0_i32_0 : i32, i32
  }
  func.func @transform_12(%arg0: i32) -> (i32, i32) {
    %c0_i32 = arith.constant 0 : i32
    %c0_i32_0 = arith.constant 0 : i32
    %c0_i32_1 = arith.constant 0 : i32
    return %c0_i32, %c0_i32_0 : i32, i32
  }
  func.func @transform_13(%arg0: i32) -> (i32, i32, i32) {
    %c0_i32 = arith.constant 0 : i32
    %c0_i32_0 = arith.constant 0 : i32
    %c0_i32_1 = arith.constant 0 : i32
    %c0_i32_2 = arith.constant 0 : i32
    return %c0_i32, %c0_i32_0, %c0_i32_1 : i32, i32, i32
  }
  func.func @transform_14(%arg0: i32) -> (i32, i32, i32) {
    %c0_i32 = arith.constant 0 : i32
    %c0_i32_0 = arith.constant 0 : i32
    %c0_i32_1 = arith.constant 0 : i32
    %c0_i32_2 = arith.constant 0 : i32
    return %c0_i32, %c0_i32_0, %c0_i32_1 : i32, i32, i32
  }
  func.func @transform_15(%arg0: i32) -> (i32, i32) {
    %c0_i32 = arith.constant 0 : i32
    %c0_i32_0 = arith.constant 0 : i32
    %c0_i32_1 = arith.constant 0 : i32
    return %c0_i32, %c0_i32_0 : i32, i32
  }
  func.func @transform_16(%arg0: i32) -> (i32, i32) {
    %c0_i32 = arith.constant 0 : i32
    %c0_i32_0 = arith.constant 0 : i32
    %c0_i32_1 = arith.constant 0 : i32
    return %c0_i32, %c0_i32_0 : i32, i32
  }
  func.func @transform_17(%arg0: i32) -> (i32, i32) {
    %c0_i32 = arith.constant 0 : i32
    %c0_i32_0 = arith.constant 0 : i32
    %c0_i32_1 = arith.constant 0 : i32
    return %c0_i32, %c0_i32_0 : i32, i32
  }
  func.func @transform_18(%arg0: i32) -> (i32, i32, i32) {
    %c0_i32 = arith.constant 0 : i32
    %c0_i32_0 = arith.constant 0 : i32
    %c0_i32_1 = arith.constant 0 : i32
    %c0_i32_2 = arith.constant 0 : i32
    return %c0_i32, %c0_i32_0, %c0_i32_1 : i32, i32, i32
  }
  func.func @transform_19(%arg0: i32) -> (i32, i32, i32) {
    %c0_i32 = arith.constant 0 : i32
    %c0_i32_0 = arith.constant 0 : i32
    %c0_i32_1 = arith.constant 0 : i32
    %c0_i32_2 = arith.constant 0 : i32
    return %c0_i32, %c0_i32_0, %c0_i32_1 : i32, i32, i32
  }
  func.func @transform_20(%arg0: i32) -> (i32, i32) {
    %c0_i32 = arith.constant 0 : i32
    %c0_i32_0 = arith.constant 0 : i32
    %c0_i32_1 = arith.constant 0 : i32
    return %c0_i32, %c0_i32_0 : i32, i32
  }
}

</mosaic_0001>

<bundles_post_ra>
// kernel: discriminator_forward.1
= control target key start
LH: loop header
LB: loop body
LE: loop exit
PB: predicated region body
PF: predicated region fallthrough
CT: control target
= control target key end

     0   :  { %vm92_vm0 = vcmask 523264   ;;  %v7946_v33 = vmov 0   ;;  %vm307_vm1 = vcmask 785408   ;;  %vm945_vm10 = vcmask 261120   ;;  %s10772_s0 = inlined_call_operand.vmem [shape: f32[64,96], index: 0, kind: input, shape index: {}]   ;;  %s10773_s1 = inlined_call_operand.vmem [shape: bf16[4,32,64], index: 1, kind: input, shape index: {}]   ;;  %s10774_s2 = inlined_call_operand.vmem [shape: bf16[4,96,256], index: 2, kind: input, shape index: {}]   ;;  %s10775_s3 = inlined_call_operand.vmem [shape: bf16[4,16,32], index: 3, kind: input, shape index: {}]   ;;  %s10776_s4 = inlined_call_operand.vmem [shape: bf16[4,256,256], index: 4, kind: input, shape index: {}]   ;;  %s10777_s5 = inlined_call_operand.vmem [shape: f32[256,256], index: 5, kind: input, shape index: {}]   ;;  %s10778_s9 = inlined_call_operand.vmem [shape: bf16[4,256,256], index: 9, kind: input, shape index: {}]   ;;  %s10779_s6 = inlined_call_operand.vmem [shape: f32[1,256], index: 6, kind: input, shape index: {}]   ;;  %s10780_s7 = inlined_call_operand.vmem [shape: f32[1,256], index: 7, kind: input, shape index: {}]   ;;  %s10781_s8 = inlined_call_operand.vmem [shape: bf16[4,8,16], index: 8, kind: input, shape index: {}]   ;;  %s10782_s10 = inlined_call_operand.vmem [shape: f32[256,256], index: 10, kind: input, shape index: {}]   ;;  %s10783_s14 = inlined_call_operand.vmem [shape: bf16[4,256,256], index: 14, kind: input, shape index: {}]   ;;  %s10784_s11 = inlined_call_operand.vmem [shape: f32[1,256], index: 11, kind: input, shape index: {}]   ;;  %s10785_s12 = inlined_call_operand.vmem [shape: f32[1,256], index: 12, kind: input, shape index: {}]   ;;  %s10786_s13 = inlined_call_operand.vmem [shape: bf16[4,4,8], index: 13, kind: input, shape index: {}]   ;;  %s10787_s15 = inlined_call_operand.vmem [shape: f32[256,256], index: 15, kind: input, shape index: {}]   ;;  %s10788_s19 = inlined_call_operand.vmem [shape: bf16[2,256,1], index: 19, kind: input, shape index: {}]   ;;  %s10789_s16 = inlined_call_operand.vmem [shape: f32[1,256], index: 16, kind: input, shape index: {}]   ;;  %s10790_s17 = inlined_call_operand.vmem [shape: f32[1,256], index: 17, kind: input, shape index: {}]   ;;  %s10791_s18 = inlined_call_operand.vmem [shape: bf16[2,2,4], index: 18, kind: input, shape index: {}]   ;;  %s10792_s20 = inlined_call_operand.vmem [shape: f32[2,1], index: 20, kind: output, shape index: {}]  }
   0x1   :  { %10798 = sst [smem:[#allocation2_spill]] %s10772_s0  ;;  %vm2441_vm15 = vcmask 130048  }
   0x2   :  { %10799 = sst [smem:[#allocation3_spill]] %s10773_s1  ;;  %s10803_s23 = sld [smem:[#allocation2_spill]] }
   0x3   :  { %10800 = sst [smem:[#allocation4_spill]] %s10774_s2  ;;  %s10804_s1 = sld [smem:[#allocation3_spill]] }
   0x4   :  { %10801 = sst [smem:[#allocation5_spill]] %s10775_s3 }
   0x5   :  { %10802 = sst [smem:[#allocation6_spill]] %s10776_s4  ;;  %s10805_s4 = sld [smem:[#allocation4_spill]] }
   0x6   :  { %s10806_s26 = sld [smem:[#allocation5_spill]] }
   0x8   :  { %v66_v0 = vld [vmem:[%s10803_s23] sm:$0xff]  ;;  %v67_v1 = vld [vmem:[%s10803_s23 + $0x8] sm:$0xff]  ;;  %v68_v2 = vld [vmem:[%s10803_s23 + $0x10] sm:$0xff] }
   0x9   :  { %v8062_v3 = vpack.c.bf16 %v67_v1, %v66_v0  ;;  %v69_v4 = vld [vmem:[%s10803_s23 + $0x18] sm:$0xff]  ;;  %v70_v6 = vld [vmem:[%s10803_s23 + $0x20] sm:$0xff]  ;;  %v71_v7 = vld [vmem:[%s10803_s23 + $0x28] sm:$0xff] }
   0xa   :  { %v8067_v5 = vpack.c.bf16 %v69_v4, %v68_v2  ;;  %v7238_v8 = vld [vmem:[%s10804_s1 + $0x10] sm:$0xff]   ;;  %v76_v10 = vpack.c.bf16 %v71_v7, %v70_v6  ;;  %v7240_v11 = vld [vmem:[%s10804_s1] sm:$0xff]   ;;  %v73_v12 = vld [vmem:[%s10803_s23 + $0x38] sm:$0xff] }
   0xb   :  { %6756 = vmatprep.subr.bf16.mxu1 %v8062_v3  ;;  %6744 = vmatprep.subr.bf16.mxu0 %v8062_v3  ;;  %v72_v9 = vld [vmem:[%s10803_s23 + $0x30] sm:$0xff]  ;;  %v7248_v14 = vld [vmem:[%s10805_s4 + $0x64] ss:$8 sps:$4 sm:$0xff]   ;;  %v7239_v15 = vld [vmem:[%s10804_s1 + $0x18] sm:$0xff]   ;;  %s10807_s23 = sld [smem:[#allocation6_spill]] }
   0xc   :  { %6757 = vmatpush3.bf16.msra.mxu1 %v8062_v3  ;;  %6745 = vmatpush3.bf16.msra.mxu0 %v8062_v3  ;;  %v77_v13 = vpack.c.bf16 %v73_v12, %v72_v9  ;;  %v7241_v16 = vld [vmem:[%s10804_s1 + $0x8] sm:$0xff]   ;;  %v7242_v17 = vld [vmem:[%s10804_s1 + $0x20] sm:$0xff]   ;;  %v7251_v19 = vld [vmem:[%s10805_s4 + $0x74] ss:$8 sps:$4 sm:$0xff]  }
   0xd   :  { %6758 = vmatprep.subr.bf16.mxu1 %v8067_v5  ;;  %6764 = vmatprep.mubr.msk.bf16.mxu1 %vm92_vm0, %v7238_v8  ;;  %v7246_v18 = vld [vmem:[%s10805_s4 + $0x60] ss:$8 sps:$4 sm:$0xff]   ;;  %v7249_v20 = vld [vmem:[%s10805_s4 + $0x70] ss:$8 sps:$4 sm:$0xff]   ;;  %v7254_v21 = vld [vmem:[%s10805_s4 + $0x84] ss:$8 sps:$4 sm:$0xff]  }
   0xe   :  { %6746 = vmatprep.subr.bf16.mxu0 %v8067_v5  ;;  %6752 = vmatprep.mubr.msk.bf16.mxu0 %vm92_vm0, %v7240_v11  ;;  %v7252_v22 = vld [vmem:[%s10805_s4 + $0x80] ss:$8 sps:$4 sm:$0xff]   ;;  %v7257_v23 = vld [vmem:[%s10805_s4 + $0x94] ss:$8 sps:$4 sm:$0xff]   ;;  %v7255_v24 = vld [vmem:[%s10805_s4 + $0x90] ss:$8 sps:$4 sm:$0xff]  }
   0xf   :  { %v7260_v25 = vld [vmem:[%s10805_s4 + $0xa4] ss:$8 sps:$4 sm:$0xff]   ;;  %v7244_v27 = vld [vmem:[%s10804_s1 + $0x30] sm:$0xff]   ;;  %v7258_v28 = vld [vmem:[%s10805_s4 + $0xa0] ss:$8 sps:$4 sm:$0xff]  }
  0x10   :  { %6759 = vmatpush3.bf16.msra.mxu1 %v8067_v5  ;;  %6747 = vmatpush3.bf16.msra.mxu0 %v8067_v5  ;;  %v7243_v26 = vld [vmem:[%s10804_s1 + $0x28] sm:$0xff]   ;;  %v7245_v29 = vld [vmem:[%s10804_s1 + $0x38] sm:$0xff]  }
  0x11   :  { %6760 = vmatprep.subr.bf16.mxu1 %v76_v10  ;;  %6748 = vmatprep.subr.bf16.mxu0 %v76_v10  ;;  %v7263_v30 = vld [vmem:[%s10805_s4 + $0xb4] ss:$8 sps:$4 sm:$0xff]   ;;  %v7261_v31 = vld [vmem:[%s10805_s4 + $0xb0] ss:$8 sps:$4 sm:$0xff]   ;;  %v7266_v32 = vld [vmem:[%s10805_s4 + $0x4] ss:$8 sps:$4 sm:$0xff]  }
  0x12   :  { %v7264_v42 = vld [vmem:[%s10805_s4] ss:$8 sps:$4 sm:$0xff]   ;;  %v7269_v46 = vld [vmem:[%s10805_s4 + $0x14] ss:$8 sps:$4 sm:$0xff]   ;;  %v7267_v48 = vld [vmem:[%s10805_s4 + $0x10] ss:$8 sps:$4 sm:$0xff]  }
  0x13   :  { %v7272_v49 = vld [vmem:[%s10805_s4 + $0x24] ss:$8 sps:$4 sm:$0xff]   ;;  %v7270_v50 = vld [vmem:[%s10805_s4 + $0x20] ss:$8 sps:$4 sm:$0xff]   ;;  %v7275_v51 = vld [vmem:[%s10805_s4 + $0x34] ss:$8 sps:$4 sm:$0xff]  }
  0x14   :  { %6761 = vmatpush3.bf16.msra.mxu1 %v76_v10  ;;  %6749 = vmatpush3.bf16.msra.mxu0 %v76_v10  ;;  %v7273_v52 = vld [vmem:[%s10805_s4 + $0x30] ss:$8 sps:$4 sm:$0xff]   ;;  %v7278_v53 = vld [vmem:[%s10805_s4 + $0x44] ss:$8 sps:$4 sm:$0xff]   ;;  %v7276_v57 = vld [vmem:[%s10805_s4 + $0x40] ss:$8 sps:$4 sm:$0xff]  }
  0x15   :  { %6762 = vmatprep.subr.bf16.mxu1 %v77_v13  ;;  %6750 = vmatprep.subr.bf16.mxu0 %v77_v13  ;;  %v7281_v60 = vld [vmem:[%s10805_s4 + $0x54] ss:$8 sps:$4 sm:$0xff]   ;;  %v7279_v62 = vld [vmem:[%s10805_s4 + $0x50] ss:$8 sps:$4 sm:$0xff]   ;;  %v7284_v63 = vld [vmem:[%s10805_s4 + $0xc4] ss:$8 sps:$4 sm:$0xff]  }
  0x16   :  { %v7282_v0 = vld [vmem:[%s10805_s4 + $0xc0] ss:$8 sps:$4 sm:$0xff]   ;;  %v7287_v1 = vld [vmem:[%s10805_s4 + $0xd4] ss:$8 sps:$4 sm:$0xff]   ;;  %v7285_v2 = vld [vmem:[%s10805_s4 + $0xd0] ss:$8 sps:$4 sm:$0xff]  }
  0x17   :  { %v7288_v7 = vld [vmem:[%s10805_s4 + $0xe0] ss:$8 sps:$4 sm:$0xff]   ;;  %v7291_v12 = vld [vmem:[%s10805_s4 + $0xf0] ss:$8 sps:$4 sm:$0xff]  }
  0x18   :  { %6763 = vmatpush3.bf16.msra.mxu1 %v77_v13  ;;  %6751 = vmatpush3.bf16.msra.mxu0 %v77_v13 }
  0x19   :  { %6768 = vmatprep.subr.bf16.mxu1 %v8062_v3  ;;  %314 = vmatprep.subr.bf16.mxu0 %v7248_v14  ;;  %v7294_v14 = vld [vmem:[%s10805_s4 + $0x100] ss:$8 sps:$4 sm:$0xff]  }
  0x1b   :  { %6765 = vmatmul.mubr.msk.bf16.vlgmr.msra.gmra.mrb[0].mxu1 %vm92_vm0, %v7239_v15  ;;  %6753 = vmatmul.mubr.msk.bf16.vlgmr.msra.gmra.mrb[0].mxu0 %vm92_vm0, %v7241_v16  ;;  %v7299_v15 = vld [vmem:[%s10805_s4 + $0x114] ss:$8 sps:$4 sm:$0xff]   ;;  %v7297_v16 = vld [vmem:[%s10805_s4 + $0x110] ss:$8 sps:$4 sm:$0xff]  }
  0x1c   :  { %6769 = vmatpush3.bf16.msra.mxu1 %v8062_v3  ;;  %6776 = vmatprep.mubr.msk.bf16.mxu1 %vm92_vm0, %v7242_v17  ;;  %v7302_v17 = vld [vmem:[%s10805_s4 + $0x124] ss:$8 sps:$4 sm:$0xff]  }
  0x1d   :  { %6770 = vmatprep.subr.bf16.mxu1 %v8067_v5  ;;  %315 = vmatpush1.bf16.msra.mxu0 %v7246_v18  ;;  %v7300_v18 = vld [vmem:[%s10805_s4 + $0x120] ss:$8 sps:$4 sm:$0xff]  }
  0x1e   :  { %316 = vmatprep.subr.bf16.mxu0 %v7251_v19  ;;  %346 = vmatprep.mubr.bf16.mxu0 %v7946_v33  ;;  %v7305_v19 = vld [vmem:[%s10805_s4 + $0x134] ss:$8 sps:$4 sm:$0xff]  }
  0x20   :  { %6771 = vmatpush3.bf16.msra.mxu1 %v8067_v5 }
  0x21   :  { %6772 = vmatprep.subr.bf16.mxu1 %v76_v10  ;;  %317 = vmatpush1.bf16.msra.mxu0 %v7249_v20  ;;  %v7303_v20 = vld [vmem:[%s10805_s4 + $0x130] ss:$8 sps:$4 sm:$0xff]  }
  0x22   :  { %318 = vmatprep.subr.bf16.mxu0 %v7254_v21  ;;  %v7308_v21 = vld [vmem:[%s10805_s4 + $0x144] ss:$8 sps:$4 sm:$0xff]  }
  0x24   :  { %6773 = vmatpush3.bf16.msra.mxu1 %v76_v10 }
  0x25   :  { %6774 = vmatprep.subr.bf16.mxu1 %v77_v13  ;;  %319 = vmatpush1.bf16.msra.mxu0 %v7252_v22  ;;  %v7306_v22 = vld [vmem:[%s10805_s4 + $0x140] ss:$8 sps:$4 sm:$0xff]  }
  0x26   :  { %320 = vmatprep.subr.bf16.mxu0 %v7257_v23  ;;  %v7311_v23 = vld [vmem:[%s10805_s4 + $0x154] ss:$8 sps:$4 sm:$0xff]  }
  0x28   :  { %6775 = vmatpush3.bf16.msra.mxu1 %v77_v13 }
  0x29   :  { %6780 = vmatprep.subr.bf16.mxu1 %v8062_v3  ;;  %321 = vmatpush1.bf16.msra.mxu0 %v7255_v24  ;;  %v7309_v24 = vld [vmem:[%s10805_s4 + $0x150] ss:$8 sps:$4 sm:$0xff]  }
  0x2a   :  { %322 = vmatprep.subr.bf16.mxu0 %v7260_v25  ;;  %v7314_v25 = vld [vmem:[%s10805_s4 + $0x164] ss:$8 sps:$4 sm:$0xff]  }
  0x2b   :  { %6777 = vmatmul.mubr.msk.bf16.vlgmr.msra.gmra.mrb[4].mxu1 %vm92_vm0, %v7243_v26  ;;  %v7312_v26 = vld [vmem:[%s10805_s4 + $0x160] ss:$8 sps:$4 sm:$0xff]  }
  0x2c   :  { %6781 = vmatpush3.bf16.msra.mxu1 %v8062_v3  ;;  %6788 = vmatprep.mubr.msk.bf16.mxu1 %vm92_vm0, %v7244_v27  ;;  %v7290_v3 = vld [vmem:[%s10805_s4 + $0xe4] ss:$8 sps:$4 sm:$0xff]   ;;  %v7317_v27 = vld [vmem:[%s10805_s4 + $0x174] ss:$8 sps:$4 sm:$0xff]  }
  0x2d   :  { %6782 = vmatprep.subr.bf16.mxu1 %v8067_v5  ;;  %323 = vmatpush1.bf16.msra.mxu0 %v7258_v28  ;;  %v7315_v28 = vld [vmem:[%s10805_s4 + $0x170] ss:$8 sps:$4 sm:$0xff]  }
  0x2e   :  { %324 = vmatprep.subr.bf16.mxu0 %v7263_v30 }
  0x30   :  { %6783 = vmatpush3.bf16.msra.mxu1 %v8067_v5 }
  0x31   :  { %6784 = vmatprep.subr.bf16.mxu1 %v76_v10  ;;  %325 = vmatpush1.bf16.msra.mxu0 %v7261_v31 }
  0x32   :  { %433 = vmatprep.subr.bf16.mxu0 %v7266_v32 }
  0x34   :  { %6785 = vmatpush3.bf16.msra.mxu1 %v76_v10  ;;  %v7293_v10 = vld [vmem:[%s10805_s4 + $0xf4] ss:$8 sps:$4 sm:$0xff]  }
  0x35   :  { %6786 = vmatprep.subr.bf16.mxu1 %v77_v13 }
  0x38   :  { %6787 = vmatpush3.bf16.msra.mxu1 %v77_v13  ;;  %v7296_v13 = vld [vmem:[%s10805_s4 + $0x104] ss:$8 sps:$4 sm:$0xff]  }
  0x3b   :  { %6789 = vmatmul.mubr.msk.bf16.vlgmr.msra.gmra.mrb[8].mxu1 %vm92_vm0, %v7245_v29 }
  0x3c   :  { %981 = vmatprep.mubr.bf16.mxu1 %v7946_v33 }
  0xee   :  { %v6766_v34 = vpop.f32.mrb[0].mxu1  ;;  %v8170_v35 = vpop.f32.mrb[0].mxu0 }
  0xef   :  { %v217_v36 = vpop.f32.mrb[1].mxu1  ;;  %v133_v37 = vpop.f32.mrb[1].mxu0 }
  0xf0   :  { %v6767_v38 = vpop.f32.mrb[2].mxu1  ;;  %v6755_v39 = vpop.f32.mrb[2].mxu0 }
  0xf1   :  { %v233_v40 = vpack.c.bf16 %v6767_v38, %v6766_v34  ;;  %v220_v41 = vpop.f32.mrb[3].mxu1  ;;  %v149_v43 = vpack.c.bf16 %v6755_v39, %v8170_v35  ;;  %v136_v44 = vpop.f32.mrb[3].mxu0 }
  0xf2   :  { %v232_v45 = vpack.c.bf16 %v220_v41, %v217_v36  ;;  %v148_v47 = vpack.c.bf16 %v136_v44, %v133_v37 }
  0xf4   :  { %5819 = vmatmul.mubr.msk.bf16.vlgmr.msra.gmra.mrb[4].mxu0 %vm307_vm1, %v232_v45 }
  0xf5   :  { %434 = vmatpush1.bf16.msra.mxu0 %v7264_v42  ;;  %356 = vmatprep.mubr.bf16.mxu0 %v7946_v33 }
  0xf6   :  { %435 = vmatprep.subr.bf16.mxu0 %v7269_v46 }
  0xf9   :  { %436 = vmatpush1.bf16.msra.mxu0 %v7267_v48 }
  0xfa   :  { %437 = vmatprep.subr.bf16.mxu0 %v7272_v49 }
  0xfc   :  { %5820 = vmatmul.mubr.msk.bf16.gmra.mrb[8].mxu0 %vm307_vm1, %v233_v40 }
  0xfd   :  { %438 = vmatpush1.bf16.msra.mxu0 %v7270_v50  ;;  %465 = vmatprep.mubr.bf16.mxu0 %v7946_v33 }
  0xfe   :  { %439 = vmatprep.subr.bf16.mxu0 %v7275_v51  ;;  %v8201_v54 = vpop.f32.mrb[4].mxu1 }
  0xff   :  { %v541_v55 = vpop.f32.mrb[5].mxu1 }
 0x100   :  { %v6779_v56 = vpop.f32.mrb[6].mxu1 }
 0x101   :  { %440 = vmatpush1.bf16.msra.mxu0 %v7273_v52  ;;  %v557_v58 = vpack.c.bf16 %v6779_v56, %v8201_v54  ;;  %v544_v59 = vpop.f32.mrb[7].mxu1 }
 0x102   :  { %441 = vmatprep.subr.bf16.mxu0 %v7278_v53  ;;  %v556_v61 = vpack.c.bf16 %v544_v59, %v541_v55  ;;  %v7322_v59 = vld [vmem:[%s10807_s23 + $0x104] ss:$8 sps:$4 sm:$0xff]  }
 0x105   :  { %442 = vmatpush1.bf16.msra.mxu0 %v7276_v57 }
 0x106   :  { %443 = vmatprep.subr.bf16.mxu0 %v7281_v60  ;;  %v7319_v60 = vld [vmem:[%s10806_s26 + $0x8] sm:$0xff]  }
 0x109   :  { %444 = vmatpush1.bf16.msra.mxu0 %v7279_v62  ;;  %v7325_v62 = vld [vmem:[%s10807_s23 + $0x114] ss:$8 sps:$4 sm:$0xff]  }
 0x10a   :  { %637 = vmatprep.subr.bf16.mxu0 %v7284_v63  ;;  %v7323_v63 = vld [vmem:[%s10807_s23 + $0x110] ss:$8 sps:$4 sm:$0xff]  }
 0x10c   :  { %5833 = vmatmul.mubr.msk.bf16.vlgmr.msra.gmra.mrb[4].mxu0 %vm307_vm1, %v148_v47 }
 0x10d   :  { %638 = vmatpush1.bf16.msra.mxu0 %v7282_v0  ;;  %475 = vmatprep.mubr.bf16.mxu0 %v7946_v33  ;;  %v7328_v0 = vld [vmem:[%s10807_s23 + $0x124] ss:$8 sps:$4 sm:$0xff]  }
 0x10e   :  { %639 = vmatprep.subr.bf16.mxu0 %v7287_v1  ;;  %v6790_v4 = vpop.f32.mrb[8].mxu1  ;;  %v7326_v1 = vld [vmem:[%s10807_s23 + $0x120] ss:$8 sps:$4 sm:$0xff]  }
 0x10f   :  { %v753_v5 = vpop.f32.mrb[9].mxu1 }
 0x110   :  { %v6791_v6 = vpop.f32.mrb[10].mxu1 }
 0x111   :  { %640 = vmatpush1.bf16.msra.mxu0 %v7285_v2  ;;  %v769_v8 = vpack.c.bf16 %v6791_v6, %v6790_v4  ;;  %v756_v9 = vpop.f32.mrb[11].mxu1  ;;  %v7331_v2 = vld [vmem:[%s10807_s23 + $0x134] ss:$8 sps:$4 sm:$0xff]   ;;  %v7334_v4 = vld [vmem:[%s10807_s23 + $0x144] ss:$8 sps:$4 sm:$0xff]  }
 0x112   :  { %641 = vmatprep.subr.bf16.mxu0 %v7290_v3  ;;  %v768_v11 = vpack.c.bf16 %v756_v9, %v753_v5  ;;  %v7329_v3 = vld [vmem:[%s10807_s23 + $0x130] ss:$8 sps:$4 sm:$0xff]   ;;  %v7332_v5 = vld [vmem:[%s10807_s23 + $0x140] ss:$8 sps:$4 sm:$0xff]   ;;  %v7337_v6 = vld [vmem:[%s10807_s23 + $0x154] ss:$8 sps:$4 sm:$0xff]  }
 0x113   :  { %v7338_v9 = vld [vmem:[%s10807_s23 + $0x160] ss:$8 sps:$4 sm:$0xff]  }
 0x114   :  { %5834 = vmatmul.mubr.msk.bf16.gmra.mrb[8].mxu0 %vm307_vm1, %v149_v43 }
 0x115   :  { %642 = vmatpush1.bf16.msra.mxu0 %v7288_v7  ;;  %669 = vmatprep.mubr.bf16.mxu0 %v7946_v33  ;;  %v7335_v7 = vld [vmem:[%s10807_s23 + $0x150] ss:$8 sps:$4 sm:$0xff]  }
 0x116   :  { %643 = vmatprep.subr.bf16.mxu0 %v7293_v10  ;;  %v7343_v10 = vld [vmem:[%s10807_s23 + $0x174] ss:$8 sps:$4 sm:$0xff]  }
 0x119   :  { %644 = vmatpush1.bf16.msra.mxu0 %v7291_v12  ;;  %v7346_v12 = vld [vmem:[%s10807_s23 + $0x184] ss:$8 sps:$4 sm:$0xff]  }
 0x11a   :  { %645 = vmatprep.subr.bf16.mxu0 %v7296_v13  ;;  %v7344_v13 = vld [vmem:[%s10807_s23 + $0x180] ss:$8 sps:$4 sm:$0xff]  }
 0x11d   :  { %646 = vmatpush1.bf16.msra.mxu0 %v7294_v14  ;;  %v7349_v14 = vld [vmem:[%s10807_s23 + $0x194] ss:$8 sps:$4 sm:$0xff]  }
 0x11e   :  { %647 = vmatprep.subr.bf16.mxu0 %v7299_v15  ;;  %v7347_v15 = vld [vmem:[%s10807_s23 + $0x190] ss:$8 sps:$4 sm:$0xff]  }
 0x121   :  { %648 = vmatpush1.bf16.msra.mxu0 %v7297_v16  ;;  %v7352_v16 = vld [vmem:[%s10807_s23 + $0x1a4] ss:$8 sps:$4 sm:$0xff]  }
 0x122   :  { %849 = vmatprep.subr.bf16.mxu0 %v7302_v17  ;;  %v7350_v17 = vld [vmem:[%s10807_s23 + $0x1a0] ss:$8 sps:$4 sm:$0xff]  }
 0x124   :  { %5867 = vmatmul.mubr.msk.bf16.vlgmr.msra.gmra.mrb[4].mxu0 %vm307_vm1, %v556_v61  ;;  %v7320_v61 = vld [vmem:[%s10807_s23 + $0x100] ss:$8 sps:$4 sm:$0xff]  }
 0x125   :  { %850 = vmatpush1.bf16.msra.mxu0 %v7300_v18  ;;  %679 = vmatprep.mubr.bf16.mxu0 %v7946_v33  ;;  %v7355_v18 = vld [vmem:[%s10807_s23 + $0x1b4] ss:$8 sps:$4 sm:$0xff]  }
 0x126   :  { %851 = vmatprep.subr.bf16.mxu0 %v7305_v19  ;;  %v7353_v19 = vld [vmem:[%s10807_s23 + $0x1b0] ss:$8 sps:$4 sm:$0xff]  }
 0x129   :  { %852 = vmatpush1.bf16.msra.mxu0 %v7303_v20  ;;  %v7358_v20 = vld [vmem:[%s10807_s23 + $0x1c4] ss:$8 sps:$4 sm:$0xff]  }
 0x12a   :  { %853 = vmatprep.subr.bf16.mxu0 %v7308_v21  ;;  %v7356_v21 = vld [vmem:[%s10807_s23 + $0x1c0] ss:$8 sps:$4 sm:$0xff]  }
 0x12c   :  { %5868 = vmatmul.mubr.msk.bf16.gmra.mrb[8].mxu0 %vm307_vm1, %v557_v58  ;;  %v7318_v58 = vld [vmem:[%s10806_s26] sm:$0xff]  }
 0x12d   :  { %854 = vmatpush1.bf16.msra.mxu0 %v7306_v22  ;;  %881 = vmatprep.mubr.bf16.mxu0 %v7946_v33  ;;  %v7361_v22 = vld [vmem:[%s10807_s23 + $0x1d4] ss:$8 sps:$4 sm:$0xff]  }
 0x12e   :  { %855 = vmatprep.subr.bf16.mxu0 %v7311_v23  ;;  %v7359_v23 = vld [vmem:[%s10807_s23 + $0x1d0] ss:$8 sps:$4 sm:$0xff]  }
 0x131   :  { %856 = vmatpush1.bf16.msra.mxu0 %v7309_v24  ;;  %v7362_v24 = vld [vmem:[%s10807_s23 + $0x1e0] ss:$8 sps:$4 sm:$0xff]  }
 0x132   :  { %857 = vmatprep.subr.bf16.mxu0 %v7314_v25  ;;  %v7364_v25 = vld [vmem:[%s10807_s23 + $0x1e4] ss:$8 sps:$4 sm:$0xff]  }
 0x135   :  { %858 = vmatpush1.bf16.msra.mxu0 %v7312_v26  ;;  %v7367_v26 = vld [vmem:[%s10807_s23 + $0x1f4] ss:$8 sps:$4 sm:$0xff]  }
 0x136   :  { %859 = vmatprep.subr.bf16.mxu0 %v7317_v27  ;;  %v7365_v27 = vld [vmem:[%s10807_s23 + $0x1f0] ss:$8 sps:$4 sm:$0xff]  }
 0x139   :  { %860 = vmatpush1.bf16.msra.mxu0 %v7315_v28  ;;  %v7370_v28 = vld [vmem:[%s10807_s23 + $0x4] ss:$8 sps:$4 sm:$0xff]  }
 0x13c   :  { %5901 = vmatmul.mubr.msk.bf16.vlgmr.msra.gmra.mrb[4].mxu0 %vm307_vm1, %v768_v11  ;;  %v7341_v11 = vld [vmem:[%s10807_s23 + $0x170] ss:$8 sps:$4 sm:$0xff]  }
 0x13d   :  { %891 = vmatprep.mubr.bf16.mxu0 %v7946_v33 }
 0x144   :  { %5902 = vmatmul.mubr.msk.bf16.gmra.mrb[8].mxu0 %vm307_vm1, %v769_v8  ;;  %v7340_v8 = vld [vmem:[%s10807_s23 + $0x164] ss:$8 sps:$4 sm:$0xff]  }
 0x145   :  { %1860 = vmatprep.mubr.bf16.mxu0 %v7946_v33 }
 0x20f   :  { %v883_v29 = vpop.f32.mrb[4].mxu0 }
 0x210   :  { %v918_v30 = vmul.f32 0.2, %v883_v29  ;;  %v885_v31 = vpop.f32.mrb[5].mxu0  ;;  %vm910_vm2 = vcmp.gt.f32.partialorder %v883_v29, 0.0 }
 0x211   :  { %v919_v32 = vmul.f32 0.2, %v885_v31  ;;  %v887_v34 = vpop.f32.mrb[6].mxu0  ;;  %vm911_vm3 = vcmp.gt.f32.partialorder %v885_v31, 0.0 }
 0x212   :  { %vm912_vm4 = vcmp.gt.f32.partialorder %v887_v34, 0.0  ;;  %v920_v35 = vmul.f32 0.2, %v887_v34  ;;  %v889_v36 = vpop.f32.mrb[7].mxu0  ;;  %v926_v38 = vsel %vm910_vm2, %v883_v29, %v918_v30  ;;  %v7417_v29 = vld [vmem:[%s10806_s26 + $0x18] sm:$0xff]   ;;  %vm3885_vm2 = vcmask 1043456  }
 0x213   :  { %vm913_vm5 = vcmp.gt.f32.partialorder %v889_v36, 0.0  ;;  %v921_v37 = vmul.f32 0.2, %v889_v36  ;;  %v927_v40 = vsel %vm911_vm3, %v885_v31, %v919_v32  ;;  %vm3881_vm3 = vcmask 64512  }
 0x214   :  { %v928_v39 = vsel %vm912_vm4, %v887_v34, %v920_v35 }
 0x215   :  { %v8297_v41 = vpack.c.bf16 %v928_v39, %v926_v38  ;;  %v929_v42 = vsel %vm913_vm5, %v889_v36, %v921_v37 }
 0x216   :  { %v8299_v43 = vpack.c.bf16 %v929_v42, %v927_v40 }
 0x217   :  { %v893_v44 = vpop.f32.mrb[8].mxu0 }
 0x218   :  { %v922_v45 = vmul.f32 0.2, %v893_v44  ;;  %v895_v46 = vpop.f32.mrb[9].mxu0  ;;  %949 = vmatprep.subr.bf16.mxu1 %v8299_v43  ;;  %1828 = vmatprep.subr.bf16.mxu0 %v8299_v43  ;;  %vm914_vm6 = vcmp.gt.f32.partialorder %v893_v44, 0.0 }
 0x219   :  { %v923_v47 = vmul.f32 0.2, %v895_v46  ;;  %v897_v48 = vpop.f32.mrb[10].mxu0  ;;  %950 = vmatpush1.bf16.msra.mxu1 %v8297_v41  ;;  %1829 = vmatpush1.bf16.msra.mxu0 %v8297_v41  ;;  %vm915_vm7 = vcmp.gt.f32.partialorder %v895_v46, 0.0 }
 0x21a   :  { %vm916_vm8 = vcmp.gt.f32.partialorder %v897_v48, 0.0  ;;  %v924_v49 = vmul.f32 0.2, %v897_v48  ;;  %v899_v50 = vpop.f32.mrb[11].mxu0  ;;  %v930_v52 = vsel %vm914_vm6, %v893_v44, %v922_v45  ;;  %v7368_v45 = vld [vmem:[%s10807_s23] ss:$8 sps:$4 sm:$0xff]  }
 0x21b   :  { %vm917_vm9 = vcmp.gt.f32.partialorder %v899_v50, 0.0  ;;  %v925_v51 = vmul.f32 0.2, %v899_v50  ;;  %v931_v54 = vsel %vm915_vm7, %v895_v46, %v923_v47  ;;  %v7373_v46 = vld [vmem:[%s10807_s23 + $0x14] ss:$8 sps:$4 sm:$0xff]   ;;  %vm5336_vm6 = vcmask 1041408  }
 0x21c   :  { %v932_v53 = vsel %vm916_vm8, %v897_v48, %v924_v49  ;;  %v7371_v47 = vld [vmem:[%s10807_s23 + $0x10] ss:$8 sps:$4 sm:$0xff]   ;;  %v7376_v48 = vld [vmem:[%s10807_s23 + $0x24] ss:$8 sps:$4 sm:$0xff]   ;;  %v7374_v49 = vld [vmem:[%s10807_s23 + $0x20] ss:$8 sps:$4 sm:$0xff]  }
 0x21d   :  { %v8305_v55 = vpack.c.bf16 %v932_v53, %v930_v52  ;;  %v933_v56 = vsel %vm917_vm9, %v899_v50, %v925_v51  ;;  %v7379_v50 = vld [vmem:[%s10807_s23 + $0x34] ss:$8 sps:$4 sm:$0xff]   ;;  %v7377_v51 = vld [vmem:[%s10807_s23 + $0x30] ss:$8 sps:$4 sm:$0xff]   ;;  %v7382_v52 = vld [vmem:[%s10807_s23 + $0x44] ss:$8 sps:$4 sm:$0xff]  }
 0x21e   :  { %v8307_v57 = vpack.c.bf16 %v933_v56, %v931_v54  ;;  %v7380_v53 = vld [vmem:[%s10807_s23 + $0x40] ss:$8 sps:$4 sm:$0xff]   ;;  %v7385_v54 = vld [vmem:[%s10807_s23 + $0x54] ss:$8 sps:$4 sm:$0xff]   ;;  %v7383_v56 = vld [vmem:[%s10807_s23 + $0x50] ss:$8 sps:$4 sm:$0xff]  }
 0x21f   :  { %vm5332_vm7 = vcmask 31744   ;;  %vm5777_vm8 = vcmask 1024  }
 0x220   :  { %951 = vmatprep.subr.bf16.mxu1 %v8307_v57  ;;  %1830 = vmatprep.subr.bf16.mxu0 %v8307_v57 }
 0x221   :  { %952 = vmatpush1.bf16.msra.mxu1 %v8305_v55  ;;  %1831 = vmatpush1.bf16.msra.mxu0 %v8305_v55 }
 0x222   :  { %1037 = vmatprep.subr.bf16.mxu1 %v8299_v43 }
 0x224   :  { %5904 = vmatmul.mubr.msk.bf16.vlgmr.msra.gmra.mrb[12].mxu1 %vm945_vm10, %v7318_v58  ;;  %6076 = vmatmul.mubr.msk.bf16.vlgmr.msra.gmra.mrb[12].mxu0 %vm945_vm10, %v7417_v29  ;;  %v7388_v58 = vld [vmem:[%s10807_s23 + $0x64] ss:$8 sps:$4 sm:$0xff]   ;;  %v7447_v29 = vld [vmem:[%s10807_s23 + $0x294] ss:$8 sps:$4 sm:$0xff]  }
 0x225   :  { %1038 = vmatpush1.bf16.msra.mxu1 %v8297_v41  ;;  %1069 = vmatprep.mubr.bf16.mxu1 %v7946_v33 }
 0x226   :  { %1039 = vmatprep.subr.bf16.mxu1 %v8307_v57 }
 0x229   :  { %1040 = vmatpush1.bf16.msra.mxu1 %v8305_v55 }
 0x22a   :  { %1275 = vmatprep.subr.bf16.mxu1 %v7322_v59  ;;  %v7386_v59 = vld [vmem:[%s10807_s23 + $0x60] ss:$8 sps:$4 sm:$0xff]  }
 0x22c   :  { %5908 = vmatmul.mubr.msk.bf16.vlgmr.msra.gmra.mrb[16].mxu1 %vm945_vm10, %v7319_v60  ;;  %v7391_v60 = vld [vmem:[%s10807_s23 + $0x74] ss:$8 sps:$4 sm:$0xff]  }
 0x22d   :  { %1276 = vmatpush1.bf16.msra.mxu1 %v7320_v61  ;;  %v7389_v61 = vld [vmem:[%s10807_s23 + $0x70] ss:$8 sps:$4 sm:$0xff]  }
 0x22e   :  { %1277 = vmatprep.subr.bf16.mxu1 %v7325_v62  ;;  %v7394_v62 = vld [vmem:[%s10807_s23 + $0x84] ss:$8 sps:$4 sm:$0xff]  }
 0x231   :  { %1278 = vmatpush1.bf16.msra.mxu1 %v7323_v63  ;;  %v7392_v63 = vld [vmem:[%s10807_s23 + $0x80] ss:$8 sps:$4 sm:$0xff]  }
 0x232   :  { %1279 = vmatprep.subr.bf16.mxu1 %v7328_v0  ;;  %v7397_v0 = vld [vmem:[%s10807_s23 + $0x94] ss:$8 sps:$4 sm:$0xff]  }
 0x235   :  { %1280 = vmatpush1.bf16.msra.mxu1 %v7326_v1  ;;  %v7395_v1 = vld [vmem:[%s10807_s23 + $0x90] ss:$8 sps:$4 sm:$0xff]  }
 0x236   :  { %1281 = vmatprep.subr.bf16.mxu1 %v7331_v2  ;;  %v7400_v2 = vld [vmem:[%s10807_s23 + $0xa4] ss:$8 sps:$4 sm:$0xff]  }
 0x239   :  { %1282 = vmatpush1.bf16.msra.mxu1 %v7329_v3  ;;  %v7398_v3 = vld [vmem:[%s10807_s23 + $0xa0] ss:$8 sps:$4 sm:$0xff]  }
 0x23a   :  { %1283 = vmatprep.subr.bf16.mxu1 %v7334_v4  ;;  %v7403_v4 = vld [vmem:[%s10807_s23 + $0xb4] ss:$8 sps:$4 sm:$0xff]  }
 0x23d   :  { %1284 = vmatpush1.bf16.msra.mxu1 %v7332_v5  ;;  %v7401_v5 = vld [vmem:[%s10807_s23 + $0xb0] ss:$8 sps:$4 sm:$0xff]  }
 0x23e   :  { %1285 = vmatprep.subr.bf16.mxu1 %v7337_v6  ;;  %v7406_v6 = vld [vmem:[%s10807_s23 + $0xc4] ss:$8 sps:$4 sm:$0xff]  }
 0x241   :  { %1286 = vmatpush1.bf16.msra.mxu1 %v7335_v7  ;;  %v7404_v7 = vld [vmem:[%s10807_s23 + $0xc0] ss:$8 sps:$4 sm:$0xff]  }
 0x242   :  { %1287 = vmatprep.subr.bf16.mxu1 %v7340_v8  ;;  %v7409_v8 = vld [vmem:[%s10807_s23 + $0xd4] ss:$8 sps:$4 sm:$0xff]  }
 0x245   :  { %1288 = vmatpush1.bf16.msra.mxu1 %v7338_v9  ;;  %v7407_v9 = vld [vmem:[%s10807_s23 + $0xd0] ss:$8 sps:$4 sm:$0xff]  }
 0x246   :  { %1289 = vmatprep.subr.bf16.mxu1 %v7343_v10  ;;  %v7412_v10 = vld [vmem:[%s10807_s23 + $0xe4] ss:$8 sps:$4 sm:$0xff]  }
 0x249   :  { %1290 = vmatpush1.bf16.msra.mxu1 %v7341_v11  ;;  %v7410_v11 = vld [vmem:[%s10807_s23 + $0xe0] ss:$8 sps:$4 sm:$0xff]  }
 0x24a   :  { %1291 = vmatprep.subr.bf16.mxu1 %v7346_v12  ;;  %v7415_v12 = vld [vmem:[%s10807_s23 + $0xf4] ss:$8 sps:$4 sm:$0xff]  }
 0x24d   :  { %1292 = vmatpush1.bf16.msra.mxu1 %v7344_v13  ;;  %v7413_v13 = vld [vmem:[%s10807_s23 + $0xf0] ss:$8 sps:$4 sm:$0xff]  }
 0x24e   :  { %1293 = vmatprep.subr.bf16.mxu1 %v7349_v14  ;;  %v7420_v14 = vld [vmem:[%s10807_s23 + $0x204] ss:$8 sps:$4 sm:$0xff]  }
 0x251   :  { %1294 = vmatpush1.bf16.msra.mxu1 %v7347_v15  ;;  %v7416_v15 = vld [vmem:[%s10806_s26 + $0x10] sm:$0xff]  }
 0x252   :  { %1295 = vmatprep.subr.bf16.mxu1 %v7352_v16  ;;  %v7424_v16 = vld [vmem:[%s10807_s23 + $0x220] ss:$8 sps:$4 sm:$0xff]  }
 0x255   :  { %1296 = vmatpush1.bf16.msra.mxu1 %v7350_v17  ;;  %v7429_v17 = vld [vmem:[%s10807_s23 + $0x234] ss:$8 sps:$4 sm:$0xff]  }
 0x256   :  { %1297 = vmatprep.subr.bf16.mxu1 %v7355_v18  ;;  %v7427_v18 = vld [vmem:[%s10807_s23 + $0x230] ss:$8 sps:$4 sm:$0xff]  }
 0x259   :  { %1298 = vmatpush1.bf16.msra.mxu1 %v7353_v19  ;;  %v7432_v19 = vld [vmem:[%s10807_s23 + $0x244] ss:$8 sps:$4 sm:$0xff]  }
 0x25a   :  { %1299 = vmatprep.subr.bf16.mxu1 %v7358_v20  ;;  %v7430_v20 = vld [vmem:[%s10807_s23 + $0x240] ss:$8 sps:$4 sm:$0xff]  }
 0x25d   :  { %1300 = vmatpush1.bf16.msra.mxu1 %v7356_v21  ;;  %v7435_v21 = vld [vmem:[%s10807_s23 + $0x254] ss:$8 sps:$4 sm:$0xff]  }
 0x25e   :  { %1301 = vmatprep.subr.bf16.mxu1 %v7361_v22  ;;  %v7433_v22 = vld [vmem:[%s10807_s23 + $0x250] ss:$8 sps:$4 sm:$0xff]  }
 0x261   :  { %1302 = vmatpush1.bf16.msra.mxu1 %v7359_v23  ;;  %v7438_v23 = vld [vmem:[%s10807_s23 + $0x264] ss:$8 sps:$4 sm:$0xff]  }
 0x262   :  { %1303 = vmatprep.subr.bf16.mxu1 %v7364_v25  ;;  %v7441_v25 = vld [vmem:[%s10807_s23 + $0x274] ss:$8 sps:$4 sm:$0xff]  }
 0x265   :  { %1304 = vmatpush1.bf16.msra.mxu1 %v7362_v24  ;;  %v7436_v24 = vld [vmem:[%s10807_s23 + $0x260] ss:$8 sps:$4 sm:$0xff]  }
 0x266   :  { %1305 = vmatprep.subr.bf16.mxu1 %v7367_v26  ;;  %v7439_v26 = vld [vmem:[%s10807_s23 + $0x270] ss:$8 sps:$4 sm:$0xff]  }
 0x269   :  { %1306 = vmatpush1.bf16.msra.mxu1 %v7365_v27  ;;  %v7444_v27 = vld [vmem:[%s10807_s23 + $0x284] ss:$8 sps:$4 sm:$0xff]  }
 0x26a   :  { %1478 = vmatprep.subr.bf16.mxu1 %v7370_v28  ;;  %v7442_v28 = vld [vmem:[%s10807_s23 + $0x280] ss:$8 sps:$4 sm:$0xff]  }
 0x2f7   :  { %v8429_v30 = vpop.f32.mrb[12].mxu1 }
 0x2f8   :  { %v985_v31 = vpop.f32.mrb[13].mxu1 }
 0x2f9   :  { %v8431_v32 = vpop.f32.mrb[14].mxu1 }
 0x2fa   :  { %v992_v34 = vpack.c.bf16 %v8431_v32, %v8429_v30  ;;  %v989_v35 = vpop.f32.mrb[15].mxu1  ;;  %v7445_v30 = vld [vmem:[%s10807_s23 + $0x290] ss:$8 sps:$4 sm:$0xff]   ;;  %v7448_v32 = vld [vmem:[%s10807_s23 + $0x2a0] ss:$8 sps:$4 sm:$0xff]  }
 0x2fb   :  { %v993_v36 = vpack.c.bf16 %v989_v35, %v985_v31  ;;  %v7450_v31 = vld [vmem:[%s10807_s23 + $0x2a4] ss:$8 sps:$4 sm:$0xff]   ;;  %v7451_v35 = vld [vmem:[%s10807_s23 + $0x2b0] ss:$8 sps:$4 sm:$0xff]  }
 0x2ff   :  { %v1071_v37 = vpop.f32.mrb[16].mxu1 }
 0x300   :  { %v1073_v38 = vpop.f32.mrb[17].mxu1 }
 0x301   :  { %v1075_v39 = vpop.f32.mrb[18].mxu1 }
 0x302   :  { %v1080_v40 = vpack.c.bf16 %v1075_v39, %v1071_v37  ;;  %v1077_v42 = vpop.f32.mrb[19].mxu1  ;;  %v7454_v37 = vld [vmem:[%s10807_s23 + $0x2c0] ss:$8 sps:$4 sm:$0xff]   ;;  %v7457_v39 = vld [vmem:[%s10807_s23 + $0x2d0] ss:$8 sps:$4 sm:$0xff]  }
 0x303   :  { %v1081_v44 = vpack.c.bf16 %v1077_v42, %v1073_v38  ;;  %v7459_v38 = vld [vmem:[%s10807_s23 + $0x2d4] ss:$8 sps:$4 sm:$0xff]   ;;  %v7460_v42 = vld [vmem:[%s10807_s23 + $0x2e0] ss:$8 sps:$4 sm:$0xff]  }
 0x305   :  { %1307 = vmatprep.mubr.bf16.mxu1 %v1081_v44  ;;  %v7465_v44 = vld [vmem:[%s10807_s23 + $0x2f4] ss:$8 sps:$4 sm:$0xff]  }
 0x306   :  { %1308 = vmatmul.mubr.bf16.vlgmr.msra.gmra.mrb[20].mxu1 %v1080_v40  ;;  %v7462_v40 = vld [vmem:[%s10807_s23 + $0x2e4] ss:$8 sps:$4 sm:$0xff]  }
 0x307   :  { %1479 = vmatpush1.bf16.msra.mxu1 %v7368_v45  ;;  %1510 = vmatprep.mubr.bf16.mxu1 %v993_v36  ;;  %v7456_v36 = vld [vmem:[%s10807_s23 + $0x2c4] ss:$8 sps:$4 sm:$0xff]   ;;  %v7463_v45 = vld [vmem:[%s10807_s23 + $0x2f0] ss:$8 sps:$4 sm:$0xff]  }
 0x308   :  { %1480 = vmatprep.subr.bf16.mxu1 %v7373_v46  ;;  %v7468_v46 = vld [vmem:[%s10807_s23 + $0x304] ss:$8 sps:$4 sm:$0xff]  }
 0x30b   :  { %1481 = vmatpush1.bf16.msra.mxu1 %v7371_v47  ;;  %v8639_v47 = vpop.f32.mrb[12].mxu0 }
 0x30c   :  { %1482 = vmatprep.subr.bf16.mxu1 %v7376_v48  ;;  %v8641_v48 = vpop.f32.mrb[13].mxu0 }
 0x30f   :  { %1483 = vmatpush1.bf16.msra.mxu1 %v7374_v49  ;;  %v8643_v49 = vpop.f32.mrb[14].mxu0 }
 0x310   :  { %1484 = vmatprep.subr.bf16.mxu1 %v7379_v50  ;;  %v1871_v50 = vpack.c.bf16 %v8643_v49, %v8639_v47  ;;  %v2195_v47 = vld [vmem:[%s10777_s5 + $0x190] sm:$0xff] }
 0x313   :  { %1485 = vmatpush1.bf16.msra.mxu1 %v7377_v51  ;;  %v8647_v51 = vpop.f32.mrb[15].mxu0 }
 0x314   :  { %1486 = vmatprep.subr.bf16.mxu1 %v7382_v52  ;;  %v1872_v52 = vpack.c.bf16 %v8647_v51, %v8641_v48  ;;  %v7475_v48 = vld [vmem:[%s10807_s23 + $0x330] ss:$8 sps:$4 sm:$0xff]   ;;  %v7480_v51 = vld [vmem:[%s10807_s23 + $0x344] ss:$8 sps:$4 sm:$0xff]  }
 0x317   :  { %1487 = vmatpush1.bf16.msra.mxu1 %v7380_v53  ;;  %v2146_v53 = vld [vmem:[%s10777_s5 + $0x8] sm:$0xff] }
 0x318   :  { %1488 = vmatprep.subr.bf16.mxu1 %v7385_v54  ;;  %v2148_v54 = vld [vmem:[%s10777_s5 + $0x18] sm:$0xff] }
 0x31b   :  { %1489 = vmatpush1.bf16.msra.mxu1 %v7383_v56  ;;  %v2145_v56 = vld [vmem:[%s10777_s5] sm:$0xff] }
 0x31c   :  { %1490 = vmatprep.subr.bf16.mxu1 %v7388_v58  ;;  %v8660_v58 = vpack.c.bf16 %v2148_v54, %v2146_v53  ;;  %v2181_v53 = vld [vmem:[%s10777_s5 + $0x120] sm:$0xff]  ;;  %v2183_v54 = vld [vmem:[%s10777_s5 + $0x130] sm:$0xff] }
 0x31e   :  { %6793 = vmatprep.subr.bf16.mxu0 %v8660_v58 }
 0x31f   :  { %1491 = vmatpush1.bf16.msra.mxu1 %v7386_v59  ;;  %v2147_v59 = vld [vmem:[%s10777_s5 + $0x10] sm:$0xff] }
 0x320   :  { %1492 = vmatprep.subr.bf16.mxu1 %v7391_v60  ;;  %v2150_v60 = vld [vmem:[%s10777_s5 + $0x28] sm:$0xff] }
 0x323   :  { %1493 = vmatpush1.bf16.msra.mxu1 %v7389_v61  ;;  %v2152_v61 = vld [vmem:[%s10777_s5 + $0x38] sm:$0xff] }
 0x324   :  { %1494 = vmatprep.subr.bf16.mxu1 %v7394_v62  ;;  %v8671_v62 = vpack.c.bf16 %v2147_v59, %v2145_v56  ;;  %v2186_v56 = vld [vmem:[%s10777_s5 + $0x148] sm:$0xff]  ;;  %v2188_v59 = vld [vmem:[%s10777_s5 + $0x158] sm:$0xff] }
 0x326   :  { %6795 = vmatpush1.bf16.msra.mxu0 %v8671_v62 }
 0x327   :  { %1495 = vmatpush1.bf16.msra.mxu1 %v7392_v63  ;;  %v8673_v63 = vpack.c.bf16 %v2152_v61, %v2150_v60  ;;  %v8833_v60 = vpack.c.bf16 %v2183_v54, %v2181_v53  ;;  %v8836_v61 = vpack.c.bf16 %v2188_v59, %v2186_v56  ;;  %v7496_v53 = vld [vmem:[%s10807_s23 + $0x3a0] ss:$8 sps:$4 sm:$0xff]   ;;  %v7501_v54 = vld [vmem:[%s10807_s23 + $0x3b4] ss:$8 sps:$4 sm:$0xff]   ;;  %v7499_v56 = vld [vmem:[%s10807_s23 + $0x3b0] ss:$8 sps:$4 sm:$0xff]  }
 0x328   :  { %1496 = vmatprep.subr.bf16.mxu1 %v7397_v0  ;;  %v2149_v0 = vld [vmem:[%s10777_s5 + $0x20] sm:$0xff] }
 0x329   :  { %6797 = vmatprep.subr.bf16.mxu0 %v8673_v63  ;;  %v7504_v59 = vld [vmem:[%s10807_s23 + $0x3c4] ss:$8 sps:$4 sm:$0xff]  }
 0x32b   :  { %1497 = vmatpush1.bf16.msra.mxu1 %v7395_v1  ;;  %v2151_v1 = vld [vmem:[%s10777_s5 + $0x30] sm:$0xff] }
 0x32c   :  { %1498 = vmatprep.subr.bf16.mxu1 %v7400_v2  ;;  %v2154_v2 = vld [vmem:[%s10777_s5 + $0x48] sm:$0xff] }
 0x32f   :  { %1499 = vmatpush1.bf16.msra.mxu1 %v7398_v3  ;;  %v2156_v3 = vld [vmem:[%s10777_s5 + $0x58] sm:$0xff] }
 0x330   :  { %1500 = vmatprep.subr.bf16.mxu1 %v7403_v4  ;;  %v8689_v4 = vpack.c.bf16 %v2151_v1, %v2149_v0  ;;  %v2185_v0 = vld [vmem:[%s10777_s5 + $0x140] sm:$0xff]  ;;  %v2187_v1 = vld [vmem:[%s10777_s5 + $0x150] sm:$0xff] }
 0x332   :  { %6799 = vmatpush1.bf16.msra.mxu0 %v8689_v4 }
 0x333   :  { %1501 = vmatpush1.bf16.msra.mxu1 %v7401_v5  ;;  %v8692_v5 = vpack.c.bf16 %v2156_v3, %v2154_v2  ;;  %v2190_v2 = vld [vmem:[%s10777_s5 + $0x168] sm:$0xff]  ;;  %v2192_v3 = vld [vmem:[%s10777_s5 + $0x178] sm:$0xff] }
 0x334   :  { %1502 = vmatprep.subr.bf16.mxu1 %v7406_v6  ;;  %v2153_v6 = vld [vmem:[%s10777_s5 + $0x40] sm:$0xff] }
 0x335   :  { %6801 = vmatprep.subr.bf16.mxu0 %v8692_v5 }
 0x337   :  { %1503 = vmatpush1.bf16.msra.mxu1 %v7404_v7  ;;  %v2155_v7 = vld [vmem:[%s10777_s5 + $0x50] sm:$0xff] }
 0x338   :  { %1504 = vmatprep.subr.bf16.mxu1 %v7409_v8  ;;  %v2158_v8 = vld [vmem:[%s10777_s5 + $0x68] sm:$0xff] }
 0x33b   :  { %1505 = vmatpush1.bf16.msra.mxu1 %v7407_v9  ;;  %v2160_v9 = vld [vmem:[%s10777_s5 + $0x78] sm:$0xff] }
 0x33c   :  { %1506 = vmatprep.subr.bf16.mxu1 %v7412_v10  ;;  %v8707_v10 = vpack.c.bf16 %v2155_v7, %v2153_v6  ;;  %v8851_v6 = vpack.c.bf16 %v2187_v1, %v2185_v0  ;;  %v8854_v7 = vpack.c.bf16 %v2192_v3, %v2190_v2  ;;  %v7502_v0 = vld [vmem:[%s10807_s23 + $0x3c0] ss:$8 sps:$4 sm:$0xff]   ;;  %v7507_v1 = vld [vmem:[%s10807_s23 + $0x3d4] ss:$8 sps:$4 sm:$0xff]   ;;  %v7505_v2 = vld [vmem:[%s10807_s23 + $0x3d0] ss:$8 sps:$4 sm:$0xff]  }
 0x33d   :  { %v7510_v3 = vld [vmem:[%s10807_s23 + $0x3e4] ss:$8 sps:$4 sm:$0xff]  }
 0x33e   :  { %6803 = vmatpush1.bf16.msra.mxu0 %v8707_v10 }
 0x33f   :  { %1507 = vmatpush1.bf16.msra.mxu1 %v7410_v11  ;;  %v8710_v11 = vpack.c.bf16 %v2160_v9, %v2158_v8  ;;  %v2189_v8 = vld [vmem:[%s10777_s5 + $0x160] sm:$0xff]  ;;  %v2191_v9 = vld [vmem:[%s10777_s5 + $0x170] sm:$0xff] }
 0x340   :  { %1508 = vmatprep.subr.bf16.mxu1 %v7415_v12  ;;  %v2157_v12 = vld [vmem:[%s10777_s5 + $0x60] sm:$0xff] }
 0x341   :  { %6805 = vmatprep.subr.bf16.mxu0 %v8710_v11 }
 0x343   :  { %1509 = vmatpush1.bf16.msra.mxu1 %v7413_v13  ;;  %v2159_v13 = vld [vmem:[%s10777_s5 + $0x70] sm:$0xff] }
 0x344   :  { %1532 = vmatprep.subr.bf16.mxu1 %v8299_v43  ;;  %v7418_v43 = vld [vmem:[%s10807_s23 + $0x200] ss:$8 sps:$4 sm:$0xff]  }
 0x346   :  { %1511 = vmatmul.mubr.bf16.vlgmr.msra.gmra.mrb[20].mxu1 %v992_v34  ;;  %v7453_v34 = vld [vmem:[%s10807_s23 + $0x2b4] ss:$8 sps:$4 sm:$0xff]  }
 0x347   :  { %1533 = vmatpush1.bf16.msra.mxu1 %v8297_v41  ;;  %1564 = vmatprep.mubr.bf16.mxu1 %v7946_v33  ;;  %v7423_v41 = vld [vmem:[%s10807_s23 + $0x214] ss:$8 sps:$4 sm:$0xff]  }
 0x348   :  { %1534 = vmatprep.subr.bf16.mxu1 %v8307_v57  ;;  %v7421_v57 = vld [vmem:[%s10807_s23 + $0x210] ss:$8 sps:$4 sm:$0xff]  }
 0x34b   :  { %1535 = vmatpush1.bf16.msra.mxu1 %v8305_v55  ;;  %v7426_v55 = vld [vmem:[%s10807_s23 + $0x224] ss:$8 sps:$4 sm:$0xff]  }
 0x34c   :  { %1770 = vmatprep.subr.bf16.mxu1 %v7420_v14  ;;  %v2162_v14 = vld [vmem:[%s10777_s5 + $0x88] sm:$0xff] }
 0x34e   :  { %6008 = vmatmul.mubr.msk.bf16.vlgmr.msra.gmra.mrb[24].mxu1 %vm945_vm10, %v7416_v15  ;;  %v2164_v15 = vld [vmem:[%s10777_s5 + $0x98] sm:$0xff] }
 0x34f   :  { %1771 = vmatpush1.bf16.msra.mxu1 %v7418_v43  ;;  %v8725_v43 = vpack.c.bf16 %v2159_v13, %v2157_v12  ;;  %v8863_v12 = vpack.c.bf16 %v2191_v9, %v2189_v8  ;;  %v7508_v8 = vld [vmem:[%s10807_s23 + $0x3e0] ss:$8 sps:$4 sm:$0xff]   ;;  %v7513_v9 = vld [vmem:[%s10807_s23 + $0x3f4] ss:$8 sps:$4 sm:$0xff]  }
 0x350   :  { %1772 = vmatprep.subr.bf16.mxu1 %v7423_v41  ;;  %v8728_v41 = vpack.c.bf16 %v2164_v15, %v2162_v14 }
 0x351   :  { %6807 = vmatpush1.bf16.msra.mxu0 %v8725_v43 }
 0x352   :  { %6809 = vmatprep.subr.bf16.mxu0 %v8728_v41 }
 0x353   :  { %1773 = vmatpush1.bf16.msra.mxu1 %v7421_v57  ;;  %v2161_v57 = vld [vmem:[%s10777_s5 + $0x80] sm:$0xff] }
 0x354   :  { %1774 = vmatprep.subr.bf16.mxu1 %v7426_v55  ;;  %v2163_v55 = vld [vmem:[%s10777_s5 + $0x90] sm:$0xff] }
 0x357   :  { %1775 = vmatpush1.bf16.msra.mxu1 %v7424_v16  ;;  %v2166_v16 = vld [vmem:[%s10777_s5 + $0xa8] sm:$0xff] }
 0x358   :  { %1776 = vmatprep.subr.bf16.mxu1 %v7429_v17  ;;  %v2168_v17 = vld [vmem:[%s10777_s5 + $0xb8] sm:$0xff] }
 0x35b   :  { %1777 = vmatpush1.bf16.msra.mxu1 %v7427_v18  ;;  %v8743_v18 = vpack.c.bf16 %v2163_v55, %v2161_v57 }
 0x35c   :  { %1778 = vmatprep.subr.bf16.mxu1 %v7432_v19  ;;  %v8746_v19 = vpack.c.bf16 %v2168_v17, %v2166_v16  ;;  %v7466_v17 = vld [vmem:[%s10807_s23 + $0x300] ss:$8 sps:$4 sm:$0xff]  }
 0x35d   :  { %6811 = vmatpush1.bf16.msra.mxu0 %v8743_v18 }
 0x35e   :  { %6813 = vmatprep.subr.bf16.mxu0 %v8746_v19 }
 0x35f   :  { %1779 = vmatpush1.bf16.msra.mxu1 %v7430_v20  ;;  %v2165_v20 = vld [vmem:[%s10777_s5 + $0xa0] sm:$0xff] }
 0x360   :  { %1780 = vmatprep.subr.bf16.mxu1 %v7435_v21  ;;  %v2167_v21 = vld [vmem:[%s10777_s5 + $0xb0] sm:$0xff] }
 0x363   :  { %1781 = vmatpush1.bf16.msra.mxu1 %v7433_v22  ;;  %v2170_v22 = vld [vmem:[%s10777_s5 + $0xc8] sm:$0xff] }
 0x364   :  { %1782 = vmatprep.subr.bf16.mxu1 %v7438_v23  ;;  %v2172_v23 = vld [vmem:[%s10777_s5 + $0xd8] sm:$0xff] }
 0x367   :  { %1783 = vmatpush1.bf16.msra.mxu1 %v7436_v24  ;;  %v8761_v24 = vpack.c.bf16 %v2167_v21, %v2165_v20  ;;  %v7471_v20 = vld [vmem:[%s10807_s23 + $0x314] ss:$8 sps:$4 sm:$0xff]   ;;  %v7469_v21 = vld [vmem:[%s10807_s23 + $0x310] ss:$8 sps:$4 sm:$0xff]  }
 0x368   :  { %1784 = vmatprep.subr.bf16.mxu1 %v7441_v25  ;;  %v8764_v25 = vpack.c.bf16 %v2172_v23, %v2170_v22  ;;  %v7474_v22 = vld [vmem:[%s10807_s23 + $0x324] ss:$8 sps:$4 sm:$0xff]   ;;  %v7472_v23 = vld [vmem:[%s10807_s23 + $0x320] ss:$8 sps:$4 sm:$0xff]  }
 0x369   :  { %6815 = vmatpush1.bf16.msra.mxu0 %v8761_v24 }
 0x36a   :  { %6817 = vmatprep.subr.bf16.mxu0 %v8764_v25 }
 0x36b   :  { %1785 = vmatpush1.bf16.msra.mxu1 %v7439_v26  ;;  %v2169_v26 = vld [vmem:[%s10777_s5 + $0xc0] sm:$0xff] }
 0x36c   :  { %1786 = vmatprep.subr.bf16.mxu1 %v7444_v27  ;;  %v2171_v27 = vld [vmem:[%s10777_s5 + $0xd0] sm:$0xff] }
 0x36f   :  { %1787 = vmatpush1.bf16.msra.mxu1 %v7442_v28  ;;  %v2174_v28 = vld [vmem:[%s10777_s5 + $0xe8] sm:$0xff] }
 0x370   :  { %1788 = vmatprep.subr.bf16.mxu1 %v7447_v29  ;;  %v2176_v29 = vld [vmem:[%s10777_s5 + $0xf8] sm:$0xff] }
 0x373   :  { %1789 = vmatpush1.bf16.msra.mxu1 %v7445_v30  ;;  %v8779_v30 = vpack.c.bf16 %v2171_v27, %v2169_v26  ;;  %v7477_v26 = vld [vmem:[%s10807_s23 + $0x334] ss:$8 sps:$4 sm:$0xff]  }
 0x374   :  { %1790 = vmatprep.subr.bf16.mxu1 %v7450_v31  ;;  %v8782_v31 = vpack.c.bf16 %v2176_v29, %v2174_v28  ;;  %v7483_v27 = vld [vmem:[%s10807_s23 + $0x354] ss:$8 sps:$4 sm:$0xff]   ;;  %v7481_v28 = vld [vmem:[%s10807_s23 + $0x350] ss:$8 sps:$4 sm:$0xff]   ;;  %v7486_v29 = vld [vmem:[%s10807_s23 + $0x364] ss:$8 sps:$4 sm:$0xff]  }
 0x375   :  { %6819 = vmatpush1.bf16.msra.mxu0 %v8779_v30 }
 0x376   :  { %6821 = vmatprep.subr.bf16.mxu0 %v8782_v31 }
 0x377   :  { %1791 = vmatpush1.bf16.msra.mxu1 %v7448_v32  ;;  %v2173_v32 = vld [vmem:[%s10777_s5 + $0xe0] sm:$0xff] }
 0x378   :  { %1792 = vmatprep.subr.bf16.mxu1 %v7453_v34  ;;  %v2175_v34 = vld [vmem:[%s10777_s5 + $0xf0] sm:$0xff] }
 0x37b   :  { %1793 = vmatpush1.bf16.msra.mxu1 %v7451_v35  ;;  %v2178_v35 = vld [vmem:[%s10777_s5 + $0x108] sm:$0xff] }
 0x37c   :  { %1794 = vmatprep.subr.bf16.mxu1 %v7456_v36  ;;  %v2180_v36 = vld [vmem:[%s10777_s5 + $0x118] sm:$0xff] }
 0x37f   :  { %1795 = vmatpush1.bf16.msra.mxu1 %v7454_v37  ;;  %v8797_v37 = vpack.c.bf16 %v2175_v34, %v2173_v32  ;;  %v7484_v32 = vld [vmem:[%s10807_s23 + $0x360] ss:$8 sps:$4 sm:$0xff]   ;;  %v7489_v34 = vld [vmem:[%s10807_s23 + $0x374] ss:$8 sps:$4 sm:$0xff]  }
 0x380   :  { %1796 = vmatprep.subr.bf16.mxu1 %v7459_v38  ;;  %v8800_v38 = vpack.c.bf16 %v2180_v36, %v2178_v35  ;;  %v7487_v35 = vld [vmem:[%s10807_s23 + $0x370] ss:$8 sps:$4 sm:$0xff]   ;;  %v7492_v36 = vld [vmem:[%s10807_s23 + $0x384] ss:$8 sps:$4 sm:$0xff]  }
 0x381   :  { %6823 = vmatpush1.bf16.msra.mxu0 %v8797_v37 }
 0x382   :  { %6825 = vmatprep.subr.bf16.mxu0 %v8800_v38 }
 0x383   :  { %1797 = vmatpush1.bf16.msra.mxu1 %v7457_v39  ;;  %v2177_v39 = vld [vmem:[%s10777_s5 + $0x100] sm:$0xff] }
 0x384   :  { %1798 = vmatprep.subr.bf16.mxu1 %v7462_v40  ;;  %v2179_v40 = vld [vmem:[%s10777_s5 + $0x110] sm:$0xff] }
 0x387   :  { %1799 = vmatpush1.bf16.msra.mxu1 %v7460_v42  ;;  %v2182_v42 = vld [vmem:[%s10777_s5 + $0x128] sm:$0xff] }
 0x388   :  { %1800 = vmatprep.subr.bf16.mxu1 %v7465_v44  ;;  %v2184_v44 = vld [vmem:[%s10777_s5 + $0x138] sm:$0xff] }
 0x38b   :  { %1801 = vmatpush1.bf16.msra.mxu1 %v7463_v45  ;;  %v8815_v45 = vpack.c.bf16 %v2179_v40, %v2177_v39  ;;  %v7490_v39 = vld [vmem:[%s10807_s23 + $0x380] ss:$8 sps:$4 sm:$0xff]   ;;  %v7495_v40 = vld [vmem:[%s10807_s23 + $0x394] ss:$8 sps:$4 sm:$0xff]  }
 0x38c   :  { %2066 = vmatprep.subr.bf16.mxu1 %v7468_v46  ;;  %v8818_v46 = vpack.c.bf16 %v2184_v44, %v2182_v42  ;;  %v7493_v42 = vld [vmem:[%s10807_s23 + $0x390] ss:$8 sps:$4 sm:$0xff]   ;;  %v7498_v44 = vld [vmem:[%s10807_s23 + $0x3a4] ss:$8 sps:$4 sm:$0xff]  }
 0x38d   :  { %6827 = vmatpush1.bf16.msra.mxu0 %v8815_v45 }
 0x38e   :  { %6829 = vmatprep.subr.bf16.mxu0 %v8818_v46 }
 0x391   :  { %6831 = vmatpush1.bf16.msra.mxu0 %v8833_v60 }
 0x392   :  { %6833 = vmatprep.subr.bf16.mxu0 %v8836_v61 }
 0x395   :  { %6835 = vmatpush1.bf16.msra.mxu0 %v8851_v6 }
 0x396   :  { %6837 = vmatprep.subr.bf16.mxu0 %v8854_v7 }
 0x399   :  { %6839 = vmatpush1.bf16.msra.mxu0 %v8863_v12 }
 0x421   :  { %v1566_v13 = vpop.f32.mrb[24].mxu1 }
 0x422   :  { %v1568_v14 = vpop.f32.mrb[25].mxu1 }
 0x423   :  { %v1570_v15 = vpop.f32.mrb[26].mxu1 }
 0x424   :  { %v1575_v57 = vpack.c.bf16 %v1570_v15, %v1566_v13  ;;  %v1572_v55 = vpop.f32.mrb[27].mxu1  ;;  %v7511_v13 = vld [vmem:[%s10807_s23 + $0x3f0] ss:$8 sps:$4 sm:$0xff]  }
 0x425   :  { %v1576_v16 = vpack.c.bf16 %v1572_v55, %v1568_v14  ;;  %v2194_v14 = vld [vmem:[%s10777_s5 + $0x188] sm:$0xff]  ;;  %v2196_v15 = vld [vmem:[%s10777_s5 + $0x198] sm:$0xff]  ;;  %v2193_v55 = vld [vmem:[%s10777_s5 + $0x180] sm:$0xff] }
 0x426   :  { %v8981_v49 = vpack.c.bf16 %v2195_v47, %v2193_v55 }
 0x427   :  { %1802 = vmatprep.mubr.bf16.mxu1 %v1576_v16  ;;  %v2200_v16 = vld [vmem:[%s10777_s5 + $0x1b8] sm:$0xff] }
 0x428   :  { %1803 = vmatmul.mubr.bf16.vlgmr.msra.gmra.mrb[20].mxu1 %v1575_v57  ;;  %v8973_v57 = vpack.c.bf16 %v2196_v15, %v2194_v14 }
 0x429   :  { %2067 = vmatpush1.bf16.msra.mxu1 %v7466_v17  ;;  %2098 = vmatprep.mubr.bf16.mxu1 %v1872_v52  ;;  %v7478_v52 = vld [vmem:[%s10807_s23 + $0x340] ss:$8 sps:$4 sm:$0xff]  }
 0x42a   :  { %2068 = vmatprep.subr.bf16.mxu1 %v7471_v20  ;;  %6841 = vmatprep.subr.bf16.mxu0 %v8973_v57  ;;  %v2197_v20 = vld [vmem:[%s10777_s5 + $0x1a0] sm:$0xff] }
 0x42b   :  { %6843 = vmatpush1.bf16.msra.mxu0 %v8981_v49 }
 0x42d   :  { %2069 = vmatpush1.bf16.msra.mxu1 %v7469_v21  ;;  %v2199_v21 = vld [vmem:[%s10777_s5 + $0x1b0] sm:$0xff] }
 0x42e   :  { %2070 = vmatprep.subr.bf16.mxu1 %v7474_v22  ;;  %v8999_v22 = vpack.c.bf16 %v2199_v21, %v2197_v20 }
 0x431   :  { %2071 = vmatpush1.bf16.msra.mxu1 %v7472_v23  ;;  %v2202_v23 = vld [vmem:[%s10777_s5 + $0x1c8] sm:$0xff] }
 0x432   :  { %2072 = vmatprep.subr.bf16.mxu1 %v7477_v26  ;;  %v2204_v26 = vld [vmem:[%s10777_s5 + $0x1d8] sm:$0xff] }
 0x435   :  { %2073 = vmatpush1.bf16.msra.mxu1 %v7475_v48  ;;  %v9009_v48 = vpack.c.bf16 %v2204_v26, %v2202_v23 }
 0x436   :  { %2074 = vmatprep.subr.bf16.mxu1 %v7480_v51  ;;  %v2201_v51 = vld [vmem:[%s10777_s5 + $0x1c0] sm:$0xff] }
 0x439   :  { %2075 = vmatpush1.bf16.msra.mxu1 %v7478_v52  ;;  %v2203_v52 = vld [vmem:[%s10777_s5 + $0x1d0] sm:$0xff] }
 0x43a   :  { %2076 = vmatprep.subr.bf16.mxu1 %v7483_v27  ;;  %v9017_v27 = vpack.c.bf16 %v2203_v52, %v2201_v51 }
 0x43d   :  { %2077 = vmatpush1.bf16.msra.mxu1 %v7481_v28  ;;  %v2206_v28 = vld [vmem:[%s10777_s5 + $0x1e8] sm:$0xff] }
 0x43e   :  { %2078 = vmatprep.subr.bf16.mxu1 %v7486_v29  ;;  %v2208_v29 = vld [vmem:[%s10777_s5 + $0x1f8] sm:$0xff] }
 0x441   :  { %2079 = vmatpush1.bf16.msra.mxu1 %v7484_v32  ;;  %v2205_v32 = vld [vmem:[%s10777_s5 + $0x1e0] sm:$0xff] }
 0x442   :  { %2080 = vmatprep.subr.bf16.mxu1 %v7489_v34  ;;  %v9030_v34 = vpack.c.bf16 %v2208_v29, %v2206_v28 }
 0x445   :  { %2081 = vmatpush1.bf16.msra.mxu1 %v7487_v35  ;;  %v2207_v35 = vld [vmem:[%s10777_s5 + $0x1f0] sm:$0xff] }
 0x446   :  { %2082 = vmatprep.subr.bf16.mxu1 %v7492_v36  ;;  %v9035_v36 = vpack.c.bf16 %v2207_v35, %v2205_v32  ;;  %v7947_v32 = vmov 1966171168  }
 0x449   :  { %2083 = vmatpush1.bf16.msra.mxu1 %v7490_v39 }
 0x44a   :  { %2084 = vmatprep.subr.bf16.mxu1 %v7495_v40 }
 0x44d   :  { %2085 = vmatpush1.bf16.msra.mxu1 %v7493_v42 }
 0x44e   :  { %2086 = vmatprep.subr.bf16.mxu1 %v7498_v44 }
 0x451   :  { %2087 = vmatpush1.bf16.msra.mxu1 %v7496_v53 }
 0x452   :  { %2088 = vmatprep.subr.bf16.mxu1 %v7501_v54 }
 0x455   :  { %2089 = vmatpush1.bf16.msra.mxu1 %v7499_v56 }
 0x456   :  { %2090 = vmatprep.subr.bf16.mxu1 %v7504_v59 }
 0x459   :  { %2091 = vmatpush1.bf16.msra.mxu1 %v7502_v0 }
 0x45a   :  { %2092 = vmatprep.subr.bf16.mxu1 %v7507_v1 }
 0x45d   :  { %2093 = vmatpush1.bf16.msra.mxu1 %v7505_v2 }
 0x45e   :  { %2094 = vmatprep.subr.bf16.mxu1 %v7510_v3 }
 0x461   :  { %2095 = vmatpush1.bf16.msra.mxu1 %v7508_v8 }
 0x462   :  { %2096 = vmatprep.subr.bf16.mxu1 %v7513_v9 }
 0x465   :  { %2097 = vmatpush1.bf16.msra.mxu1 %v7511_v13 }
 0x468   :  { %2099 = vmatmul.mubr.bf16.vlgmr.msra.gmra.mrb[20].mxu1 %v1871_v50  ;;  %v2198_v50 = vld [vmem:[%s10777_s5 + $0x1a8] sm:$0xff] }
 0x469   :  { %3040 = vmatprep.mubr.bf16.mxu1 %v7946_v33  ;;  %v8991_v17 = vpack.c.bf16 %v2200_v16, %v2198_v50 }
 0x46b   :  { %6845 = vmatprep.subr.bf16.mxu0 %v8991_v17 }
 0x46c   :  { %6847 = vmatpush1.bf16.msra.mxu0 %v8999_v22 }
 0x46d   :  { %6849 = vmatprep.subr.bf16.mxu0 %v9009_v48 }
 0x470   :  { %6851 = vmatpush1.bf16.msra.mxu0 %v9017_v27 }
 0x471   :  { %6853 = vmatprep.subr.bf16.mxu0 %v9030_v34 }
 0x474   :  { %6855 = vmatpush1.bf16.msra.mxu0 %v9035_v36 }
 0x475   :  { %6857 = vmatprep.subr.bf16.mxu0 %v8660_v58 }
 0x53b   :  { %v9040_v39 = vpop.f32.mrb[20].mxu1 }
 0x53c   :  { %v9042_v40 = vpop.f32.mrb[21].mxu1  ;;  %v2127_v44 = vmul.f32 %v9040_v39, %v9040_v39 }
 0x53d   :  { %v9044_v42 = vpop.f32.mrb[22].mxu1  ;;  %v2128_v58 = vmul.f32 %v9042_v40, %v9042_v40 }
 0x53e   :  { %v2113_v53 = vadd.f32 %v9044_v42, %v9040_v39  ;;  %v2129_v54 = vmul.f32 %v9044_v42, %v9044_v42  ;;  %v9052_v56 = vpop.f32.mrb[23].mxu1 }
 0x53f   :  { %v2120_v59 = vadd.f32 %v9052_v56, %v9042_v40  ;;  %v2130_v0 = vmul.f32 %v9052_v56, %v9052_v56 }
 0x540   :  { %v2114_v1 = vrot.slane %v2113_v53, 4  ;;  %v2131_v2 = vadd.f32 %v2129_v54, %v2127_v44 }
 0x541   :  { %v2121_v3 = vrot.slane %v2120_v59, 4  ;;  %v2138_v8 = vadd.f32 %v2130_v0, %v2128_v58  ;;  %v2410_v58 = vld [vmem:[%s10780_s7] sm:$0x3] }
 0x542   :  { %v2115_v9 = vadd.f32 %v2114_v1, %v2113_v53  ;;  %v2359_v53 = vld [vmem:[%s10779_s6] sm:$0x3] }
 0x543   :  { %v2122_v13 = vadd.f32 %v2121_v3, %v2120_v59  ;;  %v2139_v14 = vrot.slane %v2138_v8, 4 }
 0x544   :  { %v2116_v15 = vrot.slane %v2115_v9, 2 }
 0x545   :  { %v2123_v55 = vrot.slane %v2122_v13, 2  ;;  %v2140_v47 = vadd.f32 %v2139_v14, %v2138_v8 }
 0x546   :  { %v2117_v50 = vadd.f32 %v2116_v15, %v2115_v9 }
 0x547   :  { %v2124_v16 = vadd.f32 %v2123_v55, %v2122_v13  ;;  %v2141_v20 = vrot.slane %v2140_v47, 2 }
 0x548   :  { %v2118_v21 = vrot.slane %v2117_v50, 1 }
 0x549   :  { %v2125_v23 = vrot.slane %v2124_v16, 1  ;;  %v2142_v26 = vadd.f32 %v2141_v20, %v2140_v47 }
 0x54a   :  { %v2119_v28 = vadd.f32 %v2118_v21, %v2117_v50 }
 0x54b   :  { %v2126_v51 = vadd.f32 %v2125_v23, %v2124_v16  ;;  %v2143_v52 = vrot.slane %v2142_v26, 1 }
 0x54d   :  { %2273 = vmatprep.mubr.f32.mxu0 %v2126_v51  ;;  %v2144_v29 = vadd.f32 %v2143_v52, %v2142_v26 }
 0x54e   :  { %2274 = vmatmul.mubr.f32.vlgmr.msra.gmra.mrb[16].mxu0 %v2119_v28 }
 0x54f   :  { %6859 = vmatpush1.bf16.msra.mxu0 %v8671_v62  ;;  %2346 = vmatprep.mubr.f32.mxu0 %v2144_v29  ;;  %v2132_v62 = vrot.slane %v2131_v2, 4 }
 0x550   :  { %6861 = vmatprep.subr.bf16.mxu0 %v8673_v63 }
 0x551   :  { %v2133_v63 = vadd.f32 %v2132_v62, %v2131_v2 }
 0x553   :  { %6863 = vmatpush1.bf16.msra.mxu0 %v8689_v4  ;;  %v2134_v4 = vrot.slane %v2133_v63, 2 }
 0x554   :  { %6865 = vmatprep.subr.bf16.mxu0 %v8692_v5 }
 0x555   :  { %v2135_v5 = vadd.f32 %v2134_v4, %v2133_v63  ;;  %v2440_v63 = vld [vmem:[%s10781_s8] sm:$0xf]  ;;  %v6240_v4 = vld [vmem:[%s10781_s8 + $0x8] sm:$0xf] }
 0x557   :  { %6867 = vmatpush1.bf16.msra.mxu0 %v8707_v10  ;;  %v2136_v10 = vrot.slane %v2135_v5, 1 }
 0x558   :  { %6869 = vmatprep.subr.bf16.mxu0 %v8710_v11 }
 0x559   :  { %v2137_v11 = vadd.f32 %v2136_v10, %v2135_v5  ;;  %v7516_v5 = vld [vmem:[%s10778_s9 + $0x104] ss:$8 sps:$4 sm:$0xff]  }
 0x55a   :  { %v6142_v10 = vld [vmem:[%s10781_s8 + $0x4] sm:$0xf] }
 0x55b   :  { %6871 = vmatpush1.bf16.msra.mxu0 %v8725_v43  ;;  %v2370_v43 = vlaneseq }
 0x55c   :  { %6873 = vmatprep.subr.bf16.mxu0 %v8728_v41 }
 0x55d   :  { %v2371_v41 = vshrl.u32 %v2370_v43, 7  ;;  %v6306_v43 = vld [vmem:[%s10781_s8 + $0xc] sm:$0xf] }
 0x55f   :  { %6875 = vmatpush1.bf16.msra.mxu0 %v8743_v18  ;;  %v9092_v18 = vsub.s32 0, %v2371_v41 }
 0x560   :  { %6877 = vmatprep.subr.bf16.mxu0 %v8746_v19 }
 0x561   :  { %v2415_v3 = vrot.slane %v2410_v58, %v9092_v18 }
 0x563   :  { %6879 = vmatpush1.bf16.msra.mxu0 %v8761_v24 }
 0x564   :  { %6881 = vmatprep.subr.bf16.mxu0 %v8764_v25 }
 0x567   :  { %6883 = vmatpush1.bf16.msra.mxu0 %v8779_v30 }
 0x568   :  { %6885 = vmatprep.subr.bf16.mxu0 %v8782_v31 }
 0x56b   :  { %6887 = vmatpush1.bf16.msra.mxu0 %v8797_v37 }
 0x56c   :  { %6889 = vmatprep.subr.bf16.mxu0 %v8800_v38 }
 0x56f   :  { %6891 = vmatpush1.bf16.msra.mxu0 %v8815_v45 }
 0x570   :  { %6893 = vmatprep.subr.bf16.mxu0 %v8818_v46 }
 0x573   :  { %6895 = vmatpush1.bf16.msra.mxu0 %v8833_v60 }
 0x574   :  { %6897 = vmatprep.subr.bf16.mxu0 %v8836_v61 }
 0x577   :  { %6899 = vmatpush1.bf16.msra.mxu0 %v8851_v6 }
 0x578   :  { %6901 = vmatprep.subr.bf16.mxu0 %v8854_v7 }
 0x57b   :  { %6903 = vmatpush1.bf16.msra.mxu0 %v8863_v12 }
 0x57c   :  { %6905 = vmatprep.subr.bf16.mxu0 %v8973_v57 }
 0x57f   :  { %6907 = vmatpush1.bf16.msra.mxu0 %v8981_v49 }
 0x580   :  { %6909 = vmatprep.subr.bf16.mxu0 %v8991_v17 }
 0x583   :  { %6911 = vmatpush1.bf16.msra.mxu0 %v8999_v22 }
 0x584   :  { %6913 = vmatprep.subr.bf16.mxu0 %v9009_v48 }
 0x587   :  { %6915 = vmatpush1.bf16.msra.mxu0 %v9017_v27 }
 0x588   :  { %6917 = vmatprep.subr.bf16.mxu0 %v9030_v34  ;;  %v2368_v34 = vunpack.c.l.s4 %v7947_v32  ;;  %v7547_v32 = vld [vmem:[%s10778_s9 + $0x1b0] ss:$8 sps:$4 sm:$0xff]  }
 0x58a   :  { %v2369_v35 = vunpack.c.0.s8 %v2368_v34  ;;  %v7552_v34 = vld [vmem:[%s10778_s9 + $0x1c4] ss:$8 sps:$4 sm:$0xff]  }
 0x58b   :  { %6919 = vmatpush1.bf16.msra.mxu0 %v9035_v36 }
 0x58e   :  { %2347 = vmatmul.mubr.f32.vlgmr.msra.gmra.mrb[18].mxu0 %v2137_v11  ;;  %v7514_v11 = vld [vmem:[%s10778_s9 + $0x100] ss:$8 sps:$4 sm:$0xff]  }
 0x58f   :  { %2477 = vmatprep.mubr.bf16.mxu0 %v7946_v33 }
 0x621   :  { %v2275_v19 = vpop.f32.mrb[16].mxu0 }
 0x622   :  { %v2280_v24 = vmul.f32 0.0078125, %v2275_v19  ;;  %v2277_v25 = vpop.f32.mrb[17].mxu0  ;;  %v7517_v19 = vld [vmem:[%s10778_s9 + $0x110] ss:$8 sps:$4 sm:$0xff]  }
 0x623   :  { %v2281_v30 = vmul.f32 0.0078125, %v2277_v25  ;;  %v7520_v25 = vld [vmem:[%s10778_s9 + $0x120] ss:$8 sps:$4 sm:$0xff]  }
 0x624   :  { %v2386_v31 = vrot.slane %v2280_v24, %v9092_v18  ;;  %v2355_v6 = vmul.f32 %v2280_v24, %v2280_v24  ;;  %v7522_v24 = vld [vmem:[%s10778_s9 + $0x124] ss:$8 sps:$4 sm:$0xff]  }
 0x625   :  { %v2390_v37 = vrot.slane %v2281_v30, %v9092_v18  ;;  %v2356_v57 = vmul.f32 %v2281_v30, %v2281_v30  ;;  %v7525_v30 = vld [vmem:[%s10778_s9 + $0x134] ss:$8 sps:$4 sm:$0xff]  }
 0x626   :  { %v2391_v38 = vsub.f32 %v9040_v39, %v2386_v31  ;;  %v2393_v45 = vsub.f32 %v9044_v42, %v2386_v31  ;;  %v9100_v39 = vsub.s32 %v2369_v35, %v2371_v41  ;;  %v7523_v31 = vld [vmem:[%s10778_s9 + $0x130] ss:$8 sps:$4 sm:$0xff]   ;;  %v7550_v35 = vld [vmem:[%s10778_s9 + $0x1c0] ss:$8 sps:$4 sm:$0xff]  }
 0x627   :  { %v2392_v46 = vsub.f32 %v9042_v40, %v2390_v37  ;;  %v2394_v60 = vsub.f32 %v9052_v56, %v2390_v37  ;;  %v9107_v56 = vsub.s32 1, %v2371_v41  ;;  %v7519_v41 = vld [vmem:[%s10778_s9 + $0x114] ss:$8 sps:$4 sm:$0xff]   ;;  %v7528_v37 = vld [vmem:[%s10778_s9 + $0x144] ss:$8 sps:$4 sm:$0xff]  }
 0x629   :  { %v2419_v1 = vrot.slane %v2410_v58, %v9107_v56  ;;  %v7564_v58 = vld [vmem:[%s10778_s9 + $0x4] ss:$8 sps:$4 sm:$0xff]  }
 0x661   :  { %v2348_v61 = vpop.f32.mrb[18].mxu0 }
 0x662   :  { %v2353_v7 = vmul.f32 0.0078125, %v2348_v61  ;;  %v2350_v12 = vpop.f32.mrb[19].mxu0  ;;  %v7532_v61 = vld [vmem:[%s10778_s9 + $0x160] ss:$8 sps:$4 sm:$0xff]  }
 0x663   :  { %v2354_v49 = vmul.f32 0.0078125, %v2350_v12  ;;  %v7540_v12 = vld [vmem:[%s10778_s9 + $0x184] ss:$8 sps:$4 sm:$0xff]  }
 0x664   :  { %v2357_v17 = vsub.f32 %v2353_v7, %v2355_v6  ;;  %v7537_v6 = vld [vmem:[%s10778_s9 + $0x174] ss:$8 sps:$4 sm:$0xff]   ;;  %v7535_v7 = vld [vmem:[%s10778_s9 + $0x170] ss:$8 sps:$4 sm:$0xff]  }
 0x665   :  { %v2358_v22 = vsub.f32 %v2354_v49, %v2356_v57  ;;  %v7538_v57 = vld [vmem:[%s10778_s9 + $0x180] ss:$8 sps:$4 sm:$0xff]   ;;  %v7543_v49 = vld [vmem:[%s10778_s9 + $0x194] ss:$8 sps:$4 sm:$0xff]  }
 0x666   :  { %v2360_v48 = vadd.f32 1e-05, %v2357_v17  ;;  %v7541_v17 = vld [vmem:[%s10778_s9 + $0x190] ss:$8 sps:$4 sm:$0xff]  }
 0x667   :  { %v2361_v27 = vadd.f32 1e-05, %v2358_v22  ;;  %v7546_v22 = vld [vmem:[%s10778_s9 + $0x1a4] ss:$8 sps:$4 sm:$0xff]  }
 0x668   :  { %7930 = vrsqrt.f32 %v2360_v48  ;;  %v7544_v48 = vld [vmem:[%s10778_s9 + $0x1a0] ss:$8 sps:$4 sm:$0xff]  }
 0x669   :  { %7932 = vrsqrt.f32 %v2361_v27  ;;  %v7549_v27 = vld [vmem:[%s10778_s9 + $0x1b4] ss:$8 sps:$4 sm:$0xff]  }
 0x672   :  { %v7931_v36 = vpop.eup %7930 }
 0x673   :  { %v7933_v40 = vpop.eup %7932 }
 0x674   :  { %v2366_v42 = vcombine.low %v7931_v36, %v7933_v40  ;;  %v7555_v36 = vld [vmem:[%s10778_s9 + $0x1d4] ss:$8 sps:$4 sm:$0xff]   ;;  %v7553_v40 = vld [vmem:[%s10778_s9 + $0x1d0] ss:$8 sps:$4 sm:$0xff]  }
 0x676   :  { %v2373_v44 = vrot.slane %v2366_v42, %v9100_v39  ;;  %v7556_v42 = vld [vmem:[%s10778_s9 + $0x1e0] ss:$8 sps:$4 sm:$0xff]  }
 0x678   :  { %v2380_v54 = vrot.slane %v2373_v44, %v9100_v39  ;;  %v7558_v44 = vld [vmem:[%s10778_s9 + $0x1e4] ss:$8 sps:$4 sm:$0xff]  }
 0x67a   :  { %v2382_v59 = vmul.f32 %v2380_v54, %v2359_v53  ;;  %v7561_v53 = vld [vmem:[%s10778_s9 + $0x1f4] ss:$8 sps:$4 sm:$0xff]   ;;  %v7559_v54 = vld [vmem:[%s10778_s9 + $0x1f0] ss:$8 sps:$4 sm:$0xff]  }
 0x67c   :  { %v2403_v0 = vrot.slane %v2382_v59, %v9107_v56  ;;  %v2399_v2 = vrot.slane %v2382_v59, %v9092_v18 }
 0x67e   :  { %v2407_v8 = vmul.f32 %v2403_v0, %v2392_v46  ;;  %v2409_v9 = vmul.f32 %v2403_v0, %v2394_v60  ;;  %v2406_v13 = vmul.f32 %v2399_v2, %v2391_v38  ;;  %v2408_v14 = vmul.f32 %v2399_v2, %v2393_v45  ;;  %v7526_v38 = vld [vmem:[%s10778_s9 + $0x140] ss:$8 sps:$4 sm:$0xff]   ;;  %v7531_v45 = vld [vmem:[%s10778_s9 + $0x154] ss:$8 sps:$4 sm:$0xff]   ;;  %v7529_v46 = vld [vmem:[%s10778_s9 + $0x150] ss:$8 sps:$4 sm:$0xff]  }
 0x67f   :  { %v7534_v60 = vld [vmem:[%s10778_s9 + $0x164] ss:$8 sps:$4 sm:$0xff]  }
 0x680   :  { %v2423_v15 = vadd.f32 %v2419_v1, %v2407_v8  ;;  %v2425_v55 = vadd.f32 %v2419_v1, %v2409_v9  ;;  %v2422_v47 = vadd.f32 %v2415_v3, %v2406_v13  ;;  %v2424_v50 = vadd.f32 %v2415_v3, %v2408_v14 }
 0x682   :  { %vm2427_vm11 = vcmp.gt.f32.partialorder %v2423_v15, 0.0  ;;  %vm2429_vm12 = vcmp.gt.f32.partialorder %v2425_v55, 0.0  ;;  %v2431_v16 = vmul.f32 0.2, %v2423_v15  ;;  %v2433_v20 = vmul.f32 0.2, %v2425_v55 }
 0x683   :  { %vm2426_vm13 = vcmp.gt.f32.partialorder %v2422_v47, 0.0  ;;  %vm2428_vm14 = vcmp.gt.f32.partialorder %v2424_v50, 0.0  ;;  %v2430_v21 = vmul.f32 0.2, %v2422_v47  ;;  %v2432_v23 = vmul.f32 0.2, %v2424_v50 }
 0x684   :  { %v2435_v26 = vsel %vm2427_vm11, %v2423_v15, %v2431_v16  ;;  %v2437_v51 = vsel %vm2429_vm12, %v2425_v55, %v2433_v20 }
 0x685   :  { %v2439_v52 = vpack.c.bf16 %v2437_v51, %v2435_v26  ;;  %v2434_v28 = vsel %vm2426_vm13, %v2422_v47, %v2430_v21  ;;  %v2436_v29 = vsel %vm2428_vm14, %v2424_v50, %v2432_v23  ;;  %v7562_v50 = vld [vmem:[%s10778_s9] ss:$8 sps:$4 sm:$0xff]   ;;  %v7567_v21 = vld [vmem:[%s10778_s9 + $0x14] ss:$8 sps:$4 sm:$0xff]   ;;  %v7565_v26 = vld [vmem:[%s10778_s9 + $0x10] ss:$8 sps:$4 sm:$0xff]  }
 0x686   :  { %v2438_v62 = vpack.c.bf16 %v2436_v29, %v2434_v28  ;;  %v7570_v51 = vld [vmem:[%s10778_s9 + $0x24] ss:$8 sps:$4 sm:$0xff]   ;;  %v7573_v28 = vld [vmem:[%s10778_s9 + $0x34] ss:$8 sps:$4 sm:$0xff]   ;;  %v7571_v29 = vld [vmem:[%s10778_s9 + $0x30] ss:$8 sps:$4 sm:$0xff]  }
 0x687   :  { %2445 = vmatprep.subr.bf16.mxu0 %v2439_v52  ;;  %3008 = vmatprep.subr.bf16.mxu1 %v2439_v52 }
 0x688   :  { %2446 = vmatpush1.bf16.msra.mxu0 %v2438_v62  ;;  %3009 = vmatpush1.bf16.msra.mxu1 %v2438_v62 }
 0x689   :  { %2525 = vmatprep.subr.bf16.mxu0 %v2439_v52  ;;  %3292 = vmatprep.subr.bf16.mxu1 %v2439_v52  ;;  %v7568_v52 = vld [vmem:[%s10778_s9 + $0x20] ss:$8 sps:$4 sm:$0xff]  }
 0x68b   :  { %6141 = vmatmul.mubr.msk.bf16.vlgmr.msra.gmra.mrb[20].mxu0 %vm2441_vm15, %v2440_v63  ;;  %6241 = vmatmul.mubr.msk.bf16.vlgmr.msra.gmra.mrb[28].mxu1 %vm2441_vm15, %v6240_v4  ;;  %v7574_v63 = vld [vmem:[%s10778_s9 + $0x40] ss:$8 sps:$4 sm:$0xff]   ;;  %v7579_v4 = vld [vmem:[%s10778_s9 + $0x54] ss:$8 sps:$4 sm:$0xff]  }
 0x68c   :  { %2526 = vmatpush1.bf16.msra.mxu0 %v2438_v62  ;;  %3293 = vmatpush1.bf16.msra.mxu1 %v2438_v62  ;;  %v7576_v62 = vld [vmem:[%s10778_s9 + $0x44] ss:$8 sps:$4 sm:$0xff]  }
 0x68d   :  { %2557 = vmatprep.mubr.bf16.mxu0 %v7946_v33  ;;  %2761 = vmatprep.subr.bf16.mxu0 %v7516_v5  ;;  %v7577_v5 = vld [vmem:[%s10778_s9 + $0x50] ss:$8 sps:$4 sm:$0xff]  }
 0x68e   :  { %3324 = vmatprep.mubr.bf16.mxu1 %v7946_v33 }
 0x693   :  { %6143 = vmatmul.mubr.msk.bf16.vlgmr.msra.gmra.mrb[24].mxu0 %vm2441_vm15, %v6142_v10  ;;  %6307 = vmatmul.mubr.msk.bf16.vlgmr.msra.gmra.mrb[32].mxu1 %vm2441_vm15, %v6306_v43  ;;  %v7582_v10 = vld [vmem:[%s10778_s9 + $0x64] ss:$8 sps:$4 sm:$0xff]   ;;  %v7585_v43 = vld [vmem:[%s10778_s9 + $0x74] ss:$8 sps:$4 sm:$0xff]  }
 0x694   :  { %2762 = vmatpush1.bf16.msra.mxu0 %v7514_v11  ;;  %v7580_v11 = vld [vmem:[%s10778_s9 + $0x60] ss:$8 sps:$4 sm:$0xff]  }
 0x695   :  { %2763 = vmatprep.subr.bf16.mxu0 %v7519_v41  ;;  %v7583_v41 = vld [vmem:[%s10778_s9 + $0x70] ss:$8 sps:$4 sm:$0xff]  }
 0x698   :  { %2764 = vmatpush1.bf16.msra.mxu0 %v7517_v19  ;;  %v7588_v19 = vld [vmem:[%s10778_s9 + $0x84] ss:$8 sps:$4 sm:$0xff]  }
 0x699   :  { %2765 = vmatprep.subr.bf16.mxu0 %v7522_v24  ;;  %v7586_v24 = vld [vmem:[%s10778_s9 + $0x80] ss:$8 sps:$4 sm:$0xff]  }
 0x69c   :  { %2766 = vmatpush1.bf16.msra.mxu0 %v7520_v25  ;;  %v7591_v25 = vld [vmem:[%s10778_s9 + $0x94] ss:$8 sps:$4 sm:$0xff]  }
 0x69d   :  { %2767 = vmatprep.subr.bf16.mxu0 %v7525_v30  ;;  %v7589_v30 = vld [vmem:[%s10778_s9 + $0x90] ss:$8 sps:$4 sm:$0xff]  }
 0x6a0   :  { %2768 = vmatpush1.bf16.msra.mxu0 %v7523_v31  ;;  %v7594_v31 = vld [vmem:[%s10778_s9 + $0xa4] ss:$8 sps:$4 sm:$0xff]  }
 0x6a1   :  { %2769 = vmatprep.subr.bf16.mxu0 %v7528_v37  ;;  %v7592_v37 = vld [vmem:[%s10778_s9 + $0xa0] ss:$8 sps:$4 sm:$0xff]  }
 0x6a4   :  { %2770 = vmatpush1.bf16.msra.mxu0 %v7526_v38  ;;  %v7597_v38 = vld [vmem:[%s10778_s9 + $0xb4] ss:$8 sps:$4 sm:$0xff]  }
 0x6a5   :  { %2771 = vmatprep.subr.bf16.mxu0 %v7531_v45  ;;  %v7595_v45 = vld [vmem:[%s10778_s9 + $0xb0] ss:$8 sps:$4 sm:$0xff]  }
 0x6a8   :  { %2772 = vmatpush1.bf16.msra.mxu0 %v7529_v46  ;;  %v7600_v46 = vld [vmem:[%s10778_s9 + $0xc4] ss:$8 sps:$4 sm:$0xff]  }
 0x6a9   :  { %2773 = vmatprep.subr.bf16.mxu0 %v7534_v60  ;;  %v7598_v60 = vld [vmem:[%s10778_s9 + $0xc0] ss:$8 sps:$4 sm:$0xff]  }
 0x6ac   :  { %2774 = vmatpush1.bf16.msra.mxu0 %v7532_v61  ;;  %v7603_v61 = vld [vmem:[%s10778_s9 + $0xd4] ss:$8 sps:$4 sm:$0xff]  }
 0x6ad   :  { %2775 = vmatprep.subr.bf16.mxu0 %v7537_v6  ;;  %v7601_v6 = vld [vmem:[%s10778_s9 + $0xd0] ss:$8 sps:$4 sm:$0xff]  }
 0x6b0   :  { %2776 = vmatpush1.bf16.msra.mxu0 %v7535_v7  ;;  %v7606_v7 = vld [vmem:[%s10778_s9 + $0xe4] ss:$8 sps:$4 sm:$0xff]  }
 0x6b1   :  { %2777 = vmatprep.subr.bf16.mxu0 %v7540_v12  ;;  %v7604_v12 = vld [vmem:[%s10778_s9 + $0xe0] ss:$8 sps:$4 sm:$0xff]  }
 0x6b4   :  { %2778 = vmatpush1.bf16.msra.mxu0 %v7538_v57 }
 0x6b5   :  { %2779 = vmatprep.subr.bf16.mxu0 %v7543_v49  ;;  %v7609_v49 = vld [vmem:[%s10778_s9 + $0xf4] ss:$8 sps:$4 sm:$0xff]  }
 0x6b8   :  { %2780 = vmatpush1.bf16.msra.mxu0 %v7541_v17 }
 0x6b9   :  { %2781 = vmatprep.subr.bf16.mxu0 %v7546_v22 }
 0x6bc   :  { %2782 = vmatpush1.bf16.msra.mxu0 %v7544_v48 }
 0x6bd   :  { %2783 = vmatprep.subr.bf16.mxu0 %v7549_v27  ;;  %v7607_v27 = vld [vmem:[%s10778_s9 + $0xf0] ss:$8 sps:$4 sm:$0xff]  }
 0x6c0   :  { %2784 = vmatpush1.bf16.msra.mxu0 %v7547_v32  ;;  %v7612_v32 = vld [vmem:[%s10778_s9 + $0x204] ss:$8 sps:$4 sm:$0xff]  }
 0x6c1   :  { %2785 = vmatprep.subr.bf16.mxu0 %v7552_v34  ;;  %v7610_v34 = vld [vmem:[%s10778_s9 + $0x200] ss:$8 sps:$4 sm:$0xff]  }
 0x6c4   :  { %2786 = vmatpush1.bf16.msra.mxu0 %v7550_v35 }
 0x6c5   :  { %2787 = vmatprep.subr.bf16.mxu0 %v7555_v36 }
 0x6c8   :  { %2788 = vmatpush1.bf16.msra.mxu0 %v7553_v40  ;;  %v7615_v40 = vld [vmem:[%s10778_s9 + $0x214] ss:$8 sps:$4 sm:$0xff]  }
 0x6c9   :  { %2789 = vmatprep.subr.bf16.mxu0 %v7558_v44  ;;  %v7618_v44 = vld [vmem:[%s10778_s9 + $0x224] ss:$8 sps:$4 sm:$0xff]  }
 0x6cc   :  { %2790 = vmatpush1.bf16.msra.mxu0 %v7556_v42  ;;  %v7613_v42 = vld [vmem:[%s10778_s9 + $0x210] ss:$8 sps:$4 sm:$0xff]  }
 0x6cd   :  { %2791 = vmatprep.subr.bf16.mxu0 %v7561_v53  ;;  %v3598_v53 = vld [vmem:[%s10782_s10 + $0x8] sm:$0xff] }
 0x6d0   :  { %2792 = vmatpush1.bf16.msra.mxu0 %v7559_v54  ;;  %v3600_v54 = vld [vmem:[%s10782_s10 + $0x18] sm:$0xff] }
 0x6d1   :  { %2962 = vmatprep.subr.bf16.mxu0 %v7564_v58  ;;  %v3597_v58 = vld [vmem:[%s10782_s10] sm:$0xff] }
 0x75e   :  { %v9233_v59 = vpop.f32.mrb[20].mxu0  ;;  %v9235_v3 = vpop.f32.mrb[28].mxu1 }
 0x75f   :  { %v2481_v0 = vpop.f32.mrb[21].mxu0  ;;  %v9237_v8 = vpop.f32.mrb[29].mxu1  ;;  %v2486_v36 = vpack.c.bf16 %v9233_v59, %v9233_v59  ;;  %v9364_v59 = vpack.c.bf16 %v3600_v54, %v3598_v53  ;;  %v3625_v53 = vld [vmem:[%s10782_s10 + $0xe0] sm:$0xff]  ;;  %v3627_v54 = vld [vmem:[%s10782_s10 + $0xf0] sm:$0xff] }
 0x760   :  { %v2483_v1 = vpop.f32.mrb[22].mxu0  ;;  %v3046_v9 = vpop.f32.mrb[30].mxu1  ;;  %v2487_v23 = vpack.c.bf16 %v2481_v0, %v2481_v0  ;;  %v3050_v35 = vpack.c.bf16 %v9237_v8, %v9237_v8  ;;  %v3599_v0 = vld [vmem:[%s10782_s10 + $0x10] sm:$0xff] }
 0x761   :  { %v2484_v2 = vpop.f32.mrb[23].mxu0  ;;  %v3047_v14 = vpop.f32.mrb[31].mxu1  ;;  %v3602_v1 = vld [vmem:[%s10782_s10 + $0x28] sm:$0xff]  ;;  %v9375_v8 = vpack.c.bf16 %v3599_v0, %v3597_v58  ;;  %6921 = vmatprep.subr.bf16.mxu1 %v9364_v59  ;;  %v3632_v0 = vld [vmem:[%s10782_s10 + $0x118] sm:$0xff] }
 0x762   :  { %v3604_v2 = vld [vmem:[%s10782_s10 + $0x38] sm:$0xff]  ;;  %v3603_v14 = vld [vmem:[%s10782_s10 + $0x30] sm:$0xff]  ;;  %v3630_v58 = vld [vmem:[%s10782_s10 + $0x108] sm:$0xff] }
 0x763   :  { %v9377_v9 = vpack.c.bf16 %v3604_v2, %v3602_v1  ;;  %6923 = vmatpush1.bf16.msra.mxu1 %v9375_v8  ;;  %v7634_v1 = vld [vmem:[%s10778_s9 + $0x280] ss:$8 sps:$4 sm:$0xff]   ;;  %v9540_v2 = vpack.c.bf16 %v3627_v54, %v3625_v53  ;;  %v7649_v53 = vld [vmem:[%s10778_s9 + $0x2d0] ss:$8 sps:$4 sm:$0xff]  }
 0x765   :  { %6925 = vmatprep.subr.bf16.mxu1 %v9377_v9 }
 0x766   :  { %v2559_v13 = vpop.f32.mrb[24].mxu0  ;;  %v9326_v57 = vpop.f32.mrb[32].mxu1 }
 0x767   :  { %v2561_v15 = vpop.f32.mrb[25].mxu0  ;;  %v2566_v16 = vpack.c.bf16 %v2559_v13, %v2559_v13  ;;  %v9331_v17 = vpop.f32.mrb[33].mxu1  ;;  %v3601_v13 = vld [vmem:[%s10782_s10 + $0x20] sm:$0xff] }
 0x768   :  { %v2567_v55 = vpack.c.bf16 %v2561_v15, %v2561_v15  ;;  %v2563_v47 = vpop.f32.mrb[26].mxu0  ;;  %v3330_v22 = vpop.f32.mrb[34].mxu1  ;;  %v3606_v15 = vld [vmem:[%s10782_s10 + $0x48] sm:$0xff] }
 0x769   :  { %v2564_v20 = vpop.f32.mrb[27].mxu0  ;;  %v3331_v48 = vpop.f32.mrb[35].mxu1  ;;  %v7616_v47 = vld [vmem:[%s10778_s9 + $0x220] ss:$8 sps:$4 sm:$0xff]   ;;  %v7633_v22 = vld [vmem:[%s10778_s9 + $0x274] ss:$8 sps:$4 sm:$0xff]  }
 0x76a   :  { %2793 = vmatprep.mubr.bf16.mxu0 %v2567_v55  ;;  %v3608_v55 = vld [vmem:[%s10782_s10 + $0x58] sm:$0xff] }
 0x76b   :  { %2794 = vmatmul.mubr.bf16.vlgmr.msra.gmra.mrb[28].mxu0 %v2566_v16  ;;  %v7621_v16 = vld [vmem:[%s10778_s9 + $0x234] ss:$8 sps:$4 sm:$0xff]   ;;  %v9402_v20 = vpack.c.bf16 %v3608_v55, %v3606_v15  ;;  %v3629_v15 = vld [vmem:[%s10782_s10 + $0x100] sm:$0xff] }
 0x76c   :  { %2963 = vmatpush1.bf16.msra.mxu0 %v7562_v50  ;;  %2994 = vmatprep.mubr.bf16.mxu0 %v2487_v23  ;;  %v9396_v50 = vpack.c.bf16 %v3603_v14, %v3601_v13  ;;  %v3607_v23 = vld [vmem:[%s10782_s10 + $0x50] sm:$0xff]  ;;  %v9546_v14 = vpack.c.bf16 %v3632_v0, %v3630_v58  ;;  %v7654_v58 = vld [vmem:[%s10778_s9 + $0x2e4] ss:$8 sps:$4 sm:$0xff]   ;;  %v7652_v0 = vld [vmem:[%s10778_s9 + $0x2e0] ss:$8 sps:$4 sm:$0xff]  }
 0x76d   :  { %2964 = vmatprep.subr.bf16.mxu0 %v7567_v21  ;;  %v3605_v21 = vld [vmem:[%s10782_s10 + $0x40] sm:$0xff]  ;;  %v7639_v13 = vld [vmem:[%s10778_s9 + $0x294] ss:$8 sps:$4 sm:$0xff]  }
 0x76e   :  { %6927 = vmatpush1.bf16.msra.mxu1 %v9396_v50  ;;  %v3631_v55 = vld [vmem:[%s10782_s10 + $0x110] sm:$0xff] }
 0x76f   :  { %6929 = vmatprep.subr.bf16.mxu1 %v9402_v20 }
 0x770   :  { %2965 = vmatpush1.bf16.msra.mxu0 %v7565_v26  ;;  %v3610_v26 = vld [vmem:[%s10782_s10 + $0x68] sm:$0xff] }
 0x771   :  { %2966 = vmatprep.subr.bf16.mxu0 %v7570_v51  ;;  %v3612_v51 = vld [vmem:[%s10782_s10 + $0x78] sm:$0xff] }
 0x774   :  { %2967 = vmatpush1.bf16.msra.mxu0 %v7568_v52  ;;  %v7619_v52 = vld [vmem:[%s10778_s9 + $0x230] ss:$8 sps:$4 sm:$0xff]  }
 0x775   :  { %2968 = vmatprep.subr.bf16.mxu0 %v7573_v28  ;;  %v9420_v28 = vpack.c.bf16 %v3607_v23, %v3605_v21  ;;  %v7637_v21 = vld [vmem:[%s10778_s9 + $0x290] ss:$8 sps:$4 sm:$0xff]   ;;  %v9564_v23 = vpack.c.bf16 %v3631_v55, %v3629_v15  ;;  %v7660_v15 = vld [vmem:[%s10778_s9 + $0x304] ss:$8 sps:$4 sm:$0xff]   ;;  %v3049_v55 = vpack.c.bf16 %v9235_v3, %v9235_v3 }
 0x776   :  { %v7666_v3 = vld [vmem:[%s10778_s9 + $0x324] ss:$8 sps:$4 sm:$0xff]  }
 0x777   :  { %6931 = vmatpush1.bf16.msra.mxu1 %v9420_v28 }
 0x778   :  { %2969 = vmatpush1.bf16.msra.mxu0 %v7571_v29  ;;  %v7624_v29 = vld [vmem:[%s10778_s9 + $0x244] ss:$8 sps:$4 sm:$0xff]  }
 0x779   :  { %2970 = vmatprep.subr.bf16.mxu0 %v7576_v62  ;;  %v9426_v62 = vpack.c.bf16 %v3612_v51, %v3610_v26  ;;  %v7642_v26 = vld [vmem:[%s10778_s9 + $0x2a4] ss:$8 sps:$4 sm:$0xff]  }
 0x77b   :  { %6933 = vmatprep.subr.bf16.mxu1 %v9426_v62 }
 0x77c   :  { %2971 = vmatpush1.bf16.msra.mxu0 %v7574_v63  ;;  %v3609_v63 = vld [vmem:[%s10782_s10 + $0x60] sm:$0xff] }
 0x77d   :  { %2972 = vmatprep.subr.bf16.mxu0 %v7579_v4  ;;  %v3611_v4 = vld [vmem:[%s10782_s10 + $0x70] sm:$0xff] }
 0x780   :  { %2973 = vmatpush1.bf16.msra.mxu0 %v7577_v5  ;;  %v3614_v5 = vld [vmem:[%s10782_s10 + $0x88] sm:$0xff] }
 0x781   :  { %2974 = vmatprep.subr.bf16.mxu0 %v7582_v10  ;;  %v3616_v10 = vld [vmem:[%s10782_s10 + $0x98] sm:$0xff] }
 0x784   :  { %2975 = vmatpush1.bf16.msra.mxu0 %v7580_v11  ;;  %v7622_v11 = vld [vmem:[%s10778_s9 + $0x240] ss:$8 sps:$4 sm:$0xff]  }
 0x785   :  { %2976 = vmatprep.subr.bf16.mxu0 %v7585_v43  ;;  %v9444_v43 = vpack.c.bf16 %v3611_v4, %v3609_v63  ;;  %v3638_v63 = vld [vmem:[%s10782_s10 + $0x148] sm:$0xff]  ;;  %v3640_v4 = vld [vmem:[%s10782_s10 + $0x158] sm:$0xff] }
 0x787   :  { %6935 = vmatpush1.bf16.msra.mxu1 %v9444_v43 }
 0x788   :  { %2977 = vmatpush1.bf16.msra.mxu0 %v7583_v41  ;;  %v7627_v41 = vld [vmem:[%s10778_s9 + $0x254] ss:$8 sps:$4 sm:$0xff]  }
 0x789   :  { %2978 = vmatprep.subr.bf16.mxu0 %v7588_v19  ;;  %v9450_v19 = vpack.c.bf16 %v3616_v10, %v3614_v5  ;;  %v7640_v5 = vld [vmem:[%s10778_s9 + $0x2a0] ss:$8 sps:$4 sm:$0xff]  }
 0x78b   :  { %6937 = vmatprep.subr.bf16.mxu1 %v9450_v19 }
 0x78c   :  { %2979 = vmatpush1.bf16.msra.mxu0 %v7586_v24  ;;  %v3613_v24 = vld [vmem:[%s10782_s10 + $0x80] sm:$0xff] }
 0x78d   :  { %2980 = vmatprep.subr.bf16.mxu0 %v7591_v25  ;;  %v3615_v25 = vld [vmem:[%s10782_s10 + $0x90] sm:$0xff] }
 0x790   :  { %2981 = vmatpush1.bf16.msra.mxu0 %v7589_v30  ;;  %v3618_v30 = vld [vmem:[%s10782_s10 + $0xa8] sm:$0xff] }
 0x791   :  { %2982 = vmatprep.subr.bf16.mxu0 %v7594_v31  ;;  %v3620_v31 = vld [vmem:[%s10782_s10 + $0xb8] sm:$0xff] }
 0x794   :  { %2983 = vmatpush1.bf16.msra.mxu0 %v7592_v37  ;;  %v7625_v37 = vld [vmem:[%s10778_s9 + $0x250] ss:$8 sps:$4 sm:$0xff]  }
 0x795   :  { %2984 = vmatprep.subr.bf16.mxu0 %v7597_v38  ;;  %v9468_v38 = vpack.c.bf16 %v3615_v25, %v3613_v24  ;;  %v3637_v24 = vld [vmem:[%s10782_s10 + $0x140] sm:$0xff]  ;;  %v3639_v25 = vld [vmem:[%s10782_s10 + $0x150] sm:$0xff] }
 0x797   :  { %6939 = vmatpush1.bf16.msra.mxu1 %v9468_v38 }
 0x798   :  { %2985 = vmatpush1.bf16.msra.mxu0 %v7595_v45  ;;  %v7630_v45 = vld [vmem:[%s10778_s9 + $0x264] ss:$8 sps:$4 sm:$0xff]  }
 0x799   :  { %2986 = vmatprep.subr.bf16.mxu0 %v7600_v46  ;;  %v9474_v46 = vpack.c.bf16 %v3620_v31, %v3618_v30  ;;  %v3642_v30 = vld [vmem:[%s10782_s10 + $0x168] sm:$0xff]  ;;  %v3644_v31 = vld [vmem:[%s10782_s10 + $0x178] sm:$0xff] }
 0x79b   :  { %6941 = vmatprep.subr.bf16.mxu1 %v9474_v46 }
 0x79c   :  { %2987 = vmatpush1.bf16.msra.mxu0 %v7598_v60  ;;  %v3617_v60 = vld [vmem:[%s10782_s10 + $0xa0] sm:$0xff] }
 0x79d   :  { %2988 = vmatprep.subr.bf16.mxu0 %v7603_v61  ;;  %v3619_v61 = vld [vmem:[%s10782_s10 + $0xb0] sm:$0xff] }
 0x7a0   :  { %2989 = vmatpush1.bf16.msra.mxu0 %v7601_v6  ;;  %v3622_v6 = vld [vmem:[%s10782_s10 + $0xc8] sm:$0xff] }
 0x7a1   :  { %2990 = vmatprep.subr.bf16.mxu0 %v7606_v7  ;;  %v3624_v7 = vld [vmem:[%s10782_s10 + $0xd8] sm:$0xff] }
 0x7a2   :  { %v9498_v48 = vpack.c.bf16 %v3624_v7, %v3622_v6  ;;  %v3641_v6 = vld [vmem:[%s10782_s10 + $0x160] sm:$0xff]  ;;  %v3643_v7 = vld [vmem:[%s10782_s10 + $0x170] sm:$0xff] }
 0x7a4   :  { %2991 = vmatpush1.bf16.msra.mxu0 %v7604_v12  ;;  %v7628_v12 = vld [vmem:[%s10778_s9 + $0x260] ss:$8 sps:$4 sm:$0xff]  }
 0x7a5   :  { %2992 = vmatprep.subr.bf16.mxu0 %v7609_v49  ;;  %v9492_v49 = vpack.c.bf16 %v3619_v61, %v3617_v60  ;;  %v7648_v60 = vld [vmem:[%s10778_s9 + $0x2c4] ss:$8 sps:$4 sm:$0xff]   ;;  %v9618_v61 = vpack.c.bf16 %v3644_v31, %v3642_v30  ;;  %v7681_v30 = vld [vmem:[%s10778_s9 + $0x374] ss:$8 sps:$4 sm:$0xff]   ;;  %v7679_v31 = vld [vmem:[%s10778_s9 + $0x370] ss:$8 sps:$4 sm:$0xff]  }
 0x7a7   :  { %6943 = vmatpush1.bf16.msra.mxu1 %v9492_v49 }
 0x7a8   :  { %2993 = vmatpush1.bf16.msra.mxu0 %v7607_v27  ;;  %v3621_v27 = vld [vmem:[%s10782_s10 + $0xc0] sm:$0xff]  ;;  %6945 = vmatprep.subr.bf16.mxu1 %v9498_v48 }
 0x7a9   :  { %3244 = vmatprep.subr.bf16.mxu0 %v7612_v32  ;;  %v3623_v32 = vld [vmem:[%s10782_s10 + $0xd0] sm:$0xff] }
 0x7ab   :  { %2995 = vmatmul.mubr.bf16.vlgmr.msra.gmra.mrb[28].mxu0 %v2486_v36  ;;  %v7631_v36 = vld [vmem:[%s10778_s9 + $0x270] ss:$8 sps:$4 sm:$0xff]  }
 0x7ac   :  { %3245 = vmatpush1.bf16.msra.mxu0 %v7610_v34  ;;  %3276 = vmatprep.mubr.bf16.mxu0 %v3050_v35  ;;  %v3626_v34 = vld [vmem:[%s10782_s10 + $0xe8] sm:$0xff]  ;;  %v3628_v35 = vld [vmem:[%s10782_s10 + $0xf8] sm:$0xff] }
 0x7ad   :  { %3246 = vmatprep.subr.bf16.mxu0 %v7615_v40  ;;  %v9516_v40 = vpack.c.bf16 %v3623_v32, %v3621_v27  ;;  %v7646_v27 = vld [vmem:[%s10778_s9 + $0x2c0] ss:$8 sps:$4 sm:$0xff]   ;;  %v9636_v32 = vpack.c.bf16 %v3643_v7, %v3641_v6  ;;  %v7687_v6 = vld [vmem:[%s10778_s9 + $0x394] ss:$8 sps:$4 sm:$0xff]   ;;  %v7685_v7 = vld [vmem:[%s10778_s9 + $0x390] ss:$8 sps:$4 sm:$0xff]  }
 0x7af   :  { %6947 = vmatpush1.bf16.msra.mxu1 %v9516_v40 }
 0x7b0   :  { %3247 = vmatpush1.bf16.msra.mxu0 %v7613_v42  ;;  %v7636_v42 = vld [vmem:[%s10778_s9 + $0x284] ss:$8 sps:$4 sm:$0xff]  }
 0x7b1   :  { %3248 = vmatprep.subr.bf16.mxu0 %v7618_v44  ;;  %v9522_v44 = vpack.c.bf16 %v3628_v35, %v3626_v34  ;;  %v7651_v34 = vld [vmem:[%s10778_s9 + $0x2d4] ss:$8 sps:$4 sm:$0xff]  }
 0x7b3   :  { %6949 = vmatprep.subr.bf16.mxu1 %v9522_v44 }
 0x7b4   :  { %3249 = vmatpush1.bf16.msra.mxu0 %v7616_v47  ;;  %v3634_v47 = vld [vmem:[%s10782_s10 + $0x128] sm:$0xff]  ;;  %6951 = vmatpush1.bf16.msra.mxu1 %v9540_v2 }
 0x7b5   :  { %3250 = vmatprep.subr.bf16.mxu0 %v7621_v16  ;;  %v3636_v16 = vld [vmem:[%s10782_s10 + $0x138] sm:$0xff]  ;;  %6953 = vmatprep.subr.bf16.mxu1 %v9546_v14 }
 0x7b6   :  { %v9570_v51 = vpack.c.bf16 %v3636_v16, %v3634_v47  ;;  %v7658_v47 = vld [vmem:[%s10778_s9 + $0x300] ss:$8 sps:$4 sm:$0xff]   ;;  %v3334_v16 = vpack.c.bf16 %v9331_v17, %v9331_v17 }
 0x7b7   :  { %v7664_v17 = vld [vmem:[%s10778_s9 + $0x320] ss:$8 sps:$4 sm:$0xff]  }
 0x7b8   :  { %3251 = vmatpush1.bf16.msra.mxu0 %v7619_v52  ;;  %v3633_v52 = vld [vmem:[%s10782_s10 + $0x120] sm:$0xff]  ;;  %6955 = vmatpush1.bf16.msra.mxu1 %v9564_v23 }
 0x7b9   :  { %3252 = vmatprep.subr.bf16.mxu0 %v7624_v29  ;;  %v3635_v29 = vld [vmem:[%s10782_s10 + $0x130] sm:$0xff]  ;;  %6957 = vmatprep.subr.bf16.mxu1 %v9570_v51 }
 0x7ba   :  { %v9588_v10 = vpack.c.bf16 %v3635_v29, %v3633_v52  ;;  %v7669_v52 = vld [vmem:[%s10778_s9 + $0x334] ss:$8 sps:$4 sm:$0xff]   ;;  %v7667_v29 = vld [vmem:[%s10778_s9 + $0x330] ss:$8 sps:$4 sm:$0xff]  }
 0x7bc   :  { %3253 = vmatpush1.bf16.msra.mxu0 %v7622_v11  ;;  %v7645_v11 = vld [vmem:[%s10778_s9 + $0x2b4] ss:$8 sps:$4 sm:$0xff]   ;;  %6959 = vmatpush1.bf16.msra.mxu1 %v9588_v10 }
 0x7bd   :  { %3254 = vmatprep.subr.bf16.mxu0 %v7627_v41  ;;  %v9594_v41 = vpack.c.bf16 %v3640_v4, %v3638_v63  ;;  %v7672_v63 = vld [vmem:[%s10778_s9 + $0x344] ss:$8 sps:$4 sm:$0xff]   ;;  %v7670_v4 = vld [vmem:[%s10778_s9 + $0x340] ss:$8 sps:$4 sm:$0xff]  }
 0x7bf   :  { %6961 = vmatprep.subr.bf16.mxu1 %v9594_v41 }
 0x7c0   :  { %3255 = vmatpush1.bf16.msra.mxu0 %v7625_v37  ;;  %v7643_v37 = vld [vmem:[%s10778_s9 + $0x2b0] ss:$8 sps:$4 sm:$0xff]  }
 0x7c1   :  { %3256 = vmatprep.subr.bf16.mxu0 %v7630_v45  ;;  %v9612_v45 = vpack.c.bf16 %v3639_v25, %v3637_v24  ;;  %v7678_v24 = vld [vmem:[%s10778_s9 + $0x364] ss:$8 sps:$4 sm:$0xff]   ;;  %v7676_v25 = vld [vmem:[%s10778_s9 + $0x360] ss:$8 sps:$4 sm:$0xff]  }
 0x7c3   :  { %6963 = vmatpush1.bf16.msra.mxu1 %v9612_v45 }
 0x7c4   :  { %3257 = vmatpush1.bf16.msra.mxu0 %v7628_v12  ;;  %v3646_v12 = vld [vmem:[%s10782_s10 + $0x188] sm:$0xff]  ;;  %6965 = vmatprep.subr.bf16.mxu1 %v9618_v61 }
 0x7c5   :  { %3258 = vmatprep.subr.bf16.mxu0 %v7633_v22  ;;  %v3648_v22 = vld [vmem:[%s10782_s10 + $0x198] sm:$0xff] }
 0x7c6   :  { %v9642_v35 = vpack.c.bf16 %v3648_v22, %v3646_v12  ;;  %v7690_v12 = vld [vmem:[%s10778_s9 + $0x3a4] ss:$8 sps:$4 sm:$0xff]   ;;  %v7688_v22 = vld [vmem:[%s10778_s9 + $0x3a0] ss:$8 sps:$4 sm:$0xff]  }
 0x7c7   :  { %6967 = vmatpush1.bf16.msra.mxu1 %v9636_v32 }
 0x7c8   :  { %3259 = vmatpush1.bf16.msra.mxu0 %v7631_v36  ;;  %v3645_v36 = vld [vmem:[%s10782_s10 + $0x180] sm:$0xff]  ;;  %6969 = vmatprep.subr.bf16.mxu1 %v9642_v35 }
 0x7c9   :  { %3260 = vmatprep.subr.bf16.mxu0 %v7636_v42  ;;  %v3647_v42 = vld [vmem:[%s10782_s10 + $0x190] sm:$0xff] }
 0x7ca   :  { %v9654_v54 = vpack.c.bf16 %v3647_v42, %v3645_v36  ;;  %v7696_v36 = vld [vmem:[%s10778_s9 + $0x3c4] ss:$8 sps:$4 sm:$0xff]   ;;  %v7694_v42 = vld [vmem:[%s10778_s9 + $0x3c0] ss:$8 sps:$4 sm:$0xff]  }
 0x7cc   :  { %3261 = vmatpush1.bf16.msra.mxu0 %v7634_v1  ;;  %6971 = vmatpush1.bf16.msra.mxu1 %v9654_v54  ;;  %v7657_v1 = vld [vmem:[%s10778_s9 + $0x2f4] ss:$8 sps:$4 sm:$0xff]  }
 0x7cd   :  { %3262 = vmatprep.subr.bf16.mxu0 %v7639_v13  ;;  %v7655_v13 = vld [vmem:[%s10778_s9 + $0x2f0] ss:$8 sps:$4 sm:$0xff]  }
 0x7d0   :  { %3263 = vmatpush1.bf16.msra.mxu0 %v7637_v21  ;;  %v7663_v21 = vld [vmem:[%s10778_s9 + $0x314] ss:$8 sps:$4 sm:$0xff]  }
 0x7d1   :  { %3264 = vmatprep.subr.bf16.mxu0 %v7642_v26  ;;  %v7661_v26 = vld [vmem:[%s10778_s9 + $0x310] ss:$8 sps:$4 sm:$0xff]  }
 0x7d4   :  { %3265 = vmatpush1.bf16.msra.mxu0 %v7640_v5  ;;  %v7675_v5 = vld [vmem:[%s10778_s9 + $0x354] ss:$8 sps:$4 sm:$0xff]  }
 0x7d5   :  { %3266 = vmatprep.subr.bf16.mxu0 %v7645_v11  ;;  %v7673_v11 = vld [vmem:[%s10778_s9 + $0x350] ss:$8 sps:$4 sm:$0xff]  }
 0x7d8   :  { %3267 = vmatpush1.bf16.msra.mxu0 %v7643_v37  ;;  %v7684_v37 = vld [vmem:[%s10778_s9 + $0x384] ss:$8 sps:$4 sm:$0xff]  }
 0x7d9   :  { %3268 = vmatprep.subr.bf16.mxu0 %v7648_v60  ;;  %v7682_v60 = vld [vmem:[%s10778_s9 + $0x380] ss:$8 sps:$4 sm:$0xff]  }
 0x7dc   :  { %3269 = vmatpush1.bf16.msra.mxu0 %v7646_v27  ;;  %v7693_v27 = vld [vmem:[%s10778_s9 + $0x3b4] ss:$8 sps:$4 sm:$0xff]  }
 0x7dd   :  { %3270 = vmatprep.subr.bf16.mxu0 %v7651_v34  ;;  %v7691_v34 = vld [vmem:[%s10778_s9 + $0x3b0] ss:$8 sps:$4 sm:$0xff]  }
 0x7e0   :  { %3271 = vmatpush1.bf16.msra.mxu0 %v7649_v53  ;;  %v7699_v53 = vld [vmem:[%s10778_s9 + $0x3d4] ss:$8 sps:$4 sm:$0xff]  }
 0x7e1   :  { %3272 = vmatprep.subr.bf16.mxu0 %v7654_v58  ;;  %v7697_v58 = vld [vmem:[%s10778_s9 + $0x3d0] ss:$8 sps:$4 sm:$0xff]  }
 0x7e4   :  { %3273 = vmatpush1.bf16.msra.mxu0 %v7652_v0  ;;  %v7702_v0 = vld [vmem:[%s10778_s9 + $0x3e4] ss:$8 sps:$4 sm:$0xff]  }
 0x7e5   :  { %3274 = vmatprep.subr.bf16.mxu0 %v7657_v1  ;;  %v7700_v1 = vld [vmem:[%s10778_s9 + $0x3e0] ss:$8 sps:$4 sm:$0xff]  }
 0x7e8   :  { %3275 = vmatpush1.bf16.msra.mxu0 %v7655_v13  ;;  %v7705_v13 = vld [vmem:[%s10778_s9 + $0x3f4] ss:$8 sps:$4 sm:$0xff]  }
 0x7e9   :  { %3528 = vmatprep.subr.bf16.mxu0 %v7660_v15  ;;  %v7703_v15 = vld [vmem:[%s10778_s9 + $0x3f0] ss:$8 sps:$4 sm:$0xff]  }
 0x7eb   :  { %3277 = vmatmul.mubr.bf16.vlgmr.msra.gmra.mrb[28].mxu0 %v3049_v55  ;;  %v3333_v55 = vpack.c.bf16 %v9326_v57, %v9326_v57  ;;  %v3651_v57 = vld [vmem:[%s10782_s10 + $0x1b0] sm:$0xff] }
 0x7ec   :  { %3529 = vmatpush1.bf16.msra.mxu0 %v7658_v47  ;;  %3560 = vmatprep.mubr.bf16.mxu0 %v3334_v16  ;;  %v3650_v47 = vld [vmem:[%s10782_s10 + $0x1a8] sm:$0xff]  ;;  %v3652_v16 = vld [vmem:[%s10782_s10 + $0x1b8] sm:$0xff] }
 0x7ed   :  { %3530 = vmatprep.subr.bf16.mxu0 %v7663_v21  ;;  %v9779_v21 = vpack.c.bf16 %v3652_v16, %v3650_v47 }
 0x7ef   :  { %6973 = vmatprep.subr.bf16.mxu1 %v9779_v21 }
 0x7f0   :  { %3531 = vmatpush1.bf16.msra.mxu0 %v7661_v26  ;;  %v3649_v26 = vld [vmem:[%s10782_s10 + $0x1a0] sm:$0xff] }
 0x7f1   :  { %3532 = vmatprep.subr.bf16.mxu0 %v7666_v3  ;;  %v9787_v3 = vpack.c.bf16 %v3651_v57, %v3649_v26 }
 0x7f3   :  { %6975 = vmatpush1.bf16.msra.mxu1 %v9787_v3 }
 0x7f4   :  { %3533 = vmatpush1.bf16.msra.mxu0 %v7664_v17  ;;  %v3654_v17 = vld [vmem:[%s10782_s10 + $0x1c8] sm:$0xff] }
 0x7f5   :  { %3534 = vmatprep.subr.bf16.mxu0 %v7669_v52  ;;  %v3656_v52 = vld [vmem:[%s10782_s10 + $0x1d8] sm:$0xff] }
 0x7f8   :  { %3535 = vmatpush1.bf16.msra.mxu0 %v7667_v29  ;;  %v9797_v29 = vpack.c.bf16 %v3656_v52, %v3654_v17 }
 0x7f9   :  { %3536 = vmatprep.subr.bf16.mxu0 %v7672_v63  ;;  %v3653_v63 = vld [vmem:[%s10782_s10 + $0x1c0] sm:$0xff] }
 0x7fa   :  { %6977 = vmatprep.subr.bf16.mxu1 %v9797_v29 }
 0x7fc   :  { %3537 = vmatpush1.bf16.msra.mxu0 %v7670_v4  ;;  %v3655_v4 = vld [vmem:[%s10782_s10 + $0x1d0] sm:$0xff] }
 0x7fd   :  { %3538 = vmatprep.subr.bf16.mxu0 %v7675_v5  ;;  %v9805_v5 = vpack.c.bf16 %v3655_v4, %v3653_v63  ;;  %v3811_v4 = vld [vmem:[%s10784_s11] sm:$0x3] }
 0x7ff   :  { %6979 = vmatpush1.bf16.msra.mxu1 %v9805_v5 }
 0x800   :  { %3539 = vmatpush1.bf16.msra.mxu0 %v7673_v11  ;;  %v3658_v11 = vld [vmem:[%s10782_s10 + $0x1e8] sm:$0xff] }
 0x801   :  { %3540 = vmatprep.subr.bf16.mxu0 %v7678_v24  ;;  %v3660_v24 = vld [vmem:[%s10782_s10 + $0x1f8] sm:$0xff] }
 0x804   :  { %3541 = vmatpush1.bf16.msra.mxu0 %v7676_v25  ;;  %v3657_v25 = vld [vmem:[%s10782_s10 + $0x1e0] sm:$0xff] }
 0x805   :  { %3542 = vmatprep.subr.bf16.mxu0 %v7681_v30  ;;  %v9818_v30 = vpack.c.bf16 %v3660_v24, %v3658_v11  ;;  %v3858_v11 = vld [vmem:[%s10785_s12] sm:$0x3] }
 0x807   :  { %6981 = vmatprep.subr.bf16.mxu1 %v9818_v30 }
 0x808   :  { %3543 = vmatpush1.bf16.msra.mxu0 %v7679_v31  ;;  %v3659_v31 = vld [vmem:[%s10782_s10 + $0x1f0] sm:$0xff] }
 0x809   :  { %3544 = vmatprep.subr.bf16.mxu0 %v7684_v37  ;;  %v9823_v37 = vpack.c.bf16 %v3659_v31, %v3657_v25 }
 0x80b   :  { %6983 = vmatpush1.bf16.msra.mxu1 %v9823_v37 }
 0x80c   :  { %3545 = vmatpush1.bf16.msra.mxu0 %v7682_v60  ;;  %6985 = vmatprep.subr.bf16.mxu1 %v9364_v59 }
 0x80d   :  { %3546 = vmatprep.subr.bf16.mxu0 %v7687_v6 }
 0x810   :  { %3547 = vmatpush1.bf16.msra.mxu0 %v7685_v7 }
 0x811   :  { %3548 = vmatprep.subr.bf16.mxu0 %v7690_v12 }
 0x814   :  { %3549 = vmatpush1.bf16.msra.mxu0 %v7688_v22 }
 0x815   :  { %3550 = vmatprep.subr.bf16.mxu0 %v7693_v27 }
 0x818   :  { %3551 = vmatpush1.bf16.msra.mxu0 %v7691_v34 }
 0x819   :  { %3552 = vmatprep.subr.bf16.mxu0 %v7696_v36 }
 0x81c   :  { %3553 = vmatpush1.bf16.msra.mxu0 %v7694_v42 }
 0x81d   :  { %3554 = vmatprep.subr.bf16.mxu0 %v7699_v53 }
 0x820   :  { %3555 = vmatpush1.bf16.msra.mxu0 %v7697_v58 }
 0x821   :  { %3556 = vmatprep.subr.bf16.mxu0 %v7702_v0 }
 0x824   :  { %3557 = vmatpush1.bf16.msra.mxu0 %v7700_v1 }
 0x825   :  { %3558 = vmatprep.subr.bf16.mxu0 %v7705_v13 }
 0x828   :  { %3559 = vmatpush1.bf16.msra.mxu0 %v7703_v15 }
 0x82b   :  { %3561 = vmatmul.mubr.bf16.vlgmr.msra.gmra.mrb[28].mxu0 %v3333_v55 }
 0x82c   :  { %4487 = vmatprep.mubr.bf16.mxu0 %v7946_v33 }
 0x8fe   :  { %v9828_v60 = vpop.f32.mrb[28].mxu0 }
 0x8ff   :  { %v3571_v6 = vrot.slane %v9828_v60, 4  ;;  %v9831_v7 = vpop.f32.mrb[29].mxu0 }
 0x900   :  { %v3577_v12 = vrot.slane %v9831_v7, 4  ;;  %v3584_v22 = vmul.f32 %v9831_v7, %v9831_v7  ;;  %v3566_v27 = vpop.f32.mrb[30].mxu0 }
 0x901   :  { %v3572_v34 = vadd.f32 %v3571_v6, %v9828_v60  ;;  %v3567_v36 = vpop.f32.mrb[31].mxu0 }
 0x902   :  { %v3578_v42 = vadd.f32 %v3577_v12, %v9831_v7  ;;  %v3591_v53 = vrot.slane %v3584_v22, 4 }
 0x903   :  { %v3573_v58 = vrot.slane %v3572_v34, 2 }
 0x904   :  { %v3579_v59 = vrot.slane %v3578_v42, 2  ;;  %v3592_v0 = vadd.f32 %v3591_v53, %v3584_v22 }
 0x905   :  { %v3574_v1 = vadd.f32 %v3573_v58, %v3572_v34 }
 0x906   :  { %v3580_v13 = vadd.f32 %v3579_v59, %v3578_v42  ;;  %v3593_v15 = vrot.slane %v3592_v0, 2  ;;  %v3880_v59 = vld [vmem:[%s10786_s13] sm:$0x3] }
 0x907   :  { %v3575_v55 = vrot.slane %v3574_v1, 1 }
 0x908   :  { %v3581_v47 = vrot.slane %v3580_v13, 1  ;;  %v3594_v16 = vadd.f32 %v3593_v15, %v3592_v0  ;;  %v6473_v0 = vld [vmem:[%s10786_s13 + $0x4] sm:$0x3]  ;;  %v7706_v15 = vld [vmem:[%s10783_s14 + $0x100] ss:$8 sps:$4 sm:$0xff]  }
 0x909   :  { %v3576_v17 = vadd.f32 %v3575_v55, %v3574_v1  ;;  %v7708_v1 = vld [vmem:[%s10783_s14 + $0x104] ss:$8 sps:$4 sm:$0xff]  }
 0x90a   :  { %v3582_v26 = vadd.f32 %v3581_v47, %v3580_v13  ;;  %v3595_v57 = vrot.slane %v3594_v16, 1  ;;  %v6374_v13 = vld [vmem:[%s10786_s13 + $0x2] sm:$0x3]  ;;  %v6540_v55 = vld [vmem:[%s10786_s13 + $0x6] sm:$0x3] }
 0x90b   :  { %v7711_v47 = vld [vmem:[%s10783_s14 + $0x114] ss:$8 sps:$4 sm:$0xff]  }
 0x90c   :  { %3725 = vmatprep.mubr.f32.mxu1 %v3582_v26  ;;  %v3596_v52 = vadd.f32 %v3595_v57, %v3594_v16  ;;  %v7709_v16 = vld [vmem:[%s10783_s14 + $0x110] ss:$8 sps:$4 sm:$0xff]   ;;  %v7714_v26 = vld [vmem:[%s10783_s14 + $0x124] ss:$8 sps:$4 sm:$0xff]   ;;  %v7712_v57 = vld [vmem:[%s10783_s14 + $0x120] ss:$8 sps:$4 sm:$0xff]  }
 0x90d   :  { %3726 = vmatmul.mubr.f32.vlgmr.msra.gmra.mrb[36].mxu1 %v3576_v17  ;;  %v7717_v17 = vld [vmem:[%s10783_s14 + $0x134] ss:$8 sps:$4 sm:$0xff]  }
 0x90e   :  { %6987 = vmatpush1.bf16.msra.mxu1 %v9375_v8  ;;  %3798 = vmatprep.mubr.f32.mxu1 %v3596_v52  ;;  %v3583_v8 = vmul.f32 %v9828_v60, %v9828_v60  ;;  %v7715_v52 = vld [vmem:[%s10783_s14 + $0x130] ss:$8 sps:$4 sm:$0xff]  }
 0x90f   :  { %6989 = vmatprep.subr.bf16.mxu1 %v9377_v9 }
 0x910   :  { %v3585_v9 = vrot.slane %v3583_v8, 4 }
 0x912   :  { %6991 = vmatpush1.bf16.msra.mxu1 %v9396_v50  ;;  %v3586_v50 = vadd.f32 %v3585_v9, %v3583_v8  ;;  %v7720_v8 = vld [vmem:[%s10783_s14 + $0x144] ss:$8 sps:$4 sm:$0xff]   ;;  %v7718_v9 = vld [vmem:[%s10783_s14 + $0x140] ss:$8 sps:$4 sm:$0xff]  }
 0x913   :  { %6993 = vmatprep.subr.bf16.mxu1 %v9402_v20 }
 0x914   :  { %v3587_v20 = vrot.slane %v3586_v50, 2 }
 0x916   :  { %6995 = vmatpush1.bf16.msra.mxu1 %v9420_v28  ;;  %v3588_v28 = vadd.f32 %v3587_v20, %v3586_v50  ;;  %v7723_v50 = vld [vmem:[%s10783_s14 + $0x154] ss:$8 sps:$4 sm:$0xff]   ;;  %v7721_v20 = vld [vmem:[%s10783_s14 + $0x150] ss:$8 sps:$4 sm:$0xff]  }
 0x917   :  { %6997 = vmatprep.subr.bf16.mxu1 %v9426_v62 }
 0x918   :  { %v3589_v62 = vrot.slane %v3588_v28, 1 }
 0x91a   :  { %6999 = vmatpush1.bf16.msra.mxu1 %v9444_v43  ;;  %v3590_v43 = vadd.f32 %v3589_v62, %v3588_v28  ;;  %v7726_v28 = vld [vmem:[%s10783_s14 + $0x164] ss:$8 sps:$4 sm:$0xff]   ;;  %v7724_v62 = vld [vmem:[%s10783_s14 + $0x160] ss:$8 sps:$4 sm:$0xff]  }
 0x91b   :  { %7001 = vmatprep.subr.bf16.mxu1 %v9450_v19 }
 0x91e   :  { %7003 = vmatpush1.bf16.msra.mxu1 %v9468_v38 }
 0x91f   :  { %7005 = vmatprep.subr.bf16.mxu1 %v9474_v46 }
 0x922   :  { %7007 = vmatpush1.bf16.msra.mxu1 %v9492_v49 }
 0x923   :  { %7009 = vmatprep.subr.bf16.mxu1 %v9498_v48 }
 0x926   :  { %7011 = vmatpush1.bf16.msra.mxu1 %v9516_v40 }
 0x927   :  { %7013 = vmatprep.subr.bf16.mxu1 %v9522_v44 }
 0x92a   :  { %7015 = vmatpush1.bf16.msra.mxu1 %v9540_v2 }
 0x92b   :  { %7017 = vmatprep.subr.bf16.mxu1 %v9546_v14 }
 0x92e   :  { %7019 = vmatpush1.bf16.msra.mxu1 %v9564_v23 }
 0x92f   :  { %7021 = vmatprep.subr.bf16.mxu1 %v9570_v51 }
 0x932   :  { %7023 = vmatpush1.bf16.msra.mxu1 %v9588_v10 }
 0x933   :  { %7025 = vmatprep.subr.bf16.mxu1 %v9594_v41 }
 0x936   :  { %7027 = vmatpush1.bf16.msra.mxu1 %v9612_v45 }
 0x937   :  { %7029 = vmatprep.subr.bf16.mxu1 %v9618_v61 }
 0x93a   :  { %7031 = vmatpush1.bf16.msra.mxu1 %v9636_v32 }
 0x93b   :  { %7033 = vmatprep.subr.bf16.mxu1 %v9642_v35 }
 0x93e   :  { %7035 = vmatpush1.bf16.msra.mxu1 %v9654_v54 }
 0x93f   :  { %7037 = vmatprep.subr.bf16.mxu1 %v9779_v21 }
 0x942   :  { %7039 = vmatpush1.bf16.msra.mxu1 %v9787_v3 }
 0x943   :  { %7041 = vmatprep.subr.bf16.mxu1 %v9797_v29 }
 0x946   :  { %7043 = vmatpush1.bf16.msra.mxu1 %v9805_v5 }
 0x947   :  { %7045 = vmatprep.subr.bf16.mxu1 %v9818_v30  ;;  %v3867_v30 = vrot.slane %v3858_v11, %v9107_v56 }
 0x94a   :  { %7047 = vmatpush1.bf16.msra.mxu1 %v9823_v37  ;;  %v3863_v37 = vrot.slane %v3858_v11, %v9092_v18 }
 0x94d   :  { %3799 = vmatmul.mubr.f32.vlgmr.msra.gmra.mrb[38].mxu1 %v3590_v43  ;;  %v7729_v43 = vld [vmem:[%s10783_s14 + $0x174] ss:$8 sps:$4 sm:$0xff]  }
 0x94e   :  { %3924 = vmatprep.mubr.bf16.mxu1 %v7946_v33 }
 0x9e0   :  { %v3727_v19 = vpop.f32.mrb[36].mxu1 }
 0x9e1   :  { %v3732_v38 = vmul.f32 0.03125, %v3727_v19  ;;  %v3729_v46 = vpop.f32.mrb[37].mxu1  ;;  %v7727_v19 = vld [vmem:[%s10783_s14 + $0x170] ss:$8 sps:$4 sm:$0xff]  }
 0x9e2   :  { %v3733_v49 = vmul.f32 0.03125, %v3729_v46  ;;  %v7730_v46 = vld [vmem:[%s10783_s14 + $0x180] ss:$8 sps:$4 sm:$0xff]  }
 0x9e3   :  { %v3838_v48 = vrot.slane %v3732_v38, %v9092_v18  ;;  %v3807_v23 = vmul.f32 %v3732_v38, %v3732_v38  ;;  %v7732_v38 = vld [vmem:[%s10783_s14 + $0x184] ss:$8 sps:$4 sm:$0xff]  }
 0x9e4   :  { %v3842_v40 = vrot.slane %v3733_v49, %v9092_v18  ;;  %v3808_v41 = vmul.f32 %v3733_v49, %v3733_v49  ;;  %v7735_v49 = vld [vmem:[%s10783_s14 + $0x194] ss:$8 sps:$4 sm:$0xff]  }
 0x9e5   :  { %v3843_v44 = vsub.f32 %v9828_v60, %v3838_v48  ;;  %v7733_v48 = vld [vmem:[%s10783_s14 + $0x190] ss:$8 sps:$4 sm:$0xff]  }
 0x9e6   :  { %v3844_v2 = vsub.f32 %v9831_v7, %v3842_v40  ;;  %v7738_v40 = vld [vmem:[%s10783_s14 + $0x1a4] ss:$8 sps:$4 sm:$0xff]  }
 0xa20   :  { %v3800_v14 = vpop.f32.mrb[38].mxu1 }
 0xa21   :  { %v3805_v51 = vmul.f32 0.03125, %v3800_v14  ;;  %v3802_v10 = vpop.f32.mrb[39].mxu1  ;;  %v7739_v14 = vld [vmem:[%s10783_s14 + $0x1b0] ss:$8 sps:$4 sm:$0xff]  }
 0xa22   :  { %v3806_v45 = vmul.f32 0.03125, %v3802_v10  ;;  %v7747_v10 = vld [vmem:[%s10783_s14 + $0x1d4] ss:$8 sps:$4 sm:$0xff]  }
 0xa23   :  { %v3809_v61 = vsub.f32 %v3805_v51, %v3807_v23  ;;  %v7744_v23 = vld [vmem:[%s10783_s14 + $0x1c4] ss:$8 sps:$4 sm:$0xff]   ;;  %v7742_v51 = vld [vmem:[%s10783_s14 + $0x1c0] ss:$8 sps:$4 sm:$0xff]  }
 0xa24   :  { %v3810_v32 = vsub.f32 %v3806_v45, %v3808_v41  ;;  %v7745_v41 = vld [vmem:[%s10783_s14 + $0x1d0] ss:$8 sps:$4 sm:$0xff]   ;;  %v7750_v45 = vld [vmem:[%s10783_s14 + $0x1e4] ss:$8 sps:$4 sm:$0xff]  }
 0xa25   :  { %v3812_v35 = vadd.f32 1e-05, %v3809_v61  ;;  %v7748_v61 = vld [vmem:[%s10783_s14 + $0x1e0] ss:$8 sps:$4 sm:$0xff]  }
 0xa26   :  { %v3813_v54 = vadd.f32 1e-05, %v3810_v32  ;;  %v7753_v32 = vld [vmem:[%s10783_s14 + $0x1f4] ss:$8 sps:$4 sm:$0xff]  }
 0xa27   :  { %7934 = vrsqrt.f32 %v3812_v35  ;;  %v7751_v35 = vld [vmem:[%s10783_s14 + $0x1f0] ss:$8 sps:$4 sm:$0xff]  }
 0xa28   :  { %7936 = vrsqrt.f32 %v3813_v54  ;;  %v7756_v54 = vld [vmem:[%s10783_s14 + $0x4] ss:$8 sps:$4 sm:$0xff]  }
 0xa31   :  { %v7935_v21 = vpop.eup %7934 }
 0xa32   :  { %v7937_v3 = vpop.eup %7936 }
 0xa33   :  { %v3818_v29 = vcombine.low %v7935_v21, %v7937_v3 }
 0xa35   :  { %v3825_v63 = vrot.slane %v3818_v29, %v9100_v39 }
 0xa37   :  { %v3832_v5 = vrot.slane %v3825_v63, %v9100_v39 }
 0xa39   :  { %v3834_v24 = vmul.f32 %v3832_v5, %v3811_v4 }
 0xa3b   :  { %v3853_v25 = vrot.slane %v3834_v24, %v9107_v56  ;;  %v3849_v31 = vrot.slane %v3834_v24, %v9092_v18 }
 0xa3d   :  { %v3857_v60 = vmul.f32 %v3853_v25, %v3844_v2  ;;  %v3856_v6 = vmul.f32 %v3849_v31, %v3843_v44  ;;  %v7736_v44 = vld [vmem:[%s10783_s14 + $0x1a0] ss:$8 sps:$4 sm:$0xff]   ;;  %v7741_v2 = vld [vmem:[%s10783_s14 + $0x1b4] ss:$8 sps:$4 sm:$0xff]  }
 0xa3f   :  { %v3871_v7 = vadd.f32 %v3867_v30, %v3857_v60  ;;  %v3870_v12 = vadd.f32 %v3863_v37, %v3856_v6  ;;  %v7754_v60 = vld [vmem:[%s10783_s14] ss:$8 sps:$4 sm:$0xff]  }
 0xa41   :  { %vm3873_vm0 = vcmp.gt.f32.partialorder %v3871_v7, 0.0  ;;  %v3875_v22 = vmul.f32 0.2, %v3871_v7  ;;  %vm3872_vm1 = vcmp.gt.f32.partialorder %v3870_v12, 0.0  ;;  %v3874_v27 = vmul.f32 0.2, %v3870_v12 }
 0xa43   :  { %v3877_v34 = vsel %vm3873_vm0, %v3871_v7, %v3875_v22  ;;  %v3876_v36 = vsel %vm3872_vm1, %v3870_v12, %v3874_v27  ;;  %v7759_v12 = vld [vmem:[%s10783_s14 + $0x14] ss:$8 sps:$4 sm:$0xff]   ;;  %v7757_v27 = vld [vmem:[%s10783_s14 + $0x10] ss:$8 sps:$4 sm:$0xff]  }
 0xa44   :  { %v3879_v42 = vpack.c.bf16 %v3877_v34, %v3877_v34  ;;  %v3878_v53 = vpack.c.bf16 %v3876_v36, %v3876_v36  ;;  %v7762_v34 = vld [vmem:[%s10783_s14 + $0x24] ss:$8 sps:$4 sm:$0xff]   ;;  %v7760_v36 = vld [vmem:[%s10783_s14 + $0x20] ss:$8 sps:$4 sm:$0xff]  }
 0xa46   :  { %6372 = vmatprep.subr.msk.bf16.mxu1 %vm3885_vm2, %v3879_v42  ;;  %6474 = vmatprep.subr.msk.bf16.mxu0 %vm3885_vm2, %v3879_v42  ;;  %v3887_v58 = vsel %vm3885_vm2, %v3878_v53, 0  ;;  %v7763_v53 = vld [vmem:[%s10783_s14 + $0x30] ss:$8 sps:$4 sm:$0xff]  }
 0xa47   :  { %3893 = vmatpush1.bf16.msra.mxu1 %v3887_v58  ;;  %4456 = vmatpush1.bf16.msra.mxu0 %v3887_v58 }
 0xa48   :  { %6375 = vmatprep.subr.msk.bf16.mxu1 %vm3885_vm2, %v3879_v42  ;;  %6541 = vmatprep.subr.msk.bf16.mxu0 %vm3885_vm2, %v3879_v42  ;;  %v7765_v42 = vld [vmem:[%s10783_s14 + $0x34] ss:$8 sps:$4 sm:$0xff]  }
 0xa4a   :  { %6373 = vmatmul.mubr.msk.bf16.vlgmr.msra.gmra.mrb[40].mxu1 %vm3881_vm3, %v3880_v59  ;;  %6475 = vmatmul.mubr.msk.bf16.vlgmr.msra.gmra.mrb[32].mxu0 %vm3881_vm3, %v6473_v0  ;;  %v7766_v59 = vld [vmem:[%s10783_s14 + $0x40] ss:$8 sps:$4 sm:$0xff]   ;;  %v7771_v0 = vld [vmem:[%s10783_s14 + $0x54] ss:$8 sps:$4 sm:$0xff]  }
 0xa4b   :  { %3973 = vmatpush1.bf16.msra.mxu1 %v3887_v58  ;;  %4740 = vmatpush1.bf16.msra.mxu0 %v3887_v58  ;;  %v7768_v58 = vld [vmem:[%s10783_s14 + $0x44] ss:$8 sps:$4 sm:$0xff]  }
 0xa4c   :  { %4004 = vmatprep.mubr.bf16.mxu1 %v7946_v33  ;;  %4208 = vmatprep.subr.bf16.mxu1 %v7708_v1  ;;  %v7769_v1 = vld [vmem:[%s10783_s14 + $0x50] ss:$8 sps:$4 sm:$0xff]  }
 0xa4d   :  { %4771 = vmatprep.mubr.bf16.mxu0 %v7946_v33 }
 0xa52   :  { %6376 = vmatmul.mubr.msk.bf16.vlgmr.msra.gmra.mrb[44].mxu1 %vm3881_vm3, %v6374_v13  ;;  %6542 = vmatmul.mubr.msk.bf16.vlgmr.msra.gmra.mrb[36].mxu0 %vm3881_vm3, %v6540_v55  ;;  %v7774_v13 = vld [vmem:[%s10783_s14 + $0x64] ss:$8 sps:$4 sm:$0xff]   ;;  %v7777_v55 = vld [vmem:[%s10783_s14 + $0x74] ss:$8 sps:$4 sm:$0xff]  }
 0xa53   :  { %4209 = vmatpush1.bf16.msra.mxu1 %v7706_v15  ;;  %v7772_v15 = vld [vmem:[%s10783_s14 + $0x60] ss:$8 sps:$4 sm:$0xff]  }
 0xa54   :  { %4210 = vmatprep.subr.bf16.mxu1 %v7711_v47  ;;  %v7775_v47 = vld [vmem:[%s10783_s14 + $0x70] ss:$8 sps:$4 sm:$0xff]  }
 0xa57   :  { %4211 = vmatpush1.bf16.msra.mxu1 %v7709_v16  ;;  %v7780_v16 = vld [vmem:[%s10783_s14 + $0x84] ss:$8 sps:$4 sm:$0xff]  }
 0xa58   :  { %4212 = vmatprep.subr.bf16.mxu1 %v7714_v26  ;;  %v7778_v26 = vld [vmem:[%s10783_s14 + $0x80] ss:$8 sps:$4 sm:$0xff]  }
 0xa5b   :  { %4213 = vmatpush1.bf16.msra.mxu1 %v7712_v57  ;;  %v7783_v57 = vld [vmem:[%s10783_s14 + $0x94] ss:$8 sps:$4 sm:$0xff]  }
 0xa5c   :  { %4214 = vmatprep.subr.bf16.mxu1 %v7717_v17  ;;  %v7781_v17 = vld [vmem:[%s10783_s14 + $0x90] ss:$8 sps:$4 sm:$0xff]  }
 0xa5f   :  { %4215 = vmatpush1.bf16.msra.mxu1 %v7715_v52  ;;  %v7786_v52 = vld [vmem:[%s10783_s14 + $0xa4] ss:$8 sps:$4 sm:$0xff]  }
 0xa60   :  { %4216 = vmatprep.subr.bf16.mxu1 %v7720_v8  ;;  %v7784_v8 = vld [vmem:[%s10783_s14 + $0xa0] ss:$8 sps:$4 sm:$0xff]  }
 0xa63   :  { %4217 = vmatpush1.bf16.msra.mxu1 %v7718_v9  ;;  %v7789_v9 = vld [vmem:[%s10783_s14 + $0xb4] ss:$8 sps:$4 sm:$0xff]  }
 0xa64   :  { %4218 = vmatprep.subr.bf16.mxu1 %v7723_v50  ;;  %v7787_v50 = vld [vmem:[%s10783_s14 + $0xb0] ss:$8 sps:$4 sm:$0xff]  }
 0xa67   :  { %4219 = vmatpush1.bf16.msra.mxu1 %v7721_v20  ;;  %v7792_v20 = vld [vmem:[%s10783_s14 + $0xc4] ss:$8 sps:$4 sm:$0xff]  }
 0xa68   :  { %4220 = vmatprep.subr.bf16.mxu1 %v7726_v28  ;;  %v7790_v28 = vld [vmem:[%s10783_s14 + $0xc0] ss:$8 sps:$4 sm:$0xff]  }
 0xa6b   :  { %4221 = vmatpush1.bf16.msra.mxu1 %v7724_v62  ;;  %v7795_v62 = vld [vmem:[%s10783_s14 + $0xd4] ss:$8 sps:$4 sm:$0xff]  }
 0xa6c   :  { %4222 = vmatprep.subr.bf16.mxu1 %v7729_v43  ;;  %v7793_v43 = vld [vmem:[%s10783_s14 + $0xd0] ss:$8 sps:$4 sm:$0xff]  }
 0xa6f   :  { %4223 = vmatpush1.bf16.msra.mxu1 %v7727_v19  ;;  %v7798_v19 = vld [vmem:[%s10783_s14 + $0xe4] ss:$8 sps:$4 sm:$0xff]  }
 0xa70   :  { %4224 = vmatprep.subr.bf16.mxu1 %v7732_v38  ;;  %v7796_v38 = vld [vmem:[%s10783_s14 + $0xe0] ss:$8 sps:$4 sm:$0xff]  }
 0xa73   :  { %4225 = vmatpush1.bf16.msra.mxu1 %v7730_v46 }
 0xa74   :  { %4226 = vmatprep.subr.bf16.mxu1 %v7735_v49  ;;  %v7801_v49 = vld [vmem:[%s10783_s14 + $0xf4] ss:$8 sps:$4 sm:$0xff]  }
 0xa77   :  { %4227 = vmatpush1.bf16.msra.mxu1 %v7733_v48 }
 0xa78   :  { %4228 = vmatprep.subr.bf16.mxu1 %v7738_v40 }
 0xa7b   :  { %4229 = vmatpush1.bf16.msra.mxu1 %v7736_v44 }
 0xa7c   :  { %4230 = vmatprep.subr.bf16.mxu1 %v7741_v2  ;;  %v7799_v2 = vld [vmem:[%s10783_s14 + $0xf0] ss:$8 sps:$4 sm:$0xff]  }
 0xa7f   :  { %4231 = vmatpush1.bf16.msra.mxu1 %v7739_v14  ;;  %v7804_v14 = vld [vmem:[%s10783_s14 + $0x204] ss:$8 sps:$4 sm:$0xff]  }
 0xa80   :  { %4232 = vmatprep.subr.bf16.mxu1 %v7744_v23  ;;  %v7802_v23 = vld [vmem:[%s10783_s14 + $0x200] ss:$8 sps:$4 sm:$0xff]  }
 0xa83   :  { %4233 = vmatpush1.bf16.msra.mxu1 %v7742_v51 }
 0xa84   :  { %4234 = vmatprep.subr.bf16.mxu1 %v7747_v10 }
 0xa87   :  { %4235 = vmatpush1.bf16.msra.mxu1 %v7745_v41  ;;  %v7807_v41 = vld [vmem:[%s10783_s14 + $0x214] ss:$8 sps:$4 sm:$0xff]  }
 0xa88   :  { %4236 = vmatprep.subr.bf16.mxu1 %v7750_v45  ;;  %v7805_v45 = vld [vmem:[%s10783_s14 + $0x210] ss:$8 sps:$4 sm:$0xff]  }
 0xa8b   :  { %4237 = vmatpush1.bf16.msra.mxu1 %v7748_v61  ;;  %v7810_v61 = vld [vmem:[%s10783_s14 + $0x224] ss:$8 sps:$4 sm:$0xff]  }
 0xa8c   :  { %4238 = vmatprep.subr.bf16.mxu1 %v7753_v32  ;;  %v5049_v32 = vld [vmem:[%s10787_s15 + $0x8] sm:$0xff] }
 0xa8f   :  { %4239 = vmatpush1.bf16.msra.mxu1 %v7751_v35  ;;  %v5051_v35 = vld [vmem:[%s10787_s15 + $0x18] sm:$0xff] }
 0xa90   :  { %4409 = vmatprep.subr.bf16.mxu1 %v7756_v54  ;;  %v5048_v54 = vld [vmem:[%s10787_s15] sm:$0xff] }
 0xb1d   :  { %v10010_v21 = vpop.f32.mrb[40].mxu1  ;;  %v10012_v4 = vpop.f32.mrb[32].mxu0 }
 0xb1e   :  { %v3928_v3 = vpop.f32.mrb[41].mxu1  ;;  %v10014_v5 = vpop.f32.mrb[33].mxu0  ;;  %v3933_v10 = vpack.c.bf16 %v10010_v21, %v10010_v21  ;;  %v10141_v21 = vpack.c.bf16 %v5051_v35, %v5049_v32  ;;  %v5076_v32 = vld [vmem:[%s10787_s15 + $0xe0] sm:$0xff]  ;;  %v5078_v35 = vld [vmem:[%s10787_s15 + $0xf0] sm:$0xff] }
 0xb1f   :  { %v3930_v29 = vpop.f32.mrb[42].mxu1  ;;  %v4493_v11 = vpop.f32.mrb[34].mxu0  ;;  %v3934_v22 = vpack.c.bf16 %v3928_v3, %v3928_v3  ;;  %v4497_v51 = vpack.c.bf16 %v10014_v5, %v10014_v5  ;;  %v5050_v3 = vld [vmem:[%s10787_s15 + $0x10] sm:$0xff] }
 0xb20   :  { %v3931_v63 = vpop.f32.mrb[43].mxu1  ;;  %v4494_v25 = vpop.f32.mrb[35].mxu0  ;;  %v5053_v29 = vld [vmem:[%s10787_s15 + $0x28] sm:$0xff]  ;;  %v10152_v5 = vpack.c.bf16 %v5050_v3, %v5048_v54  ;;  %7049 = vmatprep.subr.bf16.mxu0 %v10141_v21  ;;  %v5083_v3 = vld [vmem:[%s10787_s15 + $0x118] sm:$0xff] }
 0xb21   :  { %v5055_v63 = vld [vmem:[%s10787_s15 + $0x38] sm:$0xff]  ;;  %v5054_v25 = vld [vmem:[%s10787_s15 + $0x30] sm:$0xff]  ;;  %v5081_v54 = vld [vmem:[%s10787_s15 + $0x108] sm:$0xff] }
 0xb22   :  { %v10154_v11 = vpack.c.bf16 %v5055_v63, %v5053_v29  ;;  %7051 = vmatpush1.bf16.msra.mxu0 %v10152_v5  ;;  %v7826_v29 = vld [vmem:[%s10783_s14 + $0x280] ss:$8 sps:$4 sm:$0xff]   ;;  %v10317_v63 = vpack.c.bf16 %v5078_v35, %v5076_v32  ;;  %v7849_v35 = vld [vmem:[%s10783_s14 + $0x2f4] ss:$8 sps:$4 sm:$0xff]  }
 0xb23   :  { %v7844_v32 = vld [vmem:[%s10783_s14 + $0x2e0] ss:$8 sps:$4 sm:$0xff]  }
 0xb24   :  { %7053 = vmatprep.subr.bf16.mxu0 %v10154_v11 }
 0xb25   :  { %v4006_v24 = vpop.f32.mrb[44].mxu1  ;;  %v10103_v46 = vpop.f32.mrb[36].mxu0 }
 0xb26   :  { %v4008_v30 = vpop.f32.mrb[45].mxu1  ;;  %v4013_v6 = vpack.c.bf16 %v4006_v24, %v4006_v24  ;;  %v10108_v48 = vpop.f32.mrb[37].mxu0  ;;  %v5052_v24 = vld [vmem:[%s10787_s15 + $0x20] sm:$0xff] }
 0xb27   :  { %v4014_v31 = vpack.c.bf16 %v4008_v30, %v4008_v30  ;;  %v4010_v37 = vpop.f32.mrb[46].mxu1  ;;  %v4777_v40 = vpop.f32.mrb[38].mxu0  ;;  %v5057_v30 = vld [vmem:[%s10787_s15 + $0x48] sm:$0xff] }
 0xb28   :  { %v4011_v7 = vpop.f32.mrb[47].mxu1  ;;  %v4778_v44 = vpop.f32.mrb[39].mxu0  ;;  %v7808_v37 = vld [vmem:[%s10783_s14 + $0x220] ss:$8 sps:$4 sm:$0xff]   ;;  %v7825_v40 = vld [vmem:[%s10783_s14 + $0x274] ss:$8 sps:$4 sm:$0xff]  }
 0xb29   :  { %4240 = vmatprep.mubr.bf16.mxu1 %v4014_v31  ;;  %v5059_v31 = vld [vmem:[%s10787_s15 + $0x58] sm:$0xff] }
 0xb2a   :  { %4241 = vmatmul.mubr.bf16.vlgmr.msra.gmra.mrb[48].mxu1 %v4013_v6  ;;  %v7813_v6 = vld [vmem:[%s10783_s14 + $0x234] ss:$8 sps:$4 sm:$0xff]   ;;  %v10179_v7 = vpack.c.bf16 %v5059_v31, %v5057_v30  ;;  %v5080_v30 = vld [vmem:[%s10787_s15 + $0x100] sm:$0xff] }
 0xb2b   :  { %4410 = vmatpush1.bf16.msra.mxu1 %v7754_v60  ;;  %4441 = vmatprep.mubr.bf16.mxu1 %v3934_v22  ;;  %v10173_v60 = vpack.c.bf16 %v5054_v25, %v5052_v24  ;;  %v5058_v22 = vld [vmem:[%s10787_s15 + $0x50] sm:$0xff]  ;;  %v10323_v25 = vpack.c.bf16 %v5083_v3, %v5081_v54  ;;  %v7852_v3 = vld [vmem:[%s10783_s14 + $0x304] ss:$8 sps:$4 sm:$0xff]  }
 0xb2c   :  { %4411 = vmatprep.subr.bf16.mxu1 %v7759_v12  ;;  %v5056_v12 = vld [vmem:[%s10787_s15 + $0x40] sm:$0xff]  ;;  %v7831_v24 = vld [vmem:[%s10783_s14 + $0x294] ss:$8 sps:$4 sm:$0xff]   ;;  %v7847_v54 = vld [vmem:[%s10783_s14 + $0x2f0] ss:$8 sps:$4 sm:$0xff]  }
 0xb2d   :  { %7055 = vmatpush1.bf16.msra.mxu0 %v10173_v60  ;;  %v5082_v31 = vld [vmem:[%s10787_s15 + $0x110] sm:$0xff] }
 0xb2e   :  { %7057 = vmatprep.subr.bf16.mxu0 %v10179_v7 }
 0xb2f   :  { %4412 = vmatpush1.bf16.msra.mxu1 %v7757_v27  ;;  %v5061_v27 = vld [vmem:[%s10787_s15 + $0x68] sm:$0xff] }
 0xb30   :  { %4413 = vmatprep.subr.bf16.mxu1 %v7762_v34  ;;  %v5063_v34 = vld [vmem:[%s10787_s15 + $0x78] sm:$0xff] }
 0xb33   :  { %4414 = vmatpush1.bf16.msra.mxu1 %v7760_v36  ;;  %v7811_v36 = vld [vmem:[%s10783_s14 + $0x230] ss:$8 sps:$4 sm:$0xff]  }
 0xb34   :  { %4415 = vmatprep.subr.bf16.mxu1 %v7765_v42  ;;  %v10197_v42 = vpack.c.bf16 %v5058_v22, %v5056_v12  ;;  %v7829_v12 = vld [vmem:[%s10783_s14 + $0x290] ss:$8 sps:$4 sm:$0xff]   ;;  %v10341_v22 = vpack.c.bf16 %v5082_v31, %v5080_v30  ;;  %v4781_v30 = vpack.c.bf16 %v10108_v48, %v10108_v48  ;;  %v7855_v31 = vld [vmem:[%s10783_s14 + $0x314] ss:$8 sps:$4 sm:$0xff]   ;;  %v7856_v48 = vld [vmem:[%s10783_s14 + $0x320] ss:$8 sps:$4 sm:$0xff]  }
 0xb36   :  { %7059 = vmatpush1.bf16.msra.mxu0 %v10197_v42 }
 0xb37   :  { %4416 = vmatpush1.bf16.msra.mxu1 %v7763_v53  ;;  %v7816_v53 = vld [vmem:[%s10783_s14 + $0x244] ss:$8 sps:$4 sm:$0xff]  }
 0xb38   :  { %4417 = vmatprep.subr.bf16.mxu1 %v7768_v58  ;;  %v10203_v58 = vpack.c.bf16 %v5063_v34, %v5061_v27  ;;  %v7834_v27 = vld [vmem:[%s10783_s14 + $0x2a4] ss:$8 sps:$4 sm:$0xff]  }
 0xb3a   :  { %7061 = vmatprep.subr.bf16.mxu0 %v10203_v58 }
 0xb3b   :  { %4418 = vmatpush1.bf16.msra.mxu1 %v7766_v59  ;;  %v5060_v59 = vld [vmem:[%s10787_s15 + $0x60] sm:$0xff] }
 0xb3c   :  { %4419 = vmatprep.subr.bf16.mxu1 %v7771_v0  ;;  %v5062_v0 = vld [vmem:[%s10787_s15 + $0x70] sm:$0xff] }
 0xb3f   :  { %4420 = vmatpush1.bf16.msra.mxu1 %v7769_v1  ;;  %v5065_v1 = vld [vmem:[%s10787_s15 + $0x88] sm:$0xff] }
 0xb40   :  { %4421 = vmatprep.subr.bf16.mxu1 %v7774_v13  ;;  %v5067_v13 = vld [vmem:[%s10787_s15 + $0x98] sm:$0xff] }
 0xb43   :  { %4422 = vmatpush1.bf16.msra.mxu1 %v7772_v15  ;;  %v7814_v15 = vld [vmem:[%s10783_s14 + $0x240] ss:$8 sps:$4 sm:$0xff]  }
 0xb44   :  { %4423 = vmatprep.subr.bf16.mxu1 %v7777_v55  ;;  %v10221_v55 = vpack.c.bf16 %v5062_v0, %v5060_v59  ;;  %v5089_v59 = vld [vmem:[%s10787_s15 + $0x148] sm:$0xff]  ;;  %v5091_v0 = vld [vmem:[%s10787_s15 + $0x158] sm:$0xff] }
 0xb46   :  { %7063 = vmatpush1.bf16.msra.mxu0 %v10221_v55 }
 0xb47   :  { %4424 = vmatpush1.bf16.msra.mxu1 %v7775_v47  ;;  %v7819_v47 = vld [vmem:[%s10783_s14 + $0x254] ss:$8 sps:$4 sm:$0xff]  }
 0xb48   :  { %4425 = vmatprep.subr.bf16.mxu1 %v7780_v16  ;;  %v10227_v16 = vpack.c.bf16 %v5067_v13, %v5065_v1  ;;  %v7832_v1 = vld [vmem:[%s10783_s14 + $0x2a0] ss:$8 sps:$4 sm:$0xff]  }
 0xb4a   :  { %7065 = vmatprep.subr.bf16.mxu0 %v10227_v16 }
 0xb4b   :  { %4426 = vmatpush1.bf16.msra.mxu1 %v7778_v26  ;;  %v5064_v26 = vld [vmem:[%s10787_s15 + $0x80] sm:$0xff] }
 0xb4c   :  { %4427 = vmatprep.subr.bf16.mxu1 %v7783_v57  ;;  %v5066_v57 = vld [vmem:[%s10787_s15 + $0x90] sm:$0xff] }
 0xb4f   :  { %4428 = vmatpush1.bf16.msra.mxu1 %v7781_v17  ;;  %v5069_v17 = vld [vmem:[%s10787_s15 + $0xa8] sm:$0xff] }
 0xb50   :  { %4429 = vmatprep.subr.bf16.mxu1 %v7786_v52  ;;  %v5071_v52 = vld [vmem:[%s10787_s15 + $0xb8] sm:$0xff] }
 0xb53   :  { %4430 = vmatpush1.bf16.msra.mxu1 %v7784_v8  ;;  %v7817_v8 = vld [vmem:[%s10783_s14 + $0x250] ss:$8 sps:$4 sm:$0xff]  }
 0xb54   :  { %4431 = vmatprep.subr.bf16.mxu1 %v7789_v9  ;;  %v10245_v9 = vpack.c.bf16 %v5066_v57, %v5064_v26  ;;  %v5088_v26 = vld [vmem:[%s10787_s15 + $0x140] sm:$0xff]  ;;  %v5090_v57 = vld [vmem:[%s10787_s15 + $0x150] sm:$0xff] }
 0xb56   :  { %7067 = vmatpush1.bf16.msra.mxu0 %v10245_v9 }
 0xb57   :  { %4432 = vmatpush1.bf16.msra.mxu1 %v7787_v50  ;;  %v7822_v50 = vld [vmem:[%s10783_s14 + $0x264] ss:$8 sps:$4 sm:$0xff]  }
 0xb58   :  { %4433 = vmatprep.subr.bf16.mxu1 %v7792_v20  ;;  %v10251_v20 = vpack.c.bf16 %v5071_v52, %v5069_v17  ;;  %v5093_v17 = vld [vmem:[%s10787_s15 + $0x168] sm:$0xff]  ;;  %v5095_v52 = vld [vmem:[%s10787_s15 + $0x178] sm:$0xff] }
 0xb5a   :  { %7069 = vmatprep.subr.bf16.mxu0 %v10251_v20 }
 0xb5b   :  { %4434 = vmatpush1.bf16.msra.mxu1 %v7790_v28  ;;  %v5068_v28 = vld [vmem:[%s10787_s15 + $0xa0] sm:$0xff] }
 0xb5c   :  { %4435 = vmatprep.subr.bf16.mxu1 %v7795_v62  ;;  %v5070_v62 = vld [vmem:[%s10787_s15 + $0xb0] sm:$0xff] }
 0xb5f   :  { %4436 = vmatpush1.bf16.msra.mxu1 %v7793_v43  ;;  %v5073_v43 = vld [vmem:[%s10787_s15 + $0xc8] sm:$0xff] }
 0xb60   :  { %4437 = vmatprep.subr.bf16.mxu1 %v7798_v19  ;;  %v5075_v19 = vld [vmem:[%s10787_s15 + $0xd8] sm:$0xff] }
 0xb61   :  { %v10275_v44 = vpack.c.bf16 %v5075_v19, %v5073_v43  ;;  %v5092_v43 = vld [vmem:[%s10787_s15 + $0x160] sm:$0xff]  ;;  %v5094_v19 = vld [vmem:[%s10787_s15 + $0x170] sm:$0xff] }
 0xb63   :  { %4438 = vmatpush1.bf16.msra.mxu1 %v7796_v38  ;;  %v7820_v38 = vld [vmem:[%s10783_s14 + $0x260] ss:$8 sps:$4 sm:$0xff]  }
 0xb64   :  { %4439 = vmatprep.subr.bf16.mxu1 %v7801_v49  ;;  %v10269_v49 = vpack.c.bf16 %v5070_v62, %v5068_v28  ;;  %v7840_v28 = vld [vmem:[%s10783_s14 + $0x2c4] ss:$8 sps:$4 sm:$0xff]   ;;  %v10395_v62 = vpack.c.bf16 %v5095_v52, %v5093_v17  ;;  %v7874_v17 = vld [vmem:[%s10783_s14 + $0x380] ss:$8 sps:$4 sm:$0xff]   ;;  %v7879_v52 = vld [vmem:[%s10783_s14 + $0x394] ss:$8 sps:$4 sm:$0xff]  }
 0xb66   :  { %7071 = vmatpush1.bf16.msra.mxu0 %v10269_v49 }
 0xb67   :  { %4440 = vmatpush1.bf16.msra.mxu1 %v7799_v2  ;;  %v5072_v2 = vld [vmem:[%s10787_s15 + $0xc0] sm:$0xff]  ;;  %7073 = vmatprep.subr.bf16.mxu0 %v10275_v44 }
 0xb68   :  { %4691 = vmatprep.subr.bf16.mxu1 %v7804_v14  ;;  %v5074_v14 = vld [vmem:[%s10787_s15 + $0xd0] sm:$0xff] }
 0xb6a   :  { %4442 = vmatmul.mubr.bf16.vlgmr.msra.gmra.mrb[48].mxu1 %v3933_v10  ;;  %v7823_v10 = vld [vmem:[%s10783_s14 + $0x270] ss:$8 sps:$4 sm:$0xff]  }
 0xb6b   :  { %4692 = vmatpush1.bf16.msra.mxu1 %v7802_v23  ;;  %4723 = vmatprep.mubr.bf16.mxu1 %v4497_v51  ;;  %v5077_v23 = vld [vmem:[%s10787_s15 + $0xe8] sm:$0xff]  ;;  %v5079_v51 = vld [vmem:[%s10787_s15 + $0xf8] sm:$0xff] }
 0xb6c   :  { %4693 = vmatprep.subr.bf16.mxu1 %v7807_v41  ;;  %v10293_v41 = vpack.c.bf16 %v5074_v14, %v5072_v2  ;;  %v7838_v2 = vld [vmem:[%s10783_s14 + $0x2c0] ss:$8 sps:$4 sm:$0xff]   ;;  %v10413_v14 = vpack.c.bf16 %v5094_v19, %v5092_v43  ;;  %v7885_v19 = vld [vmem:[%s10783_s14 + $0x3b4] ss:$8 sps:$4 sm:$0xff]  }
 0xb6d   :  { %v7880_v43 = vld [vmem:[%s10783_s14 + $0x3a0] ss:$8 sps:$4 sm:$0xff]  }
 0xb6e   :  { %7075 = vmatpush1.bf16.msra.mxu0 %v10293_v41 }
 0xb6f   :  { %4694 = vmatpush1.bf16.msra.mxu1 %v7805_v45  ;;  %v7828_v45 = vld [vmem:[%s10783_s14 + $0x284] ss:$8 sps:$4 sm:$0xff]  }
 0xb70   :  { %4695 = vmatprep.subr.bf16.mxu1 %v7810_v61  ;;  %v10299_v61 = vpack.c.bf16 %v5079_v51, %v5077_v23  ;;  %v7843_v23 = vld [vmem:[%s10783_s14 + $0x2d4] ss:$8 sps:$4 sm:$0xff]  }
 0xb72   :  { %7077 = vmatprep.subr.bf16.mxu0 %v10299_v61 }
 0xb73   :  { %4696 = vmatpush1.bf16.msra.mxu1 %v7808_v37  ;;  %v5085_v37 = vld [vmem:[%s10787_s15 + $0x128] sm:$0xff]  ;;  %7079 = vmatpush1.bf16.msra.mxu0 %v10317_v63 }
 0xb74   :  { %4697 = vmatprep.subr.bf16.mxu1 %v7813_v6  ;;  %v5087_v6 = vld [vmem:[%s10787_s15 + $0x138] sm:$0xff]  ;;  %7081 = vmatprep.subr.bf16.mxu0 %v10323_v25 }
 0xb75   :  { %v10347_v34 = vpack.c.bf16 %v5087_v6, %v5085_v37  ;;  %v7853_v37 = vld [vmem:[%s10783_s14 + $0x310] ss:$8 sps:$4 sm:$0xff]   ;;  %v7861_v6 = vld [vmem:[%s10783_s14 + $0x334] ss:$8 sps:$4 sm:$0xff]  }
 0xb77   :  { %4698 = vmatpush1.bf16.msra.mxu1 %v7811_v36  ;;  %v5084_v36 = vld [vmem:[%s10787_s15 + $0x120] sm:$0xff]  ;;  %7083 = vmatpush1.bf16.msra.mxu0 %v10341_v22 }
 0xb78   :  { %4699 = vmatprep.subr.bf16.mxu1 %v7816_v53  ;;  %v5086_v53 = vld [vmem:[%s10787_s15 + $0x130] sm:$0xff]  ;;  %7085 = vmatprep.subr.bf16.mxu0 %v10347_v34 }
 0xb79   :  { %v10365_v13 = vpack.c.bf16 %v5086_v53, %v5084_v36  ;;  %v7862_v36 = vld [vmem:[%s10783_s14 + $0x340] ss:$8 sps:$4 sm:$0xff]   ;;  %v7867_v53 = vld [vmem:[%s10783_s14 + $0x354] ss:$8 sps:$4 sm:$0xff]  }
 0xb7b   :  { %4700 = vmatpush1.bf16.msra.mxu1 %v7814_v15  ;;  %v7837_v15 = vld [vmem:[%s10783_s14 + $0x2b4] ss:$8 sps:$4 sm:$0xff]   ;;  %7087 = vmatpush1.bf16.msra.mxu0 %v10365_v13 }
 0xb7c   :  { %4701 = vmatprep.subr.bf16.mxu1 %v7819_v47  ;;  %v10371_v47 = vpack.c.bf16 %v5091_v0, %v5089_v59  ;;  %v7865_v59 = vld [vmem:[%s10783_s14 + $0x350] ss:$8 sps:$4 sm:$0xff]   ;;  %v7870_v0 = vld [vmem:[%s10783_s14 + $0x364] ss:$8 sps:$4 sm:$0xff]  }
 0xb7e   :  { %7089 = vmatprep.subr.bf16.mxu0 %v10371_v47 }
 0xb7f   :  { %4702 = vmatpush1.bf16.msra.mxu1 %v7817_v8  ;;  %v7835_v8 = vld [vmem:[%s10783_s14 + $0x2b0] ss:$8 sps:$4 sm:$0xff]  }
 0xb80   :  { %4703 = vmatprep.subr.bf16.mxu1 %v7822_v50  ;;  %v10389_v50 = vpack.c.bf16 %v5090_v57, %v5088_v26  ;;  %v7871_v26 = vld [vmem:[%s10783_s14 + $0x370] ss:$8 sps:$4 sm:$0xff]   ;;  %v7876_v57 = vld [vmem:[%s10783_s14 + $0x384] ss:$8 sps:$4 sm:$0xff]  }
 0xb82   :  { %7091 = vmatpush1.bf16.msra.mxu0 %v10389_v50 }
 0xb83   :  { %4704 = vmatpush1.bf16.msra.mxu1 %v7820_v38  ;;  %v5097_v38 = vld [vmem:[%s10787_s15 + $0x188] sm:$0xff]  ;;  %7093 = vmatprep.subr.bf16.mxu0 %v10395_v62 }
 0xb84   :  { %4705 = vmatprep.subr.bf16.mxu1 %v7825_v40  ;;  %v5099_v40 = vld [vmem:[%s10787_s15 + $0x198] sm:$0xff] }
 0xb85   :  { %v10419_v51 = vpack.c.bf16 %v5099_v40, %v5097_v38  ;;  %v7883_v38 = vld [vmem:[%s10783_s14 + $0x3b0] ss:$8 sps:$4 sm:$0xff]   ;;  %v7888_v40 = vld [vmem:[%s10783_s14 + $0x3c4] ss:$8 sps:$4 sm:$0xff]  }
 0xb86   :  { %7095 = vmatpush1.bf16.msra.mxu0 %v10413_v14 }
 0xb87   :  { %4706 = vmatpush1.bf16.msra.mxu1 %v7823_v10  ;;  %v7841_v10 = vld [vmem:[%s10783_s14 + $0x2d0] ss:$8 sps:$4 sm:$0xff]   ;;  %7097 = vmatprep.subr.bf16.mxu0 %v10419_v51 }
 0xb88   :  { %4707 = vmatprep.subr.bf16.mxu1 %v7828_v45  ;;  %v7846_v45 = vld [vmem:[%s10783_s14 + $0x2e4] ss:$8 sps:$4 sm:$0xff]  }
 0xb8b   :  { %4708 = vmatpush1.bf16.msra.mxu1 %v7826_v29  ;;  %v4496_v29 = vpack.c.bf16 %v10012_v4, %v10012_v4  ;;  %v7858_v4 = vld [vmem:[%s10783_s14 + $0x324] ss:$8 sps:$4 sm:$0xff]  }
 0xb8c   :  { %4709 = vmatprep.subr.bf16.mxu1 %v7831_v24  ;;  %v7850_v24 = vld [vmem:[%s10783_s14 + $0x300] ss:$8 sps:$4 sm:$0xff]  }
 0xb8f   :  { %4710 = vmatpush1.bf16.msra.mxu1 %v7829_v12  ;;  %v7859_v12 = vld [vmem:[%s10783_s14 + $0x330] ss:$8 sps:$4 sm:$0xff]  }
 0xb90   :  { %4711 = vmatprep.subr.bf16.mxu1 %v7834_v27  ;;  %v7864_v27 = vld [vmem:[%s10783_s14 + $0x344] ss:$8 sps:$4 sm:$0xff]  }
 0xb93   :  { %4712 = vmatpush1.bf16.msra.mxu1 %v7832_v1  ;;  %v7868_v1 = vld [vmem:[%s10783_s14 + $0x360] ss:$8 sps:$4 sm:$0xff]  }
 0xb94   :  { %4713 = vmatprep.subr.bf16.mxu1 %v7837_v15  ;;  %v7873_v15 = vld [vmem:[%s10783_s14 + $0x374] ss:$8 sps:$4 sm:$0xff]  }
 0xb97   :  { %4714 = vmatpush1.bf16.msra.mxu1 %v7835_v8  ;;  %v7877_v8 = vld [vmem:[%s10783_s14 + $0x390] ss:$8 sps:$4 sm:$0xff]  }
 0xb98   :  { %4715 = vmatprep.subr.bf16.mxu1 %v7840_v28  ;;  %v7882_v28 = vld [vmem:[%s10783_s14 + $0x3a4] ss:$8 sps:$4 sm:$0xff]  }
 0xb9b   :  { %4716 = vmatpush1.bf16.msra.mxu1 %v7838_v2  ;;  %v7886_v2 = vld [vmem:[%s10783_s14 + $0x3c0] ss:$8 sps:$4 sm:$0xff]  }
 0xb9c   :  { %4717 = vmatprep.subr.bf16.mxu1 %v7843_v23  ;;  %v7891_v23 = vld [vmem:[%s10783_s14 + $0x3d4] ss:$8 sps:$4 sm:$0xff]  }
 0xb9f   :  { %4718 = vmatpush1.bf16.msra.mxu1 %v7841_v10  ;;  %v7889_v10 = vld [vmem:[%s10783_s14 + $0x3d0] ss:$8 sps:$4 sm:$0xff]  }
 0xba0   :  { %4719 = vmatprep.subr.bf16.mxu1 %v7846_v45  ;;  %v7894_v45 = vld [vmem:[%s10783_s14 + $0x3e4] ss:$8 sps:$4 sm:$0xff]  }
 0xba3   :  { %4720 = vmatpush1.bf16.msra.mxu1 %v7844_v32  ;;  %v7892_v32 = vld [vmem:[%s10783_s14 + $0x3e0] ss:$8 sps:$4 sm:$0xff]  }
 0xba4   :  { %4721 = vmatprep.subr.bf16.mxu1 %v7849_v35  ;;  %v7897_v35 = vld [vmem:[%s10783_s14 + $0x3f4] ss:$8 sps:$4 sm:$0xff]  }
 0xba7   :  { %4722 = vmatpush1.bf16.msra.mxu1 %v7847_v54  ;;  %v7895_v54 = vld [vmem:[%s10783_s14 + $0x3f0] ss:$8 sps:$4 sm:$0xff]  }
 0xba8   :  { %4975 = vmatprep.subr.bf16.mxu1 %v7852_v3  ;;  %v4780_v3 = vpack.c.bf16 %v10103_v46, %v10103_v46  ;;  %v5103_v46 = vld [vmem:[%s10787_s15 + $0x1b8] sm:$0xff] }
 0xbaa   :  { %4724 = vmatmul.mubr.bf16.vlgmr.msra.gmra.mrb[48].mxu1 %v4496_v29  ;;  %v5096_v29 = vld [vmem:[%s10787_s15 + $0x180] sm:$0xff] }
 0xbab   :  { %4976 = vmatpush1.bf16.msra.mxu1 %v7850_v24  ;;  %5007 = vmatprep.mubr.bf16.mxu1 %v4781_v30  ;;  %v5098_v24 = vld [vmem:[%s10787_s15 + $0x190] sm:$0xff] }
 0xbac   :  { %4977 = vmatprep.subr.bf16.mxu1 %v7855_v31  ;;  %v10546_v30 = vpack.c.bf16 %v5098_v24, %v5096_v29  ;;  %v5101_v31 = vld [vmem:[%s10787_s15 + $0x1a8] sm:$0xff] }
 0xbae   :  { %7099 = vmatpush1.bf16.msra.mxu0 %v10546_v30 }
 0xbaf   :  { %4978 = vmatpush1.bf16.msra.mxu1 %v7853_v37  ;;  %v10555_v37 = vpack.c.bf16 %v5103_v46, %v5101_v31 }
 0xbb0   :  { %4979 = vmatprep.subr.bf16.mxu1 %v7858_v4  ;;  %v5100_v4 = vld [vmem:[%s10787_s15 + $0x1a0] sm:$0xff] }
 0xbb1   :  { %7101 = vmatprep.subr.bf16.mxu0 %v10555_v37 }
 0xbb3   :  { %4980 = vmatpush1.bf16.msra.mxu1 %v7856_v48  ;;  %v5102_v48 = vld [vmem:[%s10787_s15 + $0x1b0] sm:$0xff] }
 0xbb4   :  { %4981 = vmatprep.subr.bf16.mxu1 %v7861_v6  ;;  %v10563_v6 = vpack.c.bf16 %v5102_v48, %v5100_v4 }
 0xbb6   :  { %7103 = vmatpush1.bf16.msra.mxu0 %v10563_v6 }
 0xbb7   :  { %4982 = vmatpush1.bf16.msra.mxu1 %v7859_v12  ;;  %v5105_v12 = vld [vmem:[%s10787_s15 + $0x1c8] sm:$0xff] }
 0xbb8   :  { %4983 = vmatprep.subr.bf16.mxu1 %v7864_v27  ;;  %v5107_v27 = vld [vmem:[%s10787_s15 + $0x1d8] sm:$0xff] }
 0xbbb   :  { %4984 = vmatpush1.bf16.msra.mxu1 %v7862_v36  ;;  %v10573_v36 = vpack.c.bf16 %v5107_v27, %v5105_v12 }
 0xbbc   :  { %4985 = vmatprep.subr.bf16.mxu1 %v7867_v53  ;;  %v5104_v53 = vld [vmem:[%s10787_s15 + $0x1c0] sm:$0xff] }
 0xbbd   :  { %7105 = vmatprep.subr.bf16.mxu0 %v10573_v36 }
 0xbbf   :  { %4986 = vmatpush1.bf16.msra.mxu1 %v7865_v59  ;;  %v5106_v59 = vld [vmem:[%s10787_s15 + $0x1d0] sm:$0xff] }
 0xbc0   :  { %4987 = vmatprep.subr.bf16.mxu1 %v7870_v0  ;;  %v10581_v0 = vpack.c.bf16 %v5106_v59, %v5104_v53 }
 0xbc2   :  { %7107 = vmatpush1.bf16.msra.mxu0 %v10581_v0 }
 0xbc3   :  { %4988 = vmatpush1.bf16.msra.mxu1 %v7868_v1  ;;  %v5109_v1 = vld [vmem:[%s10787_s15 + $0x1e8] sm:$0xff] }
 0xbc4   :  { %4989 = vmatprep.subr.bf16.mxu1 %v7873_v15  ;;  %v5111_v15 = vld [vmem:[%s10787_s15 + $0x1f8] sm:$0xff] }
 0xbc7   :  { %4990 = vmatpush1.bf16.msra.mxu1 %v7871_v26  ;;  %v10591_v26 = vpack.c.bf16 %v5111_v15, %v5109_v1 }
 0xbc8   :  { %4991 = vmatprep.subr.bf16.mxu1 %v7876_v57  ;;  %v5108_v57 = vld [vmem:[%s10787_s15 + $0x1e0] sm:$0xff] }
 0xbc9   :  { %7109 = vmatprep.subr.bf16.mxu0 %v10591_v26 }
 0xbcb   :  { %4992 = vmatpush1.bf16.msra.mxu1 %v7874_v17  ;;  %v5110_v17 = vld [vmem:[%s10787_s15 + $0x1f0] sm:$0xff] }
 0xbcc   :  { %4993 = vmatprep.subr.bf16.mxu1 %v7879_v52  ;;  %v10599_v52 = vpack.c.bf16 %v5110_v17, %v5108_v57  ;;  %v5309_v17 = vld [vmem:[%s10790_s17] sm:$0x3] }
 0xbce   :  { %7111 = vmatpush1.bf16.msra.mxu0 %v10599_v52 }
 0xbcf   :  { %4994 = vmatpush1.bf16.msra.mxu1 %v7877_v8  ;;  %7113 = vmatprep.subr.bf16.mxu0 %v10141_v21 }
 0xbd0   :  { %4995 = vmatprep.subr.bf16.mxu1 %v7882_v28 }
 0xbd3   :  { %4996 = vmatpush1.bf16.msra.mxu1 %v7880_v43 }
 0xbd4   :  { %4997 = vmatprep.subr.bf16.mxu1 %v7885_v19 }
 0xbd7   :  { %4998 = vmatpush1.bf16.msra.mxu1 %v7883_v38 }
 0xbd8   :  { %4999 = vmatprep.subr.bf16.mxu1 %v7888_v40 }
 0xbdb   :  { %5000 = vmatpush1.bf16.msra.mxu1 %v7886_v2 }
 0xbdc   :  { %5001 = vmatprep.subr.bf16.mxu1 %v7891_v23 }
 0xbdf   :  { %5002 = vmatpush1.bf16.msra.mxu1 %v7889_v10 }
 0xbe0   :  { %5003 = vmatprep.subr.bf16.mxu1 %v7894_v45 }
 0xbe3   :  { %5004 = vmatpush1.bf16.msra.mxu1 %v7892_v32 }
 0xbe4   :  { %5005 = vmatprep.subr.bf16.mxu1 %v7897_v35 }
 0xbe7   :  { %5006 = vmatpush1.bf16.msra.mxu1 %v7895_v54 }
 0xbea   :  { %5008 = vmatmul.mubr.bf16.vlgmr.msra.gmra.mrb[48].mxu1 %v4780_v3 }
 0xcbd   :  { %v10604_v8 = vpop.f32.mrb[48].mxu1 }
 0xcbe   :  { %v5018_v28 = vsel %vm3885_vm2, %v10604_v8, 0.0  ;;  %v10608_v43 = vpop.f32.mrb[49].mxu1 }
 0xcbf   :  { %v5019_v19 = vrot.slane %v5018_v28, 4  ;;  %v5025_v38 = vsel %vm3885_vm2, %v10608_v43, 0.0  ;;  %v5033_v40 = vmul.f32 %v10608_v43, %v10608_v43  ;;  %v5013_v2 = vpop.f32.mrb[50].mxu1 }
 0xcc0   :  { %v5026_v23 = vrot.slane %v5025_v38, 4  ;;  %v5014_v10 = vpop.f32.mrb[51].mxu1 }
 0xcc1   :  { %v5020_v45 = vadd.f32 %v5019_v19, %v5018_v28  ;;  %v5041_v21 = vsel %vm3885_vm2, %v5033_v40, 0.0  ;;  %v5318_v28 = vrot.slane %v5309_v17, %v9107_v56  ;;  %v5314_v19 = vrot.slane %v5309_v17, %v9092_v18 }
 0xcc2   :  { %v5027_v32 = vadd.f32 %v5026_v23, %v5025_v38  ;;  %v5042_v35 = vrot.slane %v5041_v21, 4 }
 0xcc3   :  { %v5021_v54 = vrot.slane %v5020_v45, 2 }
 0xcc4   :  { %v5028_v3 = vrot.slane %v5027_v32, 2  ;;  %v5043_v29 = vadd.f32 %v5042_v35, %v5041_v21 }
 0xcc5   :  { %v5022_v24 = vadd.f32 %v5021_v54, %v5020_v45 }
 0xcc6   :  { %v5029_v31 = vadd.f32 %v5028_v3, %v5027_v32  ;;  %v5044_v46 = vrot.slane %v5043_v29, 2  ;;  %v6609_v3 = vld [vmem:[%s10791_s18 + $0x1] sm:$0x1] }
 0xcc7   :  { %v5023_v4 = vrot.slane %v5022_v24, 1 }
 0xcc8   :  { %v5030_v48 = vrot.slane %v5029_v31, 1  ;;  %v5045_v12 = vadd.f32 %v5044_v46, %v5043_v29  ;;  %v7899_v29 = vld [vmem:[%s10788_s19 + $0x80] sm:$0xff]   ;;  %v7903_v46 = vld [vmem:[%s10788_s19 + $0x90] sm:$0xff]  }
 0xcc9   :  { %v5024_v59 = vadd.f32 %v5023_v4, %v5022_v24  ;;  %v7900_v24 = vld [vmem:[%s10788_s19 + $0xc8] sm:$0xff]   ;;  %v7904_v4 = vld [vmem:[%s10788_s19 + $0xd8] sm:$0xff]  }
 0xcca   :  { %v5031_v27 = vadd.f32 %v5030_v48, %v5029_v31  ;;  %v5046_v53 = vrot.slane %v5045_v12, 1  ;;  %v7901_v31 = vld [vmem:[%s10788_s19 + $0x88] sm:$0xff]   ;;  %v7905_v48 = vld [vmem:[%s10788_s19 + $0x98] sm:$0xff]  }
 0xccc   :  { %5176 = vmatprep.mubr.f32.mxu0 %v5031_v27  ;;  %v5047_v1 = vadd.f32 %v5046_v53, %v5045_v12  ;;  %v7906_v12 = vld [vmem:[%s10788_s19 + $0xe0] sm:$0xff]   ;;  %v7908_v53 = vld [vmem:[%s10788_s19 + $0xe8] sm:$0xff]  }
 0xccd   :  { %5177 = vmatmul.mubr.f32.vlgmr.msra.gmra.mrb[40].mxu0 %v5024_v59  ;;  %v7907_v27 = vld [vmem:[%s10788_s19 + $0xa0] sm:$0xff]   ;;  %v7909_v59 = vld [vmem:[%s10788_s19 + $0xa8] sm:$0xff]  }
 0xcce   :  { %7115 = vmatpush1.bf16.msra.mxu0 %v10152_v5  ;;  %5249 = vmatprep.mubr.f32.mxu0 %v5047_v1  ;;  %v5032_v5 = vmul.f32 %v10604_v8, %v10604_v8  ;;  %v7910_v1 = vld [vmem:[%s10788_s19 + $0xf0] sm:$0xff]  }
 0xccf   :  { %7117 = vmatprep.subr.bf16.mxu0 %v10154_v11 }
 0xcd0   :  { %v5034_v11 = vsel %vm3885_vm2, %v5032_v5, 0.0  ;;  %v7911_v5 = vld [vmem:[%s10788_s19 + $0xb0] sm:$0xff]  }
 0xcd2   :  { %7119 = vmatpush1.bf16.msra.mxu0 %v10173_v60  ;;  %v5035_v60 = vrot.slane %v5034_v11, 4 }
 0xcd3   :  { %7121 = vmatprep.subr.bf16.mxu0 %v10179_v7 }
 0xcd4   :  { %v5036_v7 = vadd.f32 %v5035_v60, %v5034_v11  ;;  %v7912_v11 = vld [vmem:[%s10788_s19 + $0xf8] sm:$0xff]  }
 0xcd5   :  { %v7913_v60 = vld [vmem:[%s10788_s19 + $0xb8] sm:$0xff]  }
 0xcd6   :  { %7123 = vmatpush1.bf16.msra.mxu0 %v10197_v42  ;;  %v5037_v42 = vrot.slane %v5036_v7, 2 }
 0xcd7   :  { %7125 = vmatprep.subr.bf16.mxu0 %v10203_v58 }
 0xcd8   :  { %v5038_v58 = vadd.f32 %v5037_v42, %v5036_v7  ;;  %v7914_v7 = vld [vmem:[%s10788_s19 + $0x40] sm:$0xff]  }
 0xcda   :  { %7127 = vmatpush1.bf16.msra.mxu0 %v10221_v55  ;;  %v5039_v55 = vrot.slane %v5038_v58, 1 }
 0xcdb   :  { %7129 = vmatprep.subr.bf16.mxu0 %v10227_v16 }
 0xcdc   :  { %v5040_v16 = vadd.f32 %v5039_v55, %v5038_v58 }
 0xcde   :  { %7131 = vmatpush1.bf16.msra.mxu0 %v10245_v9 }
 0xcdf   :  { %7133 = vmatprep.subr.bf16.mxu0 %v10251_v20 }
 0xce2   :  { %7135 = vmatpush1.bf16.msra.mxu0 %v10269_v49 }
 0xce3   :  { %7137 = vmatprep.subr.bf16.mxu0 %v10275_v44 }
 0xce6   :  { %7139 = vmatpush1.bf16.msra.mxu0 %v10293_v41 }
 0xce7   :  { %7141 = vmatprep.subr.bf16.mxu0 %v10299_v61 }
 0xcea   :  { %7143 = vmatpush1.bf16.msra.mxu0 %v10317_v63 }
 0xceb   :  { %7145 = vmatprep.subr.bf16.mxu0 %v10323_v25 }
 0xcee   :  { %7147 = vmatpush1.bf16.msra.mxu0 %v10341_v22 }
 0xcef   :  { %7149 = vmatprep.subr.bf16.mxu0 %v10347_v34 }
 0xcf2   :  { %7151 = vmatpush1.bf16.msra.mxu0 %v10365_v13 }
 0xcf3   :  { %7153 = vmatprep.subr.bf16.mxu0 %v10371_v47 }
 0xcf6   :  { %7155 = vmatpush1.bf16.msra.mxu0 %v10389_v50 }
 0xcf7   :  { %7157 = vmatprep.subr.bf16.mxu0 %v10395_v62 }
 0xcfa   :  { %7159 = vmatpush1.bf16.msra.mxu0 %v10413_v14 }
 0xcfb   :  { %7161 = vmatprep.subr.bf16.mxu0 %v10419_v51 }
 0xcfe   :  { %7163 = vmatpush1.bf16.msra.mxu0 %v10546_v30 }
 0xcff   :  { %7165 = vmatprep.subr.bf16.mxu0 %v10555_v37 }
 0xd02   :  { %7167 = vmatpush1.bf16.msra.mxu0 %v10563_v6 }
 0xd03   :  { %7169 = vmatprep.subr.bf16.mxu0 %v10573_v36 }
 0xd06   :  { %7171 = vmatpush1.bf16.msra.mxu0 %v10581_v0 }
 0xd07   :  { %7173 = vmatprep.subr.bf16.mxu0 %v10591_v26  ;;  %v5262_v26 = vld [vmem:[%s10789_s16] sm:$0x3] }
 0xd0a   :  { %7175 = vmatpush1.bf16.msra.mxu0 %v10599_v52 }
 0xd0d   :  { %5250 = vmatmul.mubr.f32.vlgmr.msra.gmra.mrb[42].mxu0 %v5040_v16 }
 0xd0e   :  { %5375 = vmatprep.mubr.bf16.mxu0 %v7946_v33 }
 0xda0   :  { %v5178_v9 = vpop.f32.mrb[40].mxu0 }
 0xda1   :  { %v5183_v20 = vmul.f32 0.125, %v5178_v9  ;;  %v5180_v49 = vpop.f32.mrb[41].mxu0 }
 0xda2   :  { %v5184_v44 = vmul.f32 0.125, %v5180_v49 }
 0xda3   :  { %v5289_v41 = vrot.slane %v5183_v20, %v9092_v18  ;;  %v5258_v34 = vmul.f32 %v5183_v20, %v5183_v20 }
 0xda4   :  { %v5293_v61 = vrot.slane %v5184_v44, %v9092_v18  ;;  %v5259_v50 = vmul.f32 %v5184_v44, %v5184_v44 }
 0xda5   :  { %v5294_v63 = vsub.f32 %v10604_v8, %v5289_v41  ;;  %v7915_v41 = vld [vmem:[%s10788_s19] sm:$0xff]  }
 0xda6   :  { %v5295_v25 = vsub.f32 %v10608_v43, %v5293_v61 }
 0xde0   :  { %v5251_v22 = vpop.f32.mrb[42].mxu0 }
 0xde1   :  { %v5256_v13 = vmul.f32 0.125, %v5251_v22  ;;  %v5253_v47 = vpop.f32.mrb[43].mxu0 }
 0xde2   :  { %v5257_v62 = vmul.f32 0.125, %v5253_v47  ;;  %v7919_v47 = vld [vmem:[%s10788_s19 + $0x10] sm:$0xff]  }
 0xde3   :  { %v5260_v14 = vsub.f32 %v5256_v13, %v5258_v34  ;;  %v7917_v34 = vld [vmem:[%s10788_s19 + $0x8] sm:$0xff]   ;;  %v7918_v13 = vld [vmem:[%s10788_s19 + $0x50] sm:$0xff]  }
 0xde4   :  { %v5261_v51 = vsub.f32 %v5257_v62, %v5259_v50  ;;  %v7920_v50 = vld [vmem:[%s10788_s19 + $0x58] sm:$0xff]  }
 0xde5   :  { %v5263_v30 = vadd.f32 1e-05, %v5260_v14  ;;  %v7921_v62 = vld [vmem:[%s10788_s19 + $0x18] sm:$0xff]   ;;  %v7922_v14 = vld [vmem:[%s10788_s19 + $0x60] sm:$0xff]  }
 0xde6   :  { %v5264_v37 = vadd.f32 1e-05, %v5261_v51  ;;  %v7923_v51 = vld [vmem:[%s10788_s19 + $0x20] sm:$0xff]  }
 0xde7   :  { %7938 = vrsqrt.f32 %v5263_v30  ;;  %v7924_v30 = vld [vmem:[%s10788_s19 + $0x68] sm:$0xff]  }
 0xde8   :  { %7940 = vrsqrt.f32 %v5264_v37  ;;  %v7925_v37 = vld [vmem:[%s10788_s19 + $0x28] sm:$0xff]  }
 0xdf1   :  { %v7939_v6 = vpop.eup %7938 }
 0xdf2   :  { %v7941_v36 = vpop.eup %7940 }
 0xdf3   :  { %v5269_v0 = vcombine.low %v7939_v6, %v7941_v36  ;;  %v7926_v6 = vld [vmem:[%s10788_s19 + $0x70] sm:$0xff]  }
 0xdf4   :  { %v7927_v36 = vld [vmem:[%s10788_s19 + $0x30] sm:$0xff]  }
 0xdf5   :  { %v5276_v15 = vrot.slane %v5269_v0, %v9100_v39  ;;  %v7928_v0 = vld [vmem:[%s10788_s19 + $0x78] sm:$0xff]  }
 0xdf7   :  { %v5283_v57 = vrot.slane %v5276_v15, %v9100_v39  ;;  %v7929_v15 = vld [vmem:[%s10788_s19 + $0x38] sm:$0xff]  }
 0xdf9   :  { %v5285_v52 = vmul.f32 %v5283_v57, %v5262_v26 }
 0xdfb   :  { %v5304_v8 = vrot.slane %v5285_v52, %v9107_v56  ;;  %v5300_v43 = vrot.slane %v5285_v52, %v9092_v18  ;;  %v5331_v18 = vld [vmem:[%s10791_s18] sm:$0x1] }
 0xdfc   :  { %v7898_v56 = vld [vmem:[%s10788_s19 + $0xc0] sm:$0xff]  }
 0xdfd   :  { %v5308_v38 = vmul.f32 %v5304_v8, %v5295_v25  ;;  %v5307_v40 = vmul.f32 %v5300_v43, %v5294_v63  ;;  %v7916_v25 = vld [vmem:[%s10788_s19 + $0x48] sm:$0xff]  }
 0xdff   :  { %v5322_v2 = vadd.f32 %v5318_v28, %v5308_v38  ;;  %v5321_v23 = vadd.f32 %v5314_v19, %v5307_v40 }
 0xe01   :  { %vm5324_vm4 = vcmp.gt.f32.partialorder %v5322_v2, 0.0  ;;  %v5326_v10 = vmul.f32 0.2, %v5322_v2  ;;  %vm5323_vm5 = vcmp.gt.f32.partialorder %v5321_v23, 0.0  ;;  %v5325_v39 = vmul.f32 0.2, %v5321_v23 }
 0xe03   :  { %v5328_v45 = vsel %vm5324_vm4, %v5322_v2, %v5326_v10  ;;  %v5327_v21 = vsel %vm5323_vm5, %v5321_v23, %v5325_v39 }
 0xe04   :  { %v5330_v32 = vpack.c.bf16 %v5328_v45, %v5328_v45  ;;  %v5329_v35 = vpack.c.bf16 %v5327_v21, %v5327_v21 }
 0xe06   :  { %6607 = vmatprep.subr.msk.bf16.mxu0 %vm5336_vm6, %v5330_v32  ;;  %v5338_v54 = vsel %vm5336_vm6, %v5329_v35, 0 }
 0xe07   :  { %5344 = vmatpush1.bf16.msra.mxu0 %v5338_v54 }
 0xe08   :  { %6610 = vmatprep.subr.msk.bf16.mxu0 %vm5336_vm6, %v5330_v32 }
 0xe0a   :  { %6608 = vmatmul.mubr.msk.bf16.vlgmr.msra.gmra.mrb[44].mxu0 %vm5332_vm7, %v5331_v18 }
 0xe0b   :  { %5424 = vmatpush1.bf16.msra.mxu0 %v5338_v54  ;;  %5455 = vmatprep.mubr.bf16.mxu0 %v7946_v33  ;;  %v7902_v33 = vld [vmem:[%s10788_s19 + $0xd0] sm:$0xff]  }
 0xe0c   :  { %6700 = vmatprep.subr.bf16.mxu0 %v7898_v56 }
 0xe12   :  { %6611 = vmatmul.mubr.msk.bf16.vlgmr.msra.gmra.mrb[48].mxu0 %vm5332_vm7, %v6609_v3 }
 0xe13   :  { %6701 = vmatpush3.bf16.msra.mxu0 %v7899_v29 }
 0xe14   :  { %6702 = vmatprep.subr.bf16.mxu0 %v7900_v24 }
 0xe17   :  { %6703 = vmatpush3.bf16.msra.mxu0 %v7901_v31 }
 0xe18   :  { %6704 = vmatprep.subr.bf16.mxu0 %v7902_v33 }
 0xe1b   :  { %6705 = vmatpush3.bf16.msra.mxu0 %v7903_v46 }
 0xe1c   :  { %6706 = vmatprep.subr.bf16.mxu0 %v7904_v4 }
 0xe1f   :  { %6707 = vmatpush3.bf16.msra.mxu0 %v7905_v48 }
 0xe20   :  { %6708 = vmatprep.subr.bf16.mxu0 %v7906_v12 }
 0xe23   :  { %6709 = vmatpush3.bf16.msra.mxu0 %v7907_v27 }
 0xe24   :  { %6710 = vmatprep.subr.bf16.mxu0 %v7908_v53 }
 0xe27   :  { %6711 = vmatpush3.bf16.msra.mxu0 %v7909_v59 }
 0xe28   :  { %6712 = vmatprep.subr.bf16.mxu0 %v7910_v1 }
 0xe2b   :  { %6713 = vmatpush3.bf16.msra.mxu0 %v7911_v5 }
 0xe2c   :  { %6714 = vmatprep.subr.bf16.mxu0 %v7912_v11 }
 0xe2f   :  { %6715 = vmatpush3.bf16.msra.mxu0 %v7913_v60 }
 0xe30   :  { %6722 = vmatprep.subr.bf16.mxu0 %v7914_v7 }
 0xedd   :  { %v5377_v42 = vpop.f32.mrb[44].mxu0 }
 0xede   :  { %v5379_v58 = vpop.f32.mrb[45].mxu0  ;;  %v5384_v26 = vpack.c.bf16 %v5377_v42, %v5377_v42 }
 0xedf   :  { %v5381_v55 = vpop.f32.mrb[46].mxu0  ;;  %v5385_v22 = vpack.c.bf16 %v5379_v58, %v5379_v58 }
 0xee0   :  { %v5382_v16 = vpop.f32.mrb[47].mxu0 }
 0xee5   :  { %v5457_v9 = vpop.f32.mrb[48].mxu0 }
 0xee6   :  { %v5459_v20 = vpop.f32.mrb[49].mxu0  ;;  %v5464_v61 = vpack.c.bf16 %v5457_v9, %v5457_v9 }
 0xee7   :  { %v5465_v49 = vpack.c.bf16 %v5459_v20, %v5459_v20  ;;  %v5461_v44 = vpop.f32.mrb[50].mxu0 }
 0xee8   :  { %v5462_v63 = vpop.f32.mrb[51].mxu0 }
 0xee9   :  { %5627 = vmatprep.mubr.bf16.mxu0 %v5465_v49 }
 0xeea   :  { %5628 = vmatmul.mubr.bf16.vlgmr.msra.gmra.mrb[52].mxu0 %v5464_v61 }
 0xeeb   :  { %6723 = vmatpush3.bf16.msra.mxu0 %v7915_v41  ;;  %5763 = vmatprep.mubr.bf16.mxu0 %v5385_v22 }
 0xeec   :  { %6724 = vmatprep.subr.bf16.mxu0 %v7916_v25 }
 0xeef   :  { %6725 = vmatpush3.bf16.msra.mxu0 %v7917_v34 }
 0xef0   :  { %6726 = vmatprep.subr.bf16.mxu0 %v7918_v13 }
 0xef3   :  { %6727 = vmatpush3.bf16.msra.mxu0 %v7919_v47 }
 0xef4   :  { %6728 = vmatprep.subr.bf16.mxu0 %v7920_v50 }
 0xef7   :  { %6729 = vmatpush3.bf16.msra.mxu0 %v7921_v62 }
 0xef8   :  { %6730 = vmatprep.subr.bf16.mxu0 %v7922_v14 }
 0xefb   :  { %6731 = vmatpush3.bf16.msra.mxu0 %v7923_v51 }
 0xefc   :  { %6732 = vmatprep.subr.bf16.mxu0 %v7924_v30 }
 0xeff   :  { %6733 = vmatpush3.bf16.msra.mxu0 %v7925_v37 }
 0xf00   :  { %6734 = vmatprep.subr.bf16.mxu0 %v7926_v6 }
 0xf03   :  { %6735 = vmatpush3.bf16.msra.mxu0 %v7927_v36 }
 0xf04   :  { %6736 = vmatprep.subr.bf16.mxu0 %v7928_v0 }
 0xf07   :  { %6737 = vmatpush3.bf16.msra.mxu0 %v7929_v15 }
 0xf0a   :  { %5764 = vmatmul.mubr.bf16.vlgmr.msra.gmra.mrb[56].mxu0 %v5384_v26 }
 0xfbd   :  { %v6716_v57 = vpop.f32.mrb[52].mxu0 }
 0xfbe   :  { %v6717_v17 = vpop.f32.mrb[53].mxu0 }
 0xfbf   :  { %v6718_v52 = vadd.f32 %v6717_v17, %v6716_v57  ;;  %v6719_v8 = vpop.f32.mrb[54].mxu0 }
 0xfc0   :  { %v6720_v28 = vpop.f32.mrb[55].mxu0 }
 0xfdd   :  { %v6738_v43 = vpop.f32.mrb[56].mxu0 }
 0xfde   :  { %v6739_v19 = vpop.f32.mrb[57].mxu0 }
 0xfdf   :  { %v6740_v38 = vadd.f32 %v6739_v19, %v6738_v43  ;;  %v6741_v40 = vpop.f32.mrb[58].mxu0 }
 0xfe0   :  { %v6742_v2 = vpop.f32.mrb[59].mxu0 }
 0xfe1   :  { %v5766_v23 = vadd.f32 %v6740_v38, %v6718_v52 }
 0xfe3   :  { %v5771_v10 = vsub.f32 0.0, %v5766_v23 }
 0xfe5   :  { %v5772_v39 = vmul.f32 1.442695, %v5771_v10 }
 0xfe7   :  { %7942 = vpow2.f32 %v5772_v39 }
 0xff1   :  { %v7943_v45 = vpop.eup %7942 }
 0xff2   :  { %v5774_v21 = vadd.f32 1.0, %v7943_v45 }
 0xff4   :  { %7944 = vrcp.f32 %v5774_v21 }
 0xffe   :  { %v7945_v32 = vpop.eup %7944 }
 0xfff   :  { %5778 = vst.msk [vmem:[%s10792_s20] sm:$0x3] %vm5777_vm8, %v7945_v32 }

</bundles_post_ra>
